<compile_context>
chip_gen: v6e
topology: v6e:2x2x1
jax: 0.10.0
libtpu: 0.0.40
codegen_flags: <defaults>
</compile_context>

<pallas_src>
import jax
import jax.numpy as jnp
from jax.experimental import pallas as pl
from jax.experimental.pallas import tpu as pltpu

# ----------------------------- small synthetic config -----------------------
BATCH = 2
CHANNELS = 3
IMG = 16
PATCH = 4
GRID = IMG // PATCH
NUM_PATCHES = GRID * GRID               # 16
SEQ = NUM_PATCHES + 1                   # 17 (CLS + patches)
SEQ_PAD = 24                            # padded to a multiple of 8 sublanes
HIDDEN = 32
NUM_HEADS = 2
HEAD_DIM = HIDDEN // NUM_HEADS
MLP_DIM = 4 * HIDDEN                    # 128
NUM_LAYERS = 2
EXPANSION = 4                           # head expansion (default 4)
HEAD_LAYERS = 3                         # head "layers" (default 3)
LN_EPS = 1e-6
PATCH_FEAT = CHANNELS * PATCH * PATCH   # 48
LBIAS_W = max(MLP_DIM, 3 * HIDDEN)      # lane width of the packed bias block


def _layer_norm(x, w, b):
    mu = jnp.mean(x, axis=-1, keepdims=True)
    var = jnp.mean(jnp.square(x - mu), axis=-1, keepdims=True)
    return (x - mu) * jax.lax.rsqrt(var + LN_EPS) * w + b


# ----------------------------- fused kernel (one image per grid step) -------
def _fused_kernel(patches_ref, pw_ref, addall_ref, lvecs_ref, wqkv_ref,
                  lbias_ref, wo_ref, w1_ref, w2_ref, gvecs_ref,
                  wfirst_ref, headb_ref, wmid_ref, wtail_ref, btail_ref,
                  o_ref):
    f32 = jnp.float32

    # positional masks: row 0 = CLS, rows 1..16 = patches, rows 17..23 = pad
    row_ids = jax.lax.broadcasted_iota(jnp.int32, (SEQ_PAD, 1), 0)
    cls_mask = (row_ids == 0).astype(f32)
    patch_mask = jnp.logical_and(row_ids >= 1, row_ids < SEQ).astype(f32)
    col_ids = jax.lax.broadcasted_iota(jnp.int32, (1, SEQ_PAD), 1)
    key_bias = jnp.where(col_ids < SEQ, 0.0, -1e30).astype(f32)  # mask pad keys

    # patch embedding; CLS token / pos-embed / conv bias folded into `addall`
    x = jnp.dot(patches_ref[...], pw_ref[...], preferred_element_type=f32)
    x = x + addall_ref[...]                                      # (S_pad, H)

    for l in range(NUM_LAYERS):                                  # static unroll
        lv = lvecs_ref[l]                                        # (8, H)
        lb = lbias_ref[l]                                        # (2, LBIAS_W)
        ln1_w, ln1_b = lv[0:1], lv[1:2]
        ln2_w, ln2_b = lv[2:3], lv[3:4]
        bo, b2 = lv[4:5], lv[5:6]                                # layer-scale folded
        bqkv = lb[0:1, :3 * HIDDEN]
        b1 = lb[1:2, :MLP_DIM]

        # ---- self attention (pre-LN); 1/sqrt(HD) folded into wq/bq ----
        h = _layer_norm(x, ln1_w, ln1_b)
        qkv = jnp.dot(h, wqkv_ref[l], preferred_element_type=f32) + bqkv
        ctx_heads = []
        for hd in range(NUM_HEADS):                              # static lane slices
            q = qkv[:, hd * HEAD_DIM:(hd + 1) * HEAD_DIM]
            k = qkv[:, HIDDEN + hd * HEAD_DIM:HIDDEN + (hd + 1) * HEAD_DIM]
            v = qkv[:, 2 * HIDDEN + hd * HEAD_DIM:2 * HIDDEN + (hd + 1) * HEAD_DIM]
            s = jax.lax.dot_general(q, k, (((1,), (1,)), ((), ())),
                                    preferred_element_type=f32)  # (S_pad, S_pad)
            s = s + key_bias
            s = s - jnp.max(s, axis=-1, keepdims=True)
            p = jnp.exp(s)
            p = p * pl.reciprocal(jnp.sum(p, axis=-1, keepdims=True), approx=True)
            ctx_heads.append(jnp.dot(p, v, preferred_element_type=f32))
        ctx = jnp.concatenate(ctx_heads, axis=-1)                # (S_pad, H)
        x = x + jnp.dot(ctx, wo_ref[l], preferred_element_type=f32) + bo

        # ---- MLP (pre-LN); tanh GELU routes through the EUP ----
        h = _layer_norm(x, ln2_w, ln2_b)
        m = jnp.dot(h, w1_ref[l], preferred_element_type=f32) + b1
        m = jax.nn.gelu(m, approximate=True)
        x = x + jnp.dot(m, w2_ref[l], preferred_element_type=f32) + b2

    # ---- final backbone LayerNorm + masked pooling ----
    gv = gvecs_ref[...]
    h = _layer_norm(x, gv[0:1], gv[1:2])
    cls_tok = jnp.sum(h * cls_mask, axis=0, keepdims=True)               # (1, H)
    patch_mean = (jnp.sum(h * patch_mask, axis=0, keepdims=True)
                  * (1.0 / NUM_PATCHES))                                 # (1, H)
    feat = jnp.concatenate([cls_tok, patch_mean], axis=-1)               # (1, 2H)

    # ---- scorer head (prefix + activation-free tail folded offline) ----
    hb = headb_ref[...]                                                  # (2, exp)
    y = jnp.maximum(jnp.dot(feat, wfirst_ref[...], preferred_element_type=f32)
                    + hb[0:1], 0.0)
    for _ in range(HEAD_LAYERS - 1):                 # remaining shared mids
        y = jnp.maximum(jnp.dot(y, wmid_ref[...], preferred_element_type=f32)
                        + hb[1:2], 0.0)
    score = (jnp.dot(y, wtail_ref[...], preferred_element_type=f32)
             + btail_ref[...])                                           # (1, 1)
    o_ref[...] = score.reshape(1, 1, 1)


# ----------------------------- full forward ---------------------------------
def _full_spec(arr):
    if arr.ndim == 2:
        return pl.BlockSpec(arr.shape, lambda b: (0, 0))
    return pl.BlockSpec(arr.shape, lambda b: (0, 0, 0))


@jax.jit
def dinov2_aesthetic_score(pixels, kp):
    B = pixels.shape[0]
    # im2col of Conv2d(kernel=PATCH, stride=PATCH); feature index c*P*P+kh*P+kw
    patches = pixels.reshape(B, CHANNELS, GRID, PATCH, GRID, PATCH)
    patches = patches.transpose(0, 2, 4, 1, 3, 5).reshape(B, NUM_PATCHES, PATCH_FEAT)
    # zero row 0 (CLS slot) + zero rows 17..23 (sequence pad) -> (B*S_pad, F)
    patches = jnp.pad(patches, ((0, 0), (1, SEQ_PAD - SEQ), (0, 0)))
    patches = patches.reshape(B * SEQ_PAD, PATCH_FEAT)

    weights = (kp['patch_w'], kp['addall'], kp['lvecs'], kp['wqkv'], kp['lbias'],
               kp['wo'], kp['w1'], kp['w2'], kp['gvecs'],
               kp['w_first'], kp['head_b'], kp['w_mid'], kp['w_tail'], kp['b_tail'])

    in_specs = ([pl.BlockSpec((SEQ_PAD, PATCH_FEAT), lambda b: (b, 0))]
                + [_full_spec(w) for w in weights])

    out = pl.pallas_call(
        _fused_kernel,
        out_shape=jax.ShapeDtypeStruct((B, 1, 1), jnp.float32),
        grid=(B,),
        in_specs=in_specs,
        out_specs=pl.BlockSpec((1, 1, 1), lambda b: (b, 0, 0)),
        compiler_params=pltpu.CompilerParams(
            dimension_semantics=("parallel",)),
    )(patches, *weights)
    # TODO(synk): at real DINOv2 sizes switch to bf16 weights (MXU operands
    # only on v5e), add a layer/half-layer grid axis sized for v7x's 64 MiB
    # VMEM, and set an explicit vmem_limit_bytes in CompilerParams.
    return out.reshape((B,))                     # .squeeze() -> (B,)


# ----------------------------- deterministic parameter init -----------------
def _dense(key, fan_in, fan_out):
    kw, kb = jax.random.split(key)
    w = jax.random.normal(kw, (fan_in, fan_out), jnp.float32) * (fan_in ** -0.5)
    b = jax.random.normal(kb, (1, fan_out), jnp.float32) * 0.01
    return w, b


def init_params(key):
    """PyTorch-convention parameters (un-fused, un-stacked)."""
    keys = iter(jax.random.split(key, 64))
    params = {}
    params['cls_token'] = jax.random.normal(next(keys), (1, 1, HIDDEN), jnp.float32) * 0.02
    params['pos_embed'] = jax.random.normal(next(keys), (1, SEQ, HIDDEN), jnp.float32) * 0.02
    params['patch_w'], params['patch_b'] = _dense(next(keys), PATCH_FEAT, HIDDEN)

    layers = []
    for _ in range(NUM_LAYERS):
        p = {}
        p['ln1_w'] = jnp.ones((1, HIDDEN), jnp.float32)
        p['ln1_b'] = jnp.zeros((1, HIDDEN), jnp.float32)
        p['wq'], p['bq'] = _dense(next(keys), HIDDEN, HIDDEN)
        p['wk'], p['bk'] = _dense(next(keys), HIDDEN, HIDDEN)
        p['wv'], p['bv'] = _dense(next(keys), HIDDEN, HIDDEN)
        p['wo'], p['bo'] = _dense(next(keys), HIDDEN, HIDDEN)
        p['ls1'] = jnp.full((1, 1, HIDDEN), 0.1, jnp.float32)
        p['ln2_w'] = jnp.ones((1, HIDDEN), jnp.float32)
        p['ln2_b'] = jnp.zeros((1, HIDDEN), jnp.float32)
        p['w1'], p['b1'] = _dense(next(keys), HIDDEN, MLP_DIM)
        p['w2'], p['b2'] = _dense(next(keys), MLP_DIM, HIDDEN)
        p['ls2'] = jnp.full((1, 1, HIDDEN), 0.1, jnp.float32)
        layers.append(p)
    params['layers'] = layers

    params['final_ln_w'] = jnp.ones((1, HIDDEN), jnp.float32)
    params['final_ln_b'] = jnp.zeros((1, HIDDEN), jnp.float32)

    two_h = 2 * HIDDEN
    exp_h = two_h * EXPANSION
    hp = {}
    hp['w_in'], hp['b_in'] = _dense(next(keys), two_h, exp_h)
    hp['w_mid'], hp['b_mid'] = _dense(next(keys), exp_h, exp_h)   # shared across repeats
    hp['w_out'], hp['b_out'] = _dense(next(keys), exp_h, two_h)
    hp['w_a'], hp['b_a'] = _dense(next(keys), two_h, HIDDEN)
    hp['w_b'], hp['b_b'] = _dense(next(keys), HIDDEN, HIDDEN // 2)
    hp['w_c'], hp['b_c'] = _dense(next(keys), HIDDEN // 2, 1)
    params['head'] = hp
    return params


def prepare_params(params):
    """One-time offline prep: pack/stack per-layer weights, fold scales/head."""
    kp = {'patch_w': params['patch_w']}

    # CLS token + pos-embed + patch bias folded into one additive tensor,
    # zero-padded to SEQ_PAD rows.
    cls = params['cls_token'].reshape(1, HIDDEN)
    pos = params['pos_embed'].reshape(SEQ, HIDDEN)
    pb = params['patch_b'].reshape(1, HIDDEN)
    kp['addall'] = jnp.concatenate(
        [cls + pos[:1], pos[1:] + pb,
         jnp.zeros((SEQ_PAD - SEQ, HIDDEN), jnp.float32)], axis=0)   # (S_pad, H)

    scale = HEAD_DIM ** -0.5
    lvecs, wqkv, lbias, wo_ls, w1, w2_ls = [], [], [], [], [], []
    for p in params['layers']:
        ls1 = p['ls1'].reshape(1, HIDDEN)
        ls2 = p['ls2'].reshape(1, HIDDEN)
        bo = p['bo'] * ls1                                 # fold layer scale 1
        b2 = p['b2'] * ls2                                 # fold layer scale 2
        lvecs.append(jnp.concatenate(
            [p['ln1_w'], p['ln1_b'], p['ln2_w'], p['ln2_b'], bo, b2,
             jnp.zeros((2, HIDDEN), jnp.float32)], axis=0))           # (8, H)
        wqkv.append(jnp.concatenate(
            [p['wq'] * scale, p['wk'], p['wv']], axis=1))             # (H, 3H)
        bqkv = jnp.concatenate([p['bq'] * scale, p['bk'], p['bv']], axis=1)
        bqkv = jnp.pad(bqkv, ((0, 0), (0, LBIAS_W - 3 * HIDDEN)))
        b1 = jnp.pad(p['b1'], ((0, 0), (0, LBIAS_W - MLP_DIM)))
        lbias.append(jnp.concatenate([bqkv, b1], axis=0))             # (2, LBIAS_W)
        wo_ls.append(p['wo'] * ls1)                                   # (H, H)
        w1.append(p['w1'])
        w2_ls.append(p['w2'] * ls2)
    kp['lvecs'] = jnp.stack(lvecs)      # (L, 8, H)
    kp['wqkv'] = jnp.stack(wqkv)        # (L, H, 3H)
    kp['lbias'] = jnp.stack(lbias)      # (L, 2, LBIAS_W)
    kp['wo'] = jnp.stack(wo_ls)         # (L, H, H)
    kp['w1'] = jnp.stack(w1)            # (L, H, MLP)
    kp['w2'] = jnp.stack(w2_ls)         # (L, MLP, H)

    kp['gvecs'] = jnp.concatenate(
        [params['final_ln_w'], params['final_ln_b'],
         jnp.zeros((6, HIDDEN), jnp.float32)], axis=0)                # (8, H)

    hp = params['head']
    # Linear(2H->exp) followed (after Dropout) by shared Linear(exp->exp)+ReLU:
    # fold the two affine maps before the first ReLU.
    kp['w_first'] = hp['w_in'] @ hp['w_mid']                          # (2H, exp)
    b_first = hp['b_in'] @ hp['w_mid'] + hp['b_mid']
    kp['head_b'] = jnp.concatenate([b_first, hp['b_mid']], axis=0)    # (2, exp)
    kp['w_mid'] = hp['w_mid']
    # activation-free tail Linear(exp,2H)->(2H,H)->(H,H/2)->(H/2,1) folded.
    kp['w_tail'] = hp['w_out'] @ hp['w_a'] @ hp['w_b'] @ hp['w_c']    # (exp, 1)
    kp['b_tail'] = (((hp['b_out'] @ hp['w_a'] + hp['b_a']) @ hp['w_b']
                     + hp['b_b']) @ hp['w_c'] + hp['b_c'])            # (1, 1)
    return kp


# ----------------------------- pure-JAX reference (for validation) ----------
def reference_forward(pixels, params):
    B = pixels.shape[0]
    patches = pixels.reshape(B, CHANNELS, GRID, PATCH, GRID, PATCH)
    patches = patches.transpose(0, 2, 4, 1, 3, 5).reshape(B * NUM_PATCHES, PATCH_FEAT)
    emb = (patches @ params['patch_w'] + params['patch_b']).reshape(B, NUM_PATCHES, HIDDEN)
    cls = jnp.broadcast_to(params['cls_token'], (B, 1, HIDDEN))
    x = jnp.concatenate([cls, emb], axis=1) + params['pos_embed']
    for p in params['layers']:
        h = _layer_norm(x, p['ln1_w'], p['ln1_b']).reshape(B * SEQ, HIDDEN)
        q = (h @ p['wq'] + p['bq']).reshape(B, SEQ, NUM_HEADS, HEAD_DIM).transpose(0, 2, 1, 3)
        k = (h @ p['wk'] + p['bk']).reshape(B, SEQ, NUM_HEADS, HEAD_DIM).transpose(0, 2, 1, 3)
        v = (h @ p['wv'] + p['bv']).reshape(B, SEQ, NUM_HEADS, HEAD_DIM).transpose(0, 2, 1, 3)
        s = jnp.einsum('bhqd,bhkd->bhqk', q, k) / (HEAD_DIM ** 0.5)
        a = jax.nn.softmax(s, axis=-1)
        ctx = jnp.einsum('bhqk,bhkd->bhqd', a, v).transpose(0, 2, 1, 3).reshape(B * SEQ, HIDDEN)
        attn = ctx @ p['wo'] + p['bo']
        x = x + p['ls1'] * attn.reshape(B, SEQ, HIDDEN)
        h = _layer_norm(x, p['ln2_w'], p['ln2_b']).reshape(B * SEQ, HIDDEN)
        m = jax.nn.gelu(h @ p['w1'] + p['b1'], approximate=False) @ p['w2'] + p['b2']
        x = x + p['ls2'] * m.reshape(B, SEQ, HIDDEN)
    h = _layer_norm(x, params['final_ln_w'], params['final_ln_b'])
    feat = jnp.concatenate([h[:, 0, :], jnp.mean(h[:, 1:, :], axis=1)], axis=-1)
    hp = params['head']
    y = feat @ hp['w_in'] + hp['b_in']
    for _ in range(HEAD_LAYERS):
        y = jnp.maximum(y @ hp['w_mid'] + hp['b_mid'], 0.0)
    y = y @ hp['w_out'] + hp['b_out']
    y = y @ hp['w_a'] + hp['b_a']
    y = y @ hp['w_b'] + hp['b_b']
    y = y @ hp['w_c'] + hp['b_c']
    return jnp.squeeze(y, axis=-1)


# ----------------------------- main ------------------------------------------
if __name__ == "__main__":
    root = jax.random.PRNGKey(0)
    k_params, k_pixels = jax.random.split(root)
    params = init_params(k_params)
    kparams = prepare_params(params)          # one-time offline fold/pack
    # NCHW pixel input, like PyTorch.
    pixels = jax.random.normal(k_pixels, (BATCH, CHANNELS, IMG, IMG), jnp.float32)

    scores = dinov2_aesthetic_score(pixels, kparams)
    jax.block_until_ready(scores)
    assert scores.shape == (BATCH,)

    ref = reference_forward(pixels, params)
    assert jnp.allclose(scores, ref, atol=1e-2, rtol=1e-2)

    # TODO(synk): pretrained Dinov2 weights / AutoImageProcessor normalization
    # are replaced by deterministic synthetic parameters (no checkpoint load).
    print("KERNEL_OK")
</pallas_src>

<mosaic_0001>
module attributes {stable_mosaic.version = 11 : i64} {
  func.func @_fused_kernel(%arg0: i32, %arg1: memref<24x48xf32, #tpu.memory_space<vmem>>, %arg2: memref<48x32xf32, #tpu.memory_space<vmem>>, %arg3: memref<24x32xf32, #tpu.memory_space<vmem>>, %arg4: memref<2x8x32xf32, #tpu.memory_space<vmem>>, %arg5: memref<2x32x96xf32, #tpu.memory_space<vmem>>, %arg6: memref<2x2x128xf32, #tpu.memory_space<vmem>>, %arg7: memref<2x32x32xf32, #tpu.memory_space<vmem>>, %arg8: memref<2x32x128xf32, #tpu.memory_space<vmem>>, %arg9: memref<2x128x32xf32, #tpu.memory_space<vmem>>, %arg10: memref<8x32xf32, #tpu.memory_space<vmem>>, %arg11: memref<64x256xf32, #tpu.memory_space<vmem>>, %arg12: memref<2x256xf32, #tpu.memory_space<vmem>>, %arg13: memref<256x256xf32, #tpu.memory_space<vmem>>, %arg14: memref<256x1xf32, #tpu.memory_space<vmem>>, %arg15: memref<1x1xf32, #tpu.memory_space<vmem>>, %arg16: memref<1x1x1xf32, #tpu.memory_space<vmem>>) attributes {dimension_semantics = [#tpu.dimension_semantics<parallel>], iteration_bounds = array<i64: 2>, scalar_prefetch = 0 : i64, scratch_operands = 0 : i64, tpu.core_type = #tpu.core_type<tc>, window_params = [{transform_indices = @transform_0, window_bounds = array<i64: 24, 48>}, {pipeline_mode = #tpu.pipeline_mode<synchronous>, transform_indices = @transform_1, window_bounds = array<i64: 48, 32>}, {pipeline_mode = #tpu.pipeline_mode<synchronous>, transform_indices = @transform_2, window_bounds = array<i64: 24, 32>}, {pipeline_mode = #tpu.pipeline_mode<synchronous>, transform_indices = @transform_3, window_bounds = array<i64: 2, 8, 32>}, {pipeline_mode = #tpu.pipeline_mode<synchronous>, transform_indices = @transform_4, window_bounds = array<i64: 2, 32, 96>}, {pipeline_mode = #tpu.pipeline_mode<synchronous>, transform_indices = @transform_5, window_bounds = array<i64: 2, 2, 128>}, {pipeline_mode = #tpu.pipeline_mode<synchronous>, transform_indices = @transform_6, window_bounds = array<i64: 2, 32, 32>}, {pipeline_mode = #tpu.pipeline_mode<synchronous>, transform_indices = @transform_7, window_bounds = array<i64: 2, 32, 128>}, {pipeline_mode = #tpu.pipeline_mode<synchronous>, transform_indices = @transform_8, window_bounds = array<i64: 2, 128, 32>}, {pipeline_mode = #tpu.pipeline_mode<synchronous>, transform_indices = @transform_9, window_bounds = array<i64: 8, 32>}, {pipeline_mode = #tpu.pipeline_mode<synchronous>, transform_indices = @transform_10, window_bounds = array<i64: 64, 256>}, {pipeline_mode = #tpu.pipeline_mode<synchronous>, transform_indices = @transform_11, window_bounds = array<i64: 2, 256>}, {pipeline_mode = #tpu.pipeline_mode<synchronous>, transform_indices = @transform_12, window_bounds = array<i64: 256, 256>}, {pipeline_mode = #tpu.pipeline_mode<synchronous>, transform_indices = @transform_13, window_bounds = array<i64: 256, 1>}, {pipeline_mode = #tpu.pipeline_mode<synchronous>, transform_indices = @transform_14, window_bounds = array<i64: 1, 1>}, {transform_indices = @transform_15, window_bounds = array<i64: 1, 1, 1>}]} {
    %0 = tpu.iota {dimensions = array<i32: 0>} : vector<24x1xi32>
    %c0_i32 = arith.constant 0 : i32
    %1 = vector.broadcast %c0_i32 : i32 to vector<24x1xi32>
    %2 = arith.cmpi eq, %0, %1 : vector<24x1xi32>
    %3 = arith.extui %2 : vector<24x1xi1> to vector<24x1xi32>
    %4 = arith.sitofp %3 : vector<24x1xi32> to vector<24x1xf32>
    %c1_i32 = arith.constant 1 : i32
    %5 = vector.broadcast %c1_i32 : i32 to vector<24x1xi32>
    %6 = arith.cmpi sge, %0, %5 : vector<24x1xi32>
    %c17_i32 = arith.constant 17 : i32
    %7 = vector.broadcast %c17_i32 : i32 to vector<24x1xi32>
    %8 = arith.cmpi slt, %0, %7 : vector<24x1xi32>
    %9 = arith.andi %6, %8 : vector<24x1xi1>
    %10 = arith.extui %9 : vector<24x1xi1> to vector<24x1xi32>
    %11 = arith.sitofp %10 : vector<24x1xi32> to vector<24x1xf32>
    %12 = tpu.iota {dimensions = array<i32: 1>} : vector<1x24xi32>
    %c17_i32_0 = arith.constant 17 : i32
    %13 = vector.broadcast %c17_i32_0 : i32 to vector<1x24xi32>
    %14 = arith.cmpi slt, %12, %13 : vector<1x24xi32>
    %cst = arith.constant 0.000000e+00 : f32
    %cst_1 = arith.constant -1.000000e+30 : f32
    %15 = vector.broadcast %cst : f32 to vector<1x24xf32>
    %16 = vector.broadcast %cst_1 : f32 to vector<1x24xf32>
    %17 = arith.select %14, %15, %16 : vector<1x24xi1>, vector<1x24xf32>
    %c0 = arith.constant 0 : index
    %c0_2 = arith.constant 0 : index
    %18 = vector.load %arg1[%c0, %c0_2] : memref<24x48xf32, #tpu.memory_space<vmem>>, vector<24x48xf32>
    %c0_3 = arith.constant 0 : index
    %c0_4 = arith.constant 0 : index
    %19 = vector.load %arg2[%c0_3, %c0_4] : memref<48x32xf32, #tpu.memory_space<vmem>>, vector<48x32xf32>
    %cst_5 = arith.constant dense<0.000000e+00> : vector<24x32xf32>
    %20 = tpu.matmul %18, %19, %cst_5 {dimension_numbers = #tpu.dot_dimension_numbers<[1], [0], [0], [1], [0, 0, 1, 1], [], []>} : vector<24x48xf32>, vector<48x32xf32>, vector<24x32xf32> -> vector<24x32xf32>
    %c0_6 = arith.constant 0 : index
    %c0_7 = arith.constant 0 : index
    %21 = vector.load %arg3[%c0_6, %c0_7] : memref<24x32xf32, #tpu.memory_space<vmem>>, vector<24x32xf32>
    %22 = arith.addf %20, %21 : vector<24x32xf32>
    %c0_8 = arith.constant 0 : index
    %c0_9 = arith.constant 0 : index
    %c0_10 = arith.constant 0 : index
    %23 = vector.load %arg4[%c0_8, %c0_9, %c0_10] : memref<2x8x32xf32, #tpu.memory_space<vmem>>, vector<1x8x32xf32>
    %24 = vector.shape_cast %23 : vector<1x8x32xf32> to vector<8x32xf32>
    %c0_11 = arith.constant 0 : index
    %c0_12 = arith.constant 0 : index
    %c0_13 = arith.constant 0 : index
    %25 = vector.load %arg6[%c0_11, %c0_12, %c0_13] : memref<2x2x128xf32, #tpu.memory_space<vmem>>, vector<1x2x128xf32>
    %26 = vector.shape_cast %25 : vector<1x2x128xf32> to vector<2x128xf32>
    %27 = vector.extract_strided_slice %24 {offsets = [0, 0], sizes = [1, 32], strides = [1, 1]} : vector<8x32xf32> to vector<1x32xf32>
    %28 = vector.extract_strided_slice %24 {offsets = [1, 0], sizes = [1, 32], strides = [1, 1]} : vector<8x32xf32> to vector<1x32xf32>
    %29 = vector.extract_strided_slice %24 {offsets = [2, 0], sizes = [1, 32], strides = [1, 1]} : vector<8x32xf32> to vector<1x32xf32>
    %30 = vector.extract_strided_slice %24 {offsets = [3, 0], sizes = [1, 32], strides = [1, 1]} : vector<8x32xf32> to vector<1x32xf32>
    %31 = vector.extract_strided_slice %24 {offsets = [4, 0], sizes = [1, 32], strides = [1, 1]} : vector<8x32xf32> to vector<1x32xf32>
    %32 = vector.extract_strided_slice %24 {offsets = [5, 0], sizes = [1, 32], strides = [1, 1]} : vector<8x32xf32> to vector<1x32xf32>
    %33 = vector.extract_strided_slice %26 {offsets = [0, 0], sizes = [1, 96], strides = [1, 1]} : vector<2x128xf32> to vector<1x96xf32>
    %34 = vector.extract_strided_slice %26 {offsets = [1, 0], sizes = [1, 128], strides = [1, 1]} : vector<2x128xf32> to vector<1x128xf32>
    %cst_14 = arith.constant dense<0.000000e+00> : vector<24xf32>
    %35 = vector.multi_reduction <add>, %22, %cst_14 [1] : vector<24x32xf32> to vector<24xf32>
    %36 = vector.shape_cast %35 : vector<24xf32> to vector<24x1xf32>
    %cst_15 = arith.constant 3.200000e+01 : f32
    %37 = vector.broadcast %cst_15 : f32 to vector<24x1xf32>
    %38 = arith.divf %36, %37 : vector<24x1xf32>
    %39 = vector.broadcast %38 : vector<24x1xf32> to vector<24x32xf32>
    %40 = arith.subf %22, %39 : vector<24x32xf32>
    %41 = arith.mulf %40, %40 : vector<24x32xf32>
    %cst_16 = arith.constant dense<0.000000e+00> : vector<24xf32>
    %42 = vector.multi_reduction <add>, %41, %cst_16 [1] : vector<24x32xf32> to vector<24xf32>
    %43 = vector.shape_cast %42 : vector<24xf32> to vector<24x1xf32>
    %cst_17 = arith.constant 3.200000e+01 : f32
    %44 = vector.broadcast %cst_17 : f32 to vector<24x1xf32>
    %45 = arith.divf %43, %44 : vector<24x1xf32>
    %46 = vector.broadcast %38 : vector<24x1xf32> to vector<24x32xf32>
    %47 = arith.subf %22, %46 : vector<24x32xf32>
    %cst_18 = arith.constant 9.99999997E-7 : f32
    %48 = vector.broadcast %cst_18 : f32 to vector<24x1xf32>
    %49 = arith.addf %45, %48 : vector<24x1xf32>
    %50 = math.rsqrt %49 : vector<24x1xf32>
    %51 = vector.broadcast %50 : vector<24x1xf32> to vector<24x32xf32>
    %52 = arith.mulf %47, %51 : vector<24x32xf32>
    %53 = vector.broadcast %27 : vector<1x32xf32> to vector<24x32xf32>
    %54 = arith.mulf %52, %53 : vector<24x32xf32>
    %55 = vector.broadcast %28 : vector<1x32xf32> to vector<24x32xf32>
    %56 = arith.addf %54, %55 : vector<24x32xf32>
    %c0_19 = arith.constant 0 : index
    %c0_20 = arith.constant 0 : index
    %c0_21 = arith.constant 0 : index
    %57 = vector.load %arg5[%c0_19, %c0_20, %c0_21] : memref<2x32x96xf32, #tpu.memory_space<vmem>>, vector<1x32x96xf32>
    %58 = vector.shape_cast %57 : vector<1x32x96xf32> to vector<32x96xf32>
    %cst_22 = arith.constant dense<0.000000e+00> : vector<24x96xf32>
    %59 = tpu.matmul %56, %58, %cst_22 {dimension_numbers = #tpu.dot_dimension_numbers<[1], [0], [0], [1], [0, 0, 1, 1], [], []>} : vector<24x32xf32>, vector<32x96xf32>, vector<24x96xf32> -> vector<24x96xf32>
    %60 = vector.broadcast %33 : vector<1x96xf32> to vector<24x96xf32>
    %61 = arith.addf %59, %60 : vector<24x96xf32>
    %62 = vector.extract_strided_slice %61 {offsets = [0, 0], sizes = [24, 16], strides = [1, 1]} : vector<24x96xf32> to vector<24x16xf32>
    %63 = vector.extract_strided_slice %61 {offsets = [0, 32], sizes = [24, 16], strides = [1, 1]} : vector<24x96xf32> to vector<24x16xf32>
    %64 = vector.extract_strided_slice %61 {offsets = [0, 64], sizes = [24, 16], strides = [1, 1]} : vector<24x96xf32> to vector<24x16xf32>
    %cst_23 = arith.constant dense<0.000000e+00> : vector<24x24xf32>
    %65 = tpu.matmul %62, %63, %cst_23 {dimension_numbers = #tpu.dot_dimension_numbers<[1], [1], [0], [0], [0, 0, 1, 0], [], []>} : vector<24x16xf32>, vector<24x16xf32>, vector<24x24xf32> -> vector<24x24xf32>
    %66 = vector.broadcast %17 : vector<1x24xf32> to vector<24x24xf32>
    %67 = arith.addf %65, %66 : vector<24x24xf32>
    %cst_24 = arith.constant dense<0xFF800000> : vector<24xf32>
    %68 = vector.multi_reduction <maximumf>, %67, %cst_24 [1] : vector<24x24xf32> to vector<24xf32>
    %69 = vector.shape_cast %68 : vector<24xf32> to vector<24x1xf32>
    %70 = vector.broadcast %69 : vector<24x1xf32> to vector<24x24xf32>
    %71 = arith.subf %67, %70 : vector<24x24xf32>
    %72 = math.exp %71 : vector<24x24xf32>
    %cst_25 = arith.constant dense<0.000000e+00> : vector<24xf32>
    %73 = vector.multi_reduction <add>, %72, %cst_25 [1] : vector<24x24xf32> to vector<24xf32>
    %74 = vector.shape_cast %73 : vector<24xf32> to vector<24x1xf32>
    %75 = tpu.reciprocal %74 {approx = true} : vector<24x1xf32> -> vector<24x1xf32>
    %76 = vector.broadcast %75 : vector<24x1xf32> to vector<24x24xf32>
    %77 = arith.mulf %72, %76 : vector<24x24xf32>
    %cst_26 = arith.constant dense<0.000000e+00> : vector<24x16xf32>
    %78 = tpu.matmul %77, %64, %cst_26 {dimension_numbers = #tpu.dot_dimension_numbers<[1], [0], [0], [1], [0, 0, 1, 1], [], []>} : vector<24x24xf32>, vector<24x16xf32>, vector<24x16xf32> -> vector<24x16xf32>
    %79 = vector.extract_strided_slice %61 {offsets = [0, 16], sizes = [24, 16], strides = [1, 1]} : vector<24x96xf32> to vector<24x16xf32>
    %80 = vector.extract_strided_slice %61 {offsets = [0, 48], sizes = [24, 16], strides = [1, 1]} : vector<24x96xf32> to vector<24x16xf32>
    %81 = vector.extract_strided_slice %61 {offsets = [0, 80], sizes = [24, 16], strides = [1, 1]} : vector<24x96xf32> to vector<24x16xf32>
    %cst_27 = arith.constant dense<0.000000e+00> : vector<24x24xf32>
    %82 = tpu.matmul %79, %80, %cst_27 {dimension_numbers = #tpu.dot_dimension_numbers<[1], [1], [0], [0], [0, 0, 1, 0], [], []>} : vector<24x16xf32>, vector<24x16xf32>, vector<24x24xf32> -> vector<24x24xf32>
    %83 = vector.broadcast %17 : vector<1x24xf32> to vector<24x24xf32>
    %84 = arith.addf %82, %83 : vector<24x24xf32>
    %cst_28 = arith.constant dense<0xFF800000> : vector<24xf32>
    %85 = vector.multi_reduction <maximumf>, %84, %cst_28 [1] : vector<24x24xf32> to vector<24xf32>
    %86 = vector.shape_cast %85 : vector<24xf32> to vector<24x1xf32>
    %87 = vector.broadcast %86 : vector<24x1xf32> to vector<24x24xf32>
    %88 = arith.subf %84, %87 : vector<24x24xf32>
    %89 = math.exp %88 : vector<24x24xf32>
    %cst_29 = arith.constant dense<0.000000e+00> : vector<24xf32>
    %90 = vector.multi_reduction <add>, %89, %cst_29 [1] : vector<24x24xf32> to vector<24xf32>
    %91 = vector.shape_cast %90 : vector<24xf32> to vector<24x1xf32>
    %92 = tpu.reciprocal %91 {approx = true} : vector<24x1xf32> -> vector<24x1xf32>
    %93 = vector.broadcast %92 : vector<24x1xf32> to vector<24x24xf32>
    %94 = arith.mulf %89, %93 : vector<24x24xf32>
    %cst_30 = arith.constant dense<0.000000e+00> : vector<24x16xf32>
    %95 = tpu.matmul %94, %81, %cst_30 {dimension_numbers = #tpu.dot_dimension_numbers<[1], [0], [0], [1], [0, 0, 1, 1], [], []>} : vector<24x24xf32>, vector<24x16xf32>, vector<24x16xf32> -> vector<24x16xf32>
    %96 = tpu.concatenate %78, %95 in 1 : vector<24x16xf32>, vector<24x16xf32> -> vector<24x32xf32>
    %c0_31 = arith.constant 0 : index
    %c0_32 = arith.constant 0 : index
    %c0_33 = arith.constant 0 : index
    %97 = vector.load %arg7[%c0_31, %c0_32, %c0_33] : memref<2x32x32xf32, #tpu.memory_space<vmem>>, vector<1x32x32xf32>
    %98 = vector.shape_cast %97 : vector<1x32x32xf32> to vector<32x32xf32>
    %cst_34 = arith.constant dense<0.000000e+00> : vector<24x32xf32>
    %99 = tpu.matmul %96, %98, %cst_34 {dimension_numbers = #tpu.dot_dimension_numbers<[1], [0], [0], [1], [0, 0, 1, 1], [], []>} : vector<24x32xf32>, vector<32x32xf32>, vector<24x32xf32> -> vector<24x32xf32>
    %100 = arith.addf %22, %99 : vector<24x32xf32>
    %101 = vector.broadcast %31 : vector<1x32xf32> to vector<24x32xf32>
    %102 = arith.addf %100, %101 : vector<24x32xf32>
    %cst_35 = arith.constant dense<0.000000e+00> : vector<24xf32>
    %103 = vector.multi_reduction <add>, %102, %cst_35 [1] : vector<24x32xf32> to vector<24xf32>
    %104 = vector.shape_cast %103 : vector<24xf32> to vector<24x1xf32>
    %cst_36 = arith.constant 3.200000e+01 : f32
    %105 = vector.broadcast %cst_36 : f32 to vector<24x1xf32>
    %106 = arith.divf %104, %105 : vector<24x1xf32>
    %107 = vector.broadcast %106 : vector<24x1xf32> to vector<24x32xf32>
    %108 = arith.subf %102, %107 : vector<24x32xf32>
    %109 = arith.mulf %108, %108 : vector<24x32xf32>
    %cst_37 = arith.constant dense<0.000000e+00> : vector<24xf32>
    %110 = vector.multi_reduction <add>, %109, %cst_37 [1] : vector<24x32xf32> to vector<24xf32>
    %111 = vector.shape_cast %110 : vector<24xf32> to vector<24x1xf32>
    %cst_38 = arith.constant 3.200000e+01 : f32
    %112 = vector.broadcast %cst_38 : f32 to vector<24x1xf32>
    %113 = arith.divf %111, %112 : vector<24x1xf32>
    %114 = vector.broadcast %106 : vector<24x1xf32> to vector<24x32xf32>
    %115 = arith.subf %102, %114 : vector<24x32xf32>
    %cst_39 = arith.constant 9.99999997E-7 : f32
    %116 = vector.broadcast %cst_39 : f32 to vector<24x1xf32>
    %117 = arith.addf %113, %116 : vector<24x1xf32>
    %118 = math.rsqrt %117 : vector<24x1xf32>
    %119 = vector.broadcast %118 : vector<24x1xf32> to vector<24x32xf32>
    %120 = arith.mulf %115, %119 : vector<24x32xf32>
    %121 = vector.broadcast %29 : vector<1x32xf32> to vector<24x32xf32>
    %122 = arith.mulf %120, %121 : vector<24x32xf32>
    %123 = vector.broadcast %30 : vector<1x32xf32> to vector<24x32xf32>
    %124 = arith.addf %122, %123 : vector<24x32xf32>
    %c0_40 = arith.constant 0 : index
    %c0_41 = arith.constant 0 : index
    %c0_42 = arith.constant 0 : index
    %125 = vector.load %arg8[%c0_40, %c0_41, %c0_42] : memref<2x32x128xf32, #tpu.memory_space<vmem>>, vector<1x32x128xf32>
    %126 = vector.shape_cast %125 : vector<1x32x128xf32> to vector<32x128xf32>
    %cst_43 = arith.constant dense<0.000000e+00> : vector<24x128xf32>
    %127 = tpu.matmul %124, %126, %cst_43 {dimension_numbers = #tpu.dot_dimension_numbers<[1], [0], [0], [1], [0, 0, 1, 1], [], []>} : vector<24x32xf32>, vector<32x128xf32>, vector<24x128xf32> -> vector<24x128xf32>
    %128 = vector.broadcast %34 : vector<1x128xf32> to vector<24x128xf32>
    %129 = arith.addf %127, %128 : vector<24x128xf32>
    %130 = arith.mulf %129, %129 : vector<24x128xf32>
    %131 = arith.mulf %129, %130 : vector<24x128xf32>
    %cst_44 = arith.constant 4.471500e-02 : f32
    %132 = vector.broadcast %cst_44 : f32 to vector<24x128xf32>
    %133 = arith.mulf %132, %131 : vector<24x128xf32>
    %134 = arith.addf %129, %133 : vector<24x128xf32>
    %cst_45 = arith.constant 0.797884583 : f32
    %135 = vector.broadcast %cst_45 : f32 to vector<24x128xf32>
    %136 = arith.mulf %135, %134 : vector<24x128xf32>
    %137 = math.tanh %136 : vector<24x128xf32>
    %cst_46 = arith.constant 1.000000e+00 : f32
    %138 = vector.broadcast %cst_46 : f32 to vector<24x128xf32>
    %139 = arith.addf %138, %137 : vector<24x128xf32>
    %cst_47 = arith.constant 5.000000e-01 : f32
    %140 = vector.broadcast %cst_47 : f32 to vector<24x128xf32>
    %141 = arith.mulf %140, %139 : vector<24x128xf32>
    %142 = arith.mulf %129, %141 : vector<24x128xf32>
    %c0_48 = arith.constant 0 : index
    %c0_49 = arith.constant 0 : index
    %c0_50 = arith.constant 0 : index
    %143 = vector.load %arg9[%c0_48, %c0_49, %c0_50] : memref<2x128x32xf32, #tpu.memory_space<vmem>>, vector<1x128x32xf32>
    %144 = vector.shape_cast %143 : vector<1x128x32xf32> to vector<128x32xf32>
    %cst_51 = arith.constant dense<0.000000e+00> : vector<24x32xf32>
    %145 = tpu.matmul %142, %144, %cst_51 {dimension_numbers = #tpu.dot_dimension_numbers<[1], [0], [0], [1], [0, 0, 1, 1], [], []>} : vector<24x128xf32>, vector<128x32xf32>, vector<24x32xf32> -> vector<24x32xf32>
    %146 = arith.addf %102, %145 : vector<24x32xf32>
    %147 = vector.broadcast %32 : vector<1x32xf32> to vector<24x32xf32>
    %148 = arith.addf %146, %147 : vector<24x32xf32>
    %c1 = arith.constant 1 : index
    %c0_52 = arith.constant 0 : index
    %c0_53 = arith.constant 0 : index
    %149 = vector.load %arg4[%c1, %c0_52, %c0_53] : memref<2x8x32xf32, #tpu.memory_space<vmem>>, vector<1x8x32xf32>
    %150 = vector.shape_cast %149 : vector<1x8x32xf32> to vector<8x32xf32>
    %c1_54 = arith.constant 1 : index
    %c0_55 = arith.constant 0 : index
    %c0_56 = arith.constant 0 : index
    %151 = vector.load %arg6[%c1_54, %c0_55, %c0_56] : memref<2x2x128xf32, #tpu.memory_space<vmem>>, vector<1x2x128xf32>
    %152 = vector.shape_cast %151 : vector<1x2x128xf32> to vector<2x128xf32>
    %153 = vector.extract_strided_slice %150 {offsets = [0, 0], sizes = [1, 32], strides = [1, 1]} : vector<8x32xf32> to vector<1x32xf32>
    %154 = vector.extract_strided_slice %150 {offsets = [1, 0], sizes = [1, 32], strides = [1, 1]} : vector<8x32xf32> to vector<1x32xf32>
    %155 = vector.extract_strided_slice %150 {offsets = [2, 0], sizes = [1, 32], strides = [1, 1]} : vector<8x32xf32> to vector<1x32xf32>
    %156 = vector.extract_strided_slice %150 {offsets = [3, 0], sizes = [1, 32], strides = [1, 1]} : vector<8x32xf32> to vector<1x32xf32>
    %157 = vector.extract_strided_slice %150 {offsets = [4, 0], sizes = [1, 32], strides = [1, 1]} : vector<8x32xf32> to vector<1x32xf32>
    %158 = vector.extract_strided_slice %150 {offsets = [5, 0], sizes = [1, 32], strides = [1, 1]} : vector<8x32xf32> to vector<1x32xf32>
    %159 = vector.extract_strided_slice %152 {offsets = [0, 0], sizes = [1, 96], strides = [1, 1]} : vector<2x128xf32> to vector<1x96xf32>
    %160 = vector.extract_strided_slice %152 {offsets = [1, 0], sizes = [1, 128], strides = [1, 1]} : vector<2x128xf32> to vector<1x128xf32>
    %cst_57 = arith.constant dense<0.000000e+00> : vector<24xf32>
    %161 = vector.multi_reduction <add>, %148, %cst_57 [1] : vector<24x32xf32> to vector<24xf32>
    %162 = vector.shape_cast %161 : vector<24xf32> to vector<24x1xf32>
    %cst_58 = arith.constant 3.200000e+01 : f32
    %163 = vector.broadcast %cst_58 : f32 to vector<24x1xf32>
    %164 = arith.divf %162, %163 : vector<24x1xf32>
    %165 = vector.broadcast %164 : vector<24x1xf32> to vector<24x32xf32>
    %166 = arith.subf %148, %165 : vector<24x32xf32>
    %167 = arith.mulf %166, %166 : vector<24x32xf32>
    %cst_59 = arith.constant dense<0.000000e+00> : vector<24xf32>
    %168 = vector.multi_reduction <add>, %167, %cst_59 [1] : vector<24x32xf32> to vector<24xf32>
    %169 = vector.shape_cast %168 : vector<24xf32> to vector<24x1xf32>
    %cst_60 = arith.constant 3.200000e+01 : f32
    %170 = vector.broadcast %cst_60 : f32 to vector<24x1xf32>
    %171 = arith.divf %169, %170 : vector<24x1xf32>
    %172 = vector.broadcast %164 : vector<24x1xf32> to vector<24x32xf32>
    %173 = arith.subf %148, %172 : vector<24x32xf32>
    %cst_61 = arith.constant 9.99999997E-7 : f32
    %174 = vector.broadcast %cst_61 : f32 to vector<24x1xf32>
    %175 = arith.addf %171, %174 : vector<24x1xf32>
    %176 = math.rsqrt %175 : vector<24x1xf32>
    %177 = vector.broadcast %176 : vector<24x1xf32> to vector<24x32xf32>
    %178 = arith.mulf %173, %177 : vector<24x32xf32>
    %179 = vector.broadcast %153 : vector<1x32xf32> to vector<24x32xf32>
    %180 = arith.mulf %178, %179 : vector<24x32xf32>
    %181 = vector.broadcast %154 : vector<1x32xf32> to vector<24x32xf32>
    %182 = arith.addf %180, %181 : vector<24x32xf32>
    %c1_62 = arith.constant 1 : index
    %c0_63 = arith.constant 0 : index
    %c0_64 = arith.constant 0 : index
    %183 = vector.load %arg5[%c1_62, %c0_63, %c0_64] : memref<2x32x96xf32, #tpu.memory_space<vmem>>, vector<1x32x96xf32>
    %184 = vector.shape_cast %183 : vector<1x32x96xf32> to vector<32x96xf32>
    %cst_65 = arith.constant dense<0.000000e+00> : vector<24x96xf32>
    %185 = tpu.matmul %182, %184, %cst_65 {dimension_numbers = #tpu.dot_dimension_numbers<[1], [0], [0], [1], [0, 0, 1, 1], [], []>} : vector<24x32xf32>, vector<32x96xf32>, vector<24x96xf32> -> vector<24x96xf32>
    %186 = vector.broadcast %159 : vector<1x96xf32> to vector<24x96xf32>
    %187 = arith.addf %185, %186 : vector<24x96xf32>
    %188 = vector.extract_strided_slice %187 {offsets = [0, 0], sizes = [24, 16], strides = [1, 1]} : vector<24x96xf32> to vector<24x16xf32>
    %189 = vector.extract_strided_slice %187 {offsets = [0, 32], sizes = [24, 16], strides = [1, 1]} : vector<24x96xf32> to vector<24x16xf32>
    %190 = vector.extract_strided_slice %187 {offsets = [0, 64], sizes = [24, 16], strides = [1, 1]} : vector<24x96xf32> to vector<24x16xf32>
    %cst_66 = arith.constant dense<0.000000e+00> : vector<24x24xf32>
    %191 = tpu.matmul %188, %189, %cst_66 {dimension_numbers = #tpu.dot_dimension_numbers<[1], [1], [0], [0], [0, 0, 1, 0], [], []>} : vector<24x16xf32>, vector<24x16xf32>, vector<24x24xf32> -> vector<24x24xf32>
    %192 = vector.broadcast %17 : vector<1x24xf32> to vector<24x24xf32>
    %193 = arith.addf %191, %192 : vector<24x24xf32>
    %cst_67 = arith.constant dense<0xFF800000> : vector<24xf32>
    %194 = vector.multi_reduction <maximumf>, %193, %cst_67 [1] : vector<24x24xf32> to vector<24xf32>
    %195 = vector.shape_cast %194 : vector<24xf32> to vector<24x1xf32>
    %196 = vector.broadcast %195 : vector<24x1xf32> to vector<24x24xf32>
    %197 = arith.subf %193, %196 : vector<24x24xf32>
    %198 = math.exp %197 : vector<24x24xf32>
    %cst_68 = arith.constant dense<0.000000e+00> : vector<24xf32>
    %199 = vector.multi_reduction <add>, %198, %cst_68 [1] : vector<24x24xf32> to vector<24xf32>
    %200 = vector.shape_cast %199 : vector<24xf32> to vector<24x1xf32>
    %201 = tpu.reciprocal %200 {approx = true} : vector<24x1xf32> -> vector<24x1xf32>
    %202 = vector.broadcast %201 : vector<24x1xf32> to vector<24x24xf32>
    %203 = arith.mulf %198, %202 : vector<24x24xf32>
    %cst_69 = arith.constant dense<0.000000e+00> : vector<24x16xf32>
    %204 = tpu.matmul %203, %190, %cst_69 {dimension_numbers = #tpu.dot_dimension_numbers<[1], [0], [0], [1], [0, 0, 1, 1], [], []>} : vector<24x24xf32>, vector<24x16xf32>, vector<24x16xf32> -> vector<24x16xf32>
    %205 = vector.extract_strided_slice %187 {offsets = [0, 16], sizes = [24, 16], strides = [1, 1]} : vector<24x96xf32> to vector<24x16xf32>
    %206 = vector.extract_strided_slice %187 {offsets = [0, 48], sizes = [24, 16], strides = [1, 1]} : vector<24x96xf32> to vector<24x16xf32>
    %207 = vector.extract_strided_slice %187 {offsets = [0, 80], sizes = [24, 16], strides = [1, 1]} : vector<24x96xf32> to vector<24x16xf32>
    %cst_70 = arith.constant dense<0.000000e+00> : vector<24x24xf32>
    %208 = tpu.matmul %205, %206, %cst_70 {dimension_numbers = #tpu.dot_dimension_numbers<[1], [1], [0], [0], [0, 0, 1, 0], [], []>} : vector<24x16xf32>, vector<24x16xf32>, vector<24x24xf32> -> vector<24x24xf32>
    %209 = vector.broadcast %17 : vector<1x24xf32> to vector<24x24xf32>
    %210 = arith.addf %208, %209 : vector<24x24xf32>
    %cst_71 = arith.constant dense<0xFF800000> : vector<24xf32>
    %211 = vector.multi_reduction <maximumf>, %210, %cst_71 [1] : vector<24x24xf32> to vector<24xf32>
    %212 = vector.shape_cast %211 : vector<24xf32> to vector<24x1xf32>
    %213 = vector.broadcast %212 : vector<24x1xf32> to vector<24x24xf32>
    %214 = arith.subf %210, %213 : vector<24x24xf32>
    %215 = math.exp %214 : vector<24x24xf32>
    %cst_72 = arith.constant dense<0.000000e+00> : vector<24xf32>
    %216 = vector.multi_reduction <add>, %215, %cst_72 [1] : vector<24x24xf32> to vector<24xf32>
    %217 = vector.shape_cast %216 : vector<24xf32> to vector<24x1xf32>
    %218 = tpu.reciprocal %217 {approx = true} : vector<24x1xf32> -> vector<24x1xf32>
    %219 = vector.broadcast %218 : vector<24x1xf32> to vector<24x24xf32>
    %220 = arith.mulf %215, %219 : vector<24x24xf32>
    %cst_73 = arith.constant dense<0.000000e+00> : vector<24x16xf32>
    %221 = tpu.matmul %220, %207, %cst_73 {dimension_numbers = #tpu.dot_dimension_numbers<[1], [0], [0], [1], [0, 0, 1, 1], [], []>} : vector<24x24xf32>, vector<24x16xf32>, vector<24x16xf32> -> vector<24x16xf32>
    %222 = tpu.concatenate %204, %221 in 1 : vector<24x16xf32>, vector<24x16xf32> -> vector<24x32xf32>
    %c1_74 = arith.constant 1 : index
    %c0_75 = arith.constant 0 : index
    %c0_76 = arith.constant 0 : index
    %223 = vector.load %arg7[%c1_74, %c0_75, %c0_76] : memref<2x32x32xf32, #tpu.memory_space<vmem>>, vector<1x32x32xf32>
    %224 = vector.shape_cast %223 : vector<1x32x32xf32> to vector<32x32xf32>
    %cst_77 = arith.constant dense<0.000000e+00> : vector<24x32xf32>
    %225 = tpu.matmul %222, %224, %cst_77 {dimension_numbers = #tpu.dot_dimension_numbers<[1], [0], [0], [1], [0, 0, 1, 1], [], []>} : vector<24x32xf32>, vector<32x32xf32>, vector<24x32xf32> -> vector<24x32xf32>
    %226 = arith.addf %148, %225 : vector<24x32xf32>
    %227 = vector.broadcast %157 : vector<1x32xf32> to vector<24x32xf32>
    %228 = arith.addf %226, %227 : vector<24x32xf32>
    %cst_78 = arith.constant dense<0.000000e+00> : vector<24xf32>
    %229 = vector.multi_reduction <add>, %228, %cst_78 [1] : vector<24x32xf32> to vector<24xf32>
    %230 = vector.shape_cast %229 : vector<24xf32> to vector<24x1xf32>
    %cst_79 = arith.constant 3.200000e+01 : f32
    %231 = vector.broadcast %cst_79 : f32 to vector<24x1xf32>
    %232 = arith.divf %230, %231 : vector<24x1xf32>
    %233 = vector.broadcast %232 : vector<24x1xf32> to vector<24x32xf32>
    %234 = arith.subf %228, %233 : vector<24x32xf32>
    %235 = arith.mulf %234, %234 : vector<24x32xf32>
    %cst_80 = arith.constant dense<0.000000e+00> : vector<24xf32>
    %236 = vector.multi_reduction <add>, %235, %cst_80 [1] : vector<24x32xf32> to vector<24xf32>
    %237 = vector.shape_cast %236 : vector<24xf32> to vector<24x1xf32>
    %cst_81 = arith.constant 3.200000e+01 : f32
    %238 = vector.broadcast %cst_81 : f32 to vector<24x1xf32>
    %239 = arith.divf %237, %238 : vector<24x1xf32>
    %240 = vector.broadcast %232 : vector<24x1xf32> to vector<24x32xf32>
    %241 = arith.subf %228, %240 : vector<24x32xf32>
    %cst_82 = arith.constant 9.99999997E-7 : f32
    %242 = vector.broadcast %cst_82 : f32 to vector<24x1xf32>
    %243 = arith.addf %239, %242 : vector<24x1xf32>
    %244 = math.rsqrt %243 : vector<24x1xf32>
    %245 = vector.broadcast %244 : vector<24x1xf32> to vector<24x32xf32>
    %246 = arith.mulf %241, %245 : vector<24x32xf32>
    %247 = vector.broadcast %155 : vector<1x32xf32> to vector<24x32xf32>
    %248 = arith.mulf %246, %247 : vector<24x32xf32>
    %249 = vector.broadcast %156 : vector<1x32xf32> to vector<24x32xf32>
    %250 = arith.addf %248, %249 : vector<24x32xf32>
    %c1_83 = arith.constant 1 : index
    %c0_84 = arith.constant 0 : index
    %c0_85 = arith.constant 0 : index
    %251 = vector.load %arg8[%c1_83, %c0_84, %c0_85] : memref<2x32x128xf32, #tpu.memory_space<vmem>>, vector<1x32x128xf32>
    %252 = vector.shape_cast %251 : vector<1x32x128xf32> to vector<32x128xf32>
    %cst_86 = arith.constant dense<0.000000e+00> : vector<24x128xf32>
    %253 = tpu.matmul %250, %252, %cst_86 {dimension_numbers = #tpu.dot_dimension_numbers<[1], [0], [0], [1], [0, 0, 1, 1], [], []>} : vector<24x32xf32>, vector<32x128xf32>, vector<24x128xf32> -> vector<24x128xf32>
    %254 = vector.broadcast %160 : vector<1x128xf32> to vector<24x128xf32>
    %255 = arith.addf %253, %254 : vector<24x128xf32>
    %256 = arith.mulf %255, %255 : vector<24x128xf32>
    %257 = arith.mulf %255, %256 : vector<24x128xf32>
    %cst_87 = arith.constant 4.471500e-02 : f32
    %258 = vector.broadcast %cst_87 : f32 to vector<24x128xf32>
    %259 = arith.mulf %258, %257 : vector<24x128xf32>
    %260 = arith.addf %255, %259 : vector<24x128xf32>
    %cst_88 = arith.constant 0.797884583 : f32
    %261 = vector.broadcast %cst_88 : f32 to vector<24x128xf32>
    %262 = arith.mulf %261, %260 : vector<24x128xf32>
    %263 = math.tanh %262 : vector<24x128xf32>
    %cst_89 = arith.constant 1.000000e+00 : f32
    %264 = vector.broadcast %cst_89 : f32 to vector<24x128xf32>
    %265 = arith.addf %264, %263 : vector<24x128xf32>
    %cst_90 = arith.constant 5.000000e-01 : f32
    %266 = vector.broadcast %cst_90 : f32 to vector<24x128xf32>
    %267 = arith.mulf %266, %265 : vector<24x128xf32>
    %268 = arith.mulf %255, %267 : vector<24x128xf32>
    %c1_91 = arith.constant 1 : index
    %c0_92 = arith.constant 0 : index
    %c0_93 = arith.constant 0 : index
    %269 = vector.load %arg9[%c1_91, %c0_92, %c0_93] : memref<2x128x32xf32, #tpu.memory_space<vmem>>, vector<1x128x32xf32>
    %270 = vector.shape_cast %269 : vector<1x128x32xf32> to vector<128x32xf32>
    %cst_94 = arith.constant dense<0.000000e+00> : vector<24x32xf32>
    %271 = tpu.matmul %268, %270, %cst_94 {dimension_numbers = #tpu.dot_dimension_numbers<[1], [0], [0], [1], [0, 0, 1, 1], [], []>} : vector<24x128xf32>, vector<128x32xf32>, vector<24x32xf32> -> vector<24x32xf32>
    %272 = arith.addf %228, %271 : vector<24x32xf32>
    %273 = vector.broadcast %158 : vector<1x32xf32> to vector<24x32xf32>
    %274 = arith.addf %272, %273 : vector<24x32xf32>
    %c0_95 = arith.constant 0 : index
    %c0_96 = arith.constant 0 : index
    %275 = vector.load %arg10[%c0_95, %c0_96] : memref<8x32xf32, #tpu.memory_space<vmem>>, vector<8x32xf32>
    %276 = vector.extract_strided_slice %275 {offsets = [0, 0], sizes = [1, 32], strides = [1, 1]} : vector<8x32xf32> to vector<1x32xf32>
    %277 = vector.extract_strided_slice %275 {offsets = [1, 0], sizes = [1, 32], strides = [1, 1]} : vector<8x32xf32> to vector<1x32xf32>
    %cst_97 = arith.constant dense<0.000000e+00> : vector<24xf32>
    %278 = vector.multi_reduction <add>, %274, %cst_97 [1] : vector<24x32xf32> to vector<24xf32>
    %279 = vector.shape_cast %278 : vector<24xf32> to vector<24x1xf32>
    %cst_98 = arith.constant 3.200000e+01 : f32
    %280 = vector.broadcast %cst_98 : f32 to vector<24x1xf32>
    %281 = arith.divf %279, %280 : vector<24x1xf32>
    %282 = vector.broadcast %281 : vector<24x1xf32> to vector<24x32xf32>
    %283 = arith.subf %274, %282 : vector<24x32xf32>
    %284 = arith.mulf %283, %283 : vector<24x32xf32>
    %cst_99 = arith.constant dense<0.000000e+00> : vector<24xf32>
    %285 = vector.multi_reduction <add>, %284, %cst_99 [1] : vector<24x32xf32> to vector<24xf32>
    %286 = vector.shape_cast %285 : vector<24xf32> to vector<24x1xf32>
    %cst_100 = arith.constant 3.200000e+01 : f32
    %287 = vector.broadcast %cst_100 : f32 to vector<24x1xf32>
    %288 = arith.divf %286, %287 : vector<24x1xf32>
    %289 = vector.broadcast %281 : vector<24x1xf32> to vector<24x32xf32>
    %290 = arith.subf %274, %289 : vector<24x32xf32>
    %cst_101 = arith.constant 9.99999997E-7 : f32
    %291 = vector.broadcast %cst_101 : f32 to vector<24x1xf32>
    %292 = arith.addf %288, %291 : vector<24x1xf32>
    %293 = math.rsqrt %292 : vector<24x1xf32>
    %294 = vector.broadcast %293 : vector<24x1xf32> to vector<24x32xf32>
    %295 = arith.mulf %290, %294 : vector<24x32xf32>
    %296 = vector.broadcast %276 : vector<1x32xf32> to vector<24x32xf32>
    %297 = arith.mulf %295, %296 : vector<24x32xf32>
    %298 = vector.broadcast %277 : vector<1x32xf32> to vector<24x32xf32>
    %299 = arith.addf %297, %298 : vector<24x32xf32>
    %300 = vector.broadcast %4 : vector<24x1xf32> to vector<24x32xf32>
    %301 = arith.mulf %299, %300 : vector<24x32xf32>
    %cst_102 = arith.constant dense<0.000000e+00> : vector<32xf32>
    %302 = vector.multi_reduction <add>, %301, %cst_102 [0] : vector<24x32xf32> to vector<32xf32>
    %303 = vector.shape_cast %302 : vector<32xf32> to vector<1x32xf32>
    %304 = vector.broadcast %11 : vector<24x1xf32> to vector<24x32xf32>
    %305 = arith.mulf %299, %304 : vector<24x32xf32>
    %cst_103 = arith.constant dense<0.000000e+00> : vector<32xf32>
    %306 = vector.multi_reduction <add>, %305, %cst_103 [0] : vector<24x32xf32> to vector<32xf32>
    %307 = vector.shape_cast %306 : vector<32xf32> to vector<1x32xf32>
    %cst_104 = arith.constant 6.250000e-02 : f32
    %308 = vector.broadcast %cst_104 : f32 to vector<1x32xf32>
    %309 = arith.mulf %307, %308 : vector<1x32xf32>
    %310 = tpu.concatenate %303, %309 in 1 : vector<1x32xf32>, vector<1x32xf32> -> vector<1x64xf32>
    %c0_105 = arith.constant 0 : index
    %c0_106 = arith.constant 0 : index
    %311 = vector.load %arg12[%c0_105, %c0_106] : memref<2x256xf32, #tpu.memory_space<vmem>>, vector<2x256xf32>
    %c0_107 = arith.constant 0 : index
    %c0_108 = arith.constant 0 : index
    %312 = vector.load %arg11[%c0_107, %c0_108] : memref<64x256xf32, #tpu.memory_space<vmem>>, vector<64x256xf32>
    %cst_109 = arith.constant dense<0.000000e+00> : vector<1x256xf32>
    %313 = tpu.matmul %310, %312, %cst_109 {dimension_numbers = #tpu.dot_dimension_numbers<[1], [0], [0], [1], [0, 0, 1, 1], [], []>} : vector<1x64xf32>, vector<64x256xf32>, vector<1x256xf32> -> vector<1x256xf32>
    %314 = vector.extract_strided_slice %311 {offsets = [0, 0], sizes = [1, 256], strides = [1, 1]} : vector<2x256xf32> to vector<1x256xf32>
    %315 = arith.addf %313, %314 : vector<1x256xf32>
    %cst_110 = arith.constant 0.000000e+00 : f32
    %316 = vector.broadcast %cst_110 : f32 to vector<1x256xf32>
    %317 = arith.maximumf %315, %316 : vector<1x256xf32>
    %c0_111 = arith.constant 0 : index
    %c0_112 = arith.constant 0 : index
    %318 = vector.load %arg13[%c0_111, %c0_112] : memref<256x256xf32, #tpu.memory_space<vmem>>, vector<256x256xf32>
    %cst_113 = arith.constant dense<0.000000e+00> : vector<1x256xf32>
    %319 = tpu.matmul %317, %318, %cst_113 {dimension_numbers = #tpu.dot_dimension_numbers<[1], [0], [0], [1], [0, 0, 1, 1], [], []>} : vector<1x256xf32>, vector<256x256xf32>, vector<1x256xf32> -> vector<1x256xf32>
    %320 = vector.extract_strided_slice %311 {offsets = [1, 0], sizes = [1, 256], strides = [1, 1]} : vector<2x256xf32> to vector<1x256xf32>
    %321 = arith.addf %319, %320 : vector<1x256xf32>
    %cst_114 = arith.constant 0.000000e+00 : f32
    %322 = vector.broadcast %cst_114 : f32 to vector<1x256xf32>
    %323 = arith.maximumf %321, %322 : vector<1x256xf32>
    %c0_115 = arith.constant 0 : index
    %c0_116 = arith.constant 0 : index
    %324 = vector.load %arg13[%c0_115, %c0_116] : memref<256x256xf32, #tpu.memory_space<vmem>>, vector<256x256xf32>
    %cst_117 = arith.constant dense<0.000000e+00> : vector<1x256xf32>
    %325 = tpu.matmul %323, %324, %cst_117 {dimension_numbers = #tpu.dot_dimension_numbers<[1], [0], [0], [1], [0, 0, 1, 1], [], []>} : vector<1x256xf32>, vector<256x256xf32>, vector<1x256xf32> -> vector<1x256xf32>
    %326 = vector.extract_strided_slice %311 {offsets = [1, 0], sizes = [1, 256], strides = [1, 1]} : vector<2x256xf32> to vector<1x256xf32>
    %327 = arith.addf %325, %326 : vector<1x256xf32>
    %cst_118 = arith.constant 0.000000e+00 : f32
    %328 = vector.broadcast %cst_118 : f32 to vector<1x256xf32>
    %329 = arith.maximumf %327, %328 : vector<1x256xf32>
    %c0_119 = arith.constant 0 : index
    %c0_120 = arith.constant 0 : index
    %330 = vector.load %arg14[%c0_119, %c0_120] : memref<256x1xf32, #tpu.memory_space<vmem>>, vector<256x1xf32>
    %cst_121 = arith.constant dense<0.000000e+00> : vector<1x1xf32>
    %331 = tpu.matmul %329, %330, %cst_121 {dimension_numbers = #tpu.dot_dimension_numbers<[1], [0], [0], [1], [0, 0, 1, 1], [], []>} : vector<1x256xf32>, vector<256x1xf32>, vector<1x1xf32> -> vector<1x1xf32>
    %c0_122 = arith.constant 0 : index
    %c0_123 = arith.constant 0 : index
    %332 = vector.load %arg15[%c0_122, %c0_123] : memref<1x1xf32, #tpu.memory_space<vmem>>, vector<1x1xf32>
    %333 = arith.addf %331, %332 : vector<1x1xf32>
    %334 = vector.shape_cast %333 : vector<1x1xf32> to vector<1x1x1xf32>
    %c0_124 = arith.constant 0 : index
    %c0_125 = arith.constant 0 : index
    %c0_126 = arith.constant 0 : index
    %335 = vector.load %arg16[%c0_124, %c0_125, %c0_126] : memref<1x1x1xf32, #tpu.memory_space<vmem>>, vector<1x1x1xf32>
    tpu.vector_store %arg16[%c0_124, %c0_125, %c0_126], %334 {strides = array<i32>} : memref<1x1x1xf32, #tpu.memory_space<vmem>>, vector<1x1x1xf32>,
    return
  }
  func.func @transform_0(%arg0: i32) -> (i32, i32) {
    %c0_i32 = arith.constant 0 : i32
    %c0_i32_0 = arith.constant 0 : i32
    return %arg0, %c0_i32 : i32, i32
  }
  func.func @transform_1(%arg0: i32) -> (i32, i32) {
    %c0_i32 = arith.constant 0 : i32
    %c0_i32_0 = arith.constant 0 : i32
    %c0_i32_1 = arith.constant 0 : i32
    return %c0_i32, %c0_i32_0 : i32, i32
  }
  func.func @transform_2(%arg0: i32) -> (i32, i32) {
    %c0_i32 = arith.constant 0 : i32
    %c0_i32_0 = arith.constant 0 : i32
    %c0_i32_1 = arith.constant 0 : i32
    return %c0_i32, %c0_i32_0 : i32, i32
  }
  func.func @transform_3(%arg0: i32) -> (i32, i32, i32) {
    %c0_i32 = arith.constant 0 : i32
    %c0_i32_0 = arith.constant 0 : i32
    %c0_i32_1 = arith.constant 0 : i32
    %c0_i32_2 = arith.constant 0 : i32
    return %c0_i32, %c0_i32_0, %c0_i32_1 : i32, i32, i32
  }
  func.func @transform_4(%arg0: i32) -> (i32, i32, i32) {
    %c0_i32 = arith.constant 0 : i32
    %c0_i32_0 = arith.constant 0 : i32
    %c0_i32_1 = arith.constant 0 : i32
    %c0_i32_2 = arith.constant 0 : i32
    return %c0_i32, %c0_i32_0, %c0_i32_1 : i32, i32, i32
  }
  func.func @transform_5(%arg0: i32) -> (i32, i32, i32) {
    %c0_i32 = arith.constant 0 : i32
    %c0_i32_0 = arith.constant 0 : i32
    %c0_i32_1 = arith.constant 0 : i32
    %c0_i32_2 = arith.constant 0 : i32
    return %c0_i32, %c0_i32_0, %c0_i32_1 : i32, i32, i32
  }
  func.func @transform_6(%arg0: i32) -> (i32, i32, i32) {
    %c0_i32 = arith.constant 0 : i32
    %c0_i32_0 = arith.constant 0 : i32
    %c0_i32_1 = arith.constant 0 : i32
    %c0_i32_2 = arith.constant 0 : i32
    return %c0_i32, %c0_i32_0, %c0_i32_1 : i32, i32, i32
  }
  func.func @transform_7(%arg0: i32) -> (i32, i32, i32) {
    %c0_i32 = arith.constant 0 : i32
    %c0_i32_0 = arith.constant 0 : i32
    %c0_i32_1 = arith.constant 0 : i32
    %c0_i32_2 = arith.constant 0 : i32
    return %c0_i32, %c0_i32_0, %c0_i32_1 : i32, i32, i32
  }
  func.func @transform_8(%arg0: i32) -> (i32, i32, i32) {
    %c0_i32 = arith.constant 0 : i32
    %c0_i32_0 = arith.constant 0 : i32
    %c0_i32_1 = arith.constant 0 : i32
    %c0_i32_2 = arith.constant 0 : i32
    return %c0_i32, %c0_i32_0, %c0_i32_1 : i32, i32, i32
  }
  func.func @transform_9(%arg0: i32) -> (i32, i32) {
    %c0_i32 = arith.constant 0 : i32
    %c0_i32_0 = arith.constant 0 : i32
    %c0_i32_1 = arith.constant 0 : i32
    return %c0_i32, %c0_i32_0 : i32, i32
  }
  func.func @transform_10(%arg0: i32) -> (i32, i32) {
    %c0_i32 = arith.constant 0 : i32
    %c0_i32_0 = arith.constant 0 : i32
    %c0_i32_1 = arith.constant 0 : i32
    return %c0_i32, %c0_i32_0 : i32, i32
  }
  func.func @transform_11(%arg0: i32) -> (i32, i32) {
    %c0_i32 = arith.constant 0 : i32
    %c0_i32_0 = arith.constant 0 : i32
    %c0_i32_1 = arith.constant 0 : i32
    return %c0_i32, %c0_i32_0 : i32, i32
  }
  func.func @transform_12(%arg0: i32) -> (i32, i32) {
    %c0_i32 = arith.constant 0 : i32
    %c0_i32_0 = arith.constant 0 : i32
    %c0_i32_1 = arith.constant 0 : i32
    return %c0_i32, %c0_i32_0 : i32, i32
  }
  func.func @transform_13(%arg0: i32) -> (i32, i32) {
    %c0_i32 = arith.constant 0 : i32
    %c0_i32_0 = arith.constant 0 : i32
    %c0_i32_1 = arith.constant 0 : i32
    return %c0_i32, %c0_i32_0 : i32, i32
  }
  func.func @transform_14(%arg0: i32) -> (i32, i32) {
    %c0_i32 = arith.constant 0 : i32
    %c0_i32_0 = arith.constant 0 : i32
    %c0_i32_1 = arith.constant 0 : i32
    return %c0_i32, %c0_i32_0 : i32, i32
  }
  func.func @transform_15(%arg0: i32) -> (i32, i32, i32) {
    %c0_i32 = arith.constant 0 : i32
    %c0_i32_0 = arith.constant 0 : i32
    %c0_i32_1 = arith.constant 0 : i32
    return %arg0, %c0_i32, %c0_i32_0 : i32, i32, i32
  }
}

</mosaic_0001>

<bundles_post_ra>
// kernel: dinov2_aesthetic_score.1
= control target key start
LH: loop header
LB: loop body
LE: loop exit
PB: predicated region body
PF: predicated region fallthrough
CT: control target
= control target key end

     0   :  { %s4049_s20 = smov 0   ;;  %s5398_s0 = inlined_call_operand.vmem [shape: f32[48,48], index: 0, kind: input, shape index: {}]   ;;  %s5399_s1 = inlined_call_operand.vmem [shape: f32[48,32], index: 1, kind: input, shape index: {}]   ;;  %s5400_s2 = inlined_call_operand.vmem [shape: f32[24,32], index: 2, kind: input, shape index: {}]   ;;  %s5401_s3 = inlined_call_operand.vmem [shape: f32[2,8,32], index: 3, kind: input, shape index: {}]   ;;  %s5402_s4 = inlined_call_operand.vmem [shape: f32[2,32,96], index: 4, kind: input, shape index: {}]   ;;  %s5403_s5 = inlined_call_operand.vmem [shape: f32[2,2,128], index: 5, kind: input, shape index: {}]   ;;  %s5404_s6 = inlined_call_operand.vmem [shape: f32[2,32,32], index: 6, kind: input, shape index: {}]   ;;  %s5405_s7 = inlined_call_operand.vmem [shape: f32[2,32,128], index: 7, kind: input, shape index: {}]   ;;  %s5406_s8 = inlined_call_operand.vmem [shape: f32[2,128,32], index: 8, kind: input, shape index: {}]   ;;  %s5407_s9 = inlined_call_operand.vmem [shape: f32[8,32], index: 9, kind: input, shape index: {}]   ;;  %s5408_s10 = inlined_call_operand.vmem [shape: f32[64,256], index: 10, kind: input, shape index: {}]   ;;  %s5409_s11 = inlined_call_operand.vmem [shape: f32[2,256], index: 11, kind: input, shape index: {}]   ;;  %s5410_s12 = inlined_call_operand.vmem [shape: f32[256,256], index: 12, kind: input, shape index: {}]   ;;  %s5411_s13 = inlined_call_operand.vmem [shape: f32[256,1], index: 13, kind: input, shape index: {}]   ;;  %s5412_s14 = inlined_call_operand.<no memory space> [shape: f32[1,1], index: 14, kind: input, shape index: {}]   ;;  %s5413_s15 = inlined_call_operand.vmem [shape: f32[2,1,1], index: 15, kind: output, shape index: {}]  }
   0x1   :  { %v20_v0 = vstv %s5412_s14 }
   0x2   :  { %21 = vst [vmem:[#allocation2] sm:$0x1] %v20_v0 }
   0x3 LB: > { %s4055_s21 = sadd.s32 4294967295, %s3954_s20   ;;  %p3248_p0 = scmp.ge.s32.totalorder %s3954_s20, 1  ;;  %s3954_s20 = sphi %s4049_s20, %s27_s20  }
   0x4   : > { %p440_p1 = scmp.lt.s32.totalorder %s3954_s20, 3 }
   0x6   : > { %p441_p2 = pnand %p3248_p0, %p440_p1 }
   0x8   : > { %444 = sbr.rel (%p441_p2) target bundleno = 6820 (0x1aa4), region = 80 }
   0xd   : > { %v535_v1 = vld [vmem:[%s5399_s1 + $0x28] sm:$0xff]  ;;  %s486_s14 = smul.u32 3, %s4055_s21  ;;  %v3956_v2 = vmov 0.0   ;;  %v534_v3 = vld [vmem:[%s5399_s1 + $0x20] sm:$0xff]  ;;  %vm3957_vm0 = vmmov 0   ;;  %v533_v4 = vld [vmem:[%s5399_s1 + $0x18] sm:$0xff]  ;;  %v495_v50 = vlaneseq }
   0xe   : > { %3515 = vmatprep.subr.mxu0 %v3956_v2  ;;  %3527 = vmatprep.mubr.msk.f32.mxu0 %vm3957_vm0, %v3956_v2  ;;  %v532_v5 = vld [vmem:[%s5399_s1 + $0x10] sm:$0xff]  ;;  %v531_v6 = vld [vmem:[%s5399_s1 + $0x8] sm:$0xff]  ;;  %v530_v7 = vld [vmem:[%s5399_s1] sm:$0xff]  ;;  %vm539_vm1 = vcmask 392192   ;;  %vm631_vm2 = vcmask 261120   ;;  %s3958_s28 = smov 96  }
   0xf   : > { %3516 = vmatpush3.msra.mxu0 %v535_v1  ;;  %p487_p3 = scmp.lt.s32.totalorder %s486_s14, 5  ;;  %3536 = vmatprep.subr.mxu1 %v3956_v2  ;;  %v536_v11 = vld [vmem:[%s5400_s2] sm:$0xff]  ;;  %v537_v15 = vld [vmem:[%s5400_s2 + $0x8] sm:$0xff]  ;;  %v538_v20 = vld [vmem:[%s5400_s2 + $0x10] sm:$0xff]  ;;  %v4142_v54 = vshrl.u32 %v495_v50, 7  ;;  %vm792_vm3 = vcmask 130048  }
  0x10   : > { %3517 = vmatprep.subr.mxu0 %v3956_v2  ;;  %3544 = vmatprep.mubr.msk.f32.mxu1 %vm3957_vm0, %v3956_v2  ;;  %v689_v41 = vld [vmem:[%s5402_s4 + $0x18] sm:$0xff]  ;;  %v688_v42 = vld [vmem:[%s5402_s4 + $0x10] sm:$0xff]  ;;  %v687_v43 = vld [vmem:[%s5402_s4 + $0x8] sm:$0xff]  ;;  %vm885_vm5 = vcmask 195584   ;;  %s3960_s29 = smov 64   ;;  %s3962_s16 = smov 112  }
  0x11   : > { %3518 = vmatpush3.msra.mxu0 %v534_v3  ;;  %s5427_s14 = smov (!%p487_p3, %s486_s14), 5  ;;  %3537 = vmatpush3.msra.mxu1 %v689_v41  ;;  %v686_v44 = vld [vmem:[%s5402_s4] sm:$0xff]  ;;  %v4145_v56 = vsub.s32 0, %v4142_v54  ;;  %v4153_v58 = vsub.s32 1, %v4142_v54  ;;  %s3963_s17 = smov 48   ;;  %vm499_vm6 = vcmp.eq.s32.totalorder %v4142_v54, 0 }
  0x12   : > { %3519 = vmatprep.subr.mxu0 %v3956_v2  ;;  %s3249_s30 = sshll.u32 %s5427_s14, 3  ;;  %3538 = vmatprep.subr.mxu1 %v3956_v2  ;;  %v4150_v57 = vld [vmem:[%s5401_s3] sm:$0xff]  ;;  %s3964_s27 = smov 16   ;;  %vm508_vm7 = vcmp.ge.s32.totalorder %v4142_v54, 1  ;;  %vm2795_vm9 = vcmask 523264   ;;  %vm3195_vm10 = vcmask 0  }
  0x13   : > { %3520 = vmatpush3.msra.mxu0 %v533_v4  ;;  %s490_s22 = scalar_lea.vmem %s5398_s0, %s3249_s30  ;;  %3539 = vmatpush3.msra.mxu1 %v688_v42  ;;  %5418 = vst [vmem:[#allocation3_spill] sm:$0xff] %v4145_v56  ;;  %5419 = vst [vmem:[#allocation4_spill] sm:$0xff] %v4153_v58  ;;  %v675_v59 = vrot.slane %v4150_v57, %v4145_v56  ;;  %v682_v62 = vrot.slane %v4150_v57, %v4153_v58  ;;  %s3961_s30 = smov 80  }
  0x14   : > { %3521 = vmatprep.subr.mxu0 %v3956_v2  ;;  %v527_v8 = vld [vmem:[%s490_s22] sm:$0xff]  ;;  %v528_v9 = vld [vmem:[%s490_s22 + $0x8] sm:$0xff]  ;;  %v529_v10 = vld [vmem:[%s490_s22 + $0x10] sm:$0xff]  ;;  %3540 = vmatprep.subr.mxu1 %v3956_v2  ;;  %p492_p4 = scmp.lt.s32.totalorder %s4055_s21, 1 }
  0x15   : > { %3522 = vmatpush3.msra.mxu0 %v532_v5  ;;  %3541 = vmatpush3.msra.mxu1 %v687_v43 }
  0x16   : > { %3523 = vmatprep.subr.mxu0 %v3956_v2  ;;  %3542 = vmatprep.subr.mxu1 %v3956_v2  ;;  %s5429_s21 = smov (!%p492_p4, %s4055_s21), 1 }
  0x17   : > { %3524 = vmatpush3.msra.mxu0 %v531_v6  ;;  %3543 = vmatpush3.msra.mxu1 %v686_v44  ;;  %s494_s23 = scalar_lea.vmem %s5413_s15, %s5429_s21 }
  0x18   : > { %3525 = vmatprep.subr.mxu0 %v3956_v2  ;;  %3553 = vmatprep.subr.mxu1 %v3956_v2 }
  0x19   : > { %3526 = vmatpush3.msra.mxu0 %v530_v7 }
  0x1a   : > { %3528 = vmatmul.mubr.msk.f32.vlgmr.msra.gmra.mxu0 %vm539_vm1, %v527_v8  ;;  %3598 = vmatprep.subr.mxu0 %v3956_v2 }
  0x1b   : > { %3530 = vmatprep.mubr.msk.f32.mxu0 %vm3957_vm0, %v3956_v2 }
  0x1e   : > { %3531 = vmatmul.mubr.msk.f32.gmra.mxu0 %vm539_vm1, %v528_v9 }
  0x1f   : > { %3533 = vmatprep.mubr.msk.f32.mxu0 %vm3957_vm0, %v3956_v2 }
  0x22   : > { %3534 = vmatmul.mubr.msk.f32.gmra.mxu0 %vm539_vm1, %v529_v10  ;;  %v4171_v10 = vld [vmem:[%s5403_s5] sm:$0x3] }
  0x23   : > { %3604 = vmatprep.mubr.msk.f32.mxu0 %vm3957_vm0, %v3956_v2 }
  0xda   : > { %v615_v12 = vpop.f32.mrf.mxu0 }
  0xdb   : > { %v4102_v13 = vadd.f32 %v615_v12, %v536_v11 }
  0xdc   : > { %v3529_v14 = vpop.f32.mrf.mxu0 }
  0xdd   : > { %v632_v16 = vsel %vm631_vm2, %v4102_v13, 0.0  ;;  %v693_v14 = vrot.slane %v4171_v10, %v4145_v56 }
  0xde   : > { %633 = vadd.xlane.f32.xlu0 %v632_v16  ;;  %v620_v17 = vpop.f32.mrf.mxu0 }
  0xdf   : > { %v4109_v18 = vadd.f32 %v620_v17, %v537_v15 }
  0xe0   : > { %v3532_v19 = vpop.f32.mrf.mxu0 }
  0xe1   : > { %v635_v21 = vsel %vm631_vm2, %v4109_v18, 0.0 }
  0xe2   : > { %636 = vadd.xlane.f32.xlu0 %v635_v21  ;;  %v625_v22 = vpop.f32.mrf.mxu0 }
  0xe3   : > { %v4116_v23 = vadd.f32 %v625_v22, %v538_v20 }
  0xe4   : > { %v3535_v24 = vpop.f32.mrf.mxu0 }
  0xe5   : > { %v638_v25 = vsel %vm631_vm2, %v4116_v23, 0.0 }
  0xe6   : > { %639 = vadd.xlane.f32.xlu1 %v638_v25 }
 0x167   : > { %v634_v26 = vpop.xlane.xlu0 %633 }
 0x168   : > { %v642_v27 = vmul.f32 0.03125, %v634_v26 }
 0x16a   : > { %v645_v28 = vsub.f32 %v4102_v13, %v642_v27  ;;  %v524_v27 = vand.u32 127, %v495_v50 }
 0x16b   : > { %v637_v29 = vpop.xlane.xlu0 %636 }
 0x16c   : > { %v643_v30 = vmul.f32 0.03125, %v637_v29  ;;  %v648_v31 = vmul.f32 %v645_v28, %v645_v28  ;;  %vm525_vm4 = vcmp.lt.s32.totalorder %v524_v27, 17 }
 0x16e   : > { %v646_v32 = vsub.f32 %v4109_v18, %v643_v30  ;;  %v651_v33 = vsel %vm631_vm2, %v648_v31, 0.0 }
 0x16f   : > { %652 = vadd.xlane.f32.xlu1 %v651_v33  ;;  %v640_v34 = vpop.xlane.xlu1 %639 }
 0x170   : > { %v644_v35 = vmul.f32 0.03125, %v640_v34  ;;  %v649_v36 = vmul.f32 %v646_v32, %v646_v32 }
 0x172   : > { %v647_v37 = vsub.f32 %v4116_v23, %v644_v35  ;;  %v654_v38 = vsel %vm631_vm2, %v649_v36, 0.0 }
 0x173   : > { %655 = vadd.xlane.f32.xlu0 %v654_v38 }
 0x174   : > { %v650_v39 = vmul.f32 %v647_v37, %v647_v37 }
 0x176   : > { %v657_v40 = vsel %vm631_vm2, %v650_v39, 0.0 }
 0x177   : > { %658 = vadd.xlane.f32.xlu1 %v657_v40 }
 0x1f8   : > { %v653_v45 = vpop.xlane.xlu1 %652 }
 0x1f9   : > { %v660_v46 = vmul.f32 0.03125, %v653_v45 }
 0x1fb   : > { %v663_v47 = vadd.f32 1e-06, %v660_v46 }
 0x1fc   : > { %v656_v48 = vpop.xlane.xlu0 %655 }
 0x1fd   : > { %3858 = vrsqrt.f32 %v663_v47  ;;  %v661_v49 = vmul.f32 0.03125, %v656_v48 }
 0x1ff   : > { %v664_v51 = vadd.f32 1e-06, %v661_v49 }
 0x200   : > { %v659_v52 = vpop.xlane.xlu1 %658 }
 0x201   : > { %3860 = vrsqrt.f32 %v664_v51  ;;  %v662_v53 = vmul.f32 0.03125, %v659_v52 }
 0x203   : > { %v665_v55 = vadd.f32 1e-06, %v662_v53 }
 0x205   : > { %3862 = vrsqrt.f32 %v665_v55 }
 0x20a   : > { %v3859_v60 = vpop.eup %3858 }
 0x20b   : > { %v669_v61 = vmul.f32 %v3859_v60, %v645_v28  ;;  %v3959_v28 = vmov -1e+30  }
 0x20c   : > { %v4205_v29 = vsel %vm525_vm4, 0.0, %v3959_v28 }
 0x20d   : > { %v676_v63 = vmul.f32 %v675_v59, %v669_v61 }
 0x20e   : > { %v3861_v0 = vpop.eup %3860 }
 0x20f   : > { %v683_v1 = vadd.f32 %v682_v62, %v676_v63  ;;  %v670_v3 = vmul.f32 %v3861_v0, %v646_v32 }
 0x211   : > { %3545 = vmatmul.mubr.msk.f32.vlgmr.msra.gmra.mxu1 %vm631_vm2, %v683_v1  ;;  %v677_v4 = vmul.f32 %v675_v59, %v670_v3 }
 0x212   : > { %v3863_v5 = vpop.eup %3862  ;;  %3547 = vmatprep.mubr.msk.f32.mxu1 %vm3957_vm0, %v3956_v2 }
 0x213   : > { %v684_v6 = vadd.f32 %v682_v62, %v677_v4  ;;  %v671_v7 = vmul.f32 %v3863_v5, %v647_v37 }
 0x215   : > { %3548 = vmatmul.mubr.msk.f32.gmra.mxu1 %vm631_vm2, %v684_v6  ;;  %v678_v8 = vmul.f32 %v675_v59, %v671_v7 }
 0x216   : > { %3550 = vmatprep.mubr.msk.f32.mxu1 %vm3957_vm0, %v3956_v2 }
 0x217   : > { %v685_v9 = vadd.f32 %v682_v62, %v678_v8 }
 0x219   : > { %3551 = vmatmul.mubr.msk.f32.gmra.mxu1 %vm631_vm2, %v685_v9 }
 0x21a   : > { %3559 = vmatprep.mubr.msk.f32.mxu1 %vm3957_vm0, %v3956_v2 }
 0x2d1   : > { %v769_v11 = vpop.f32.mrf.mxu1 }
 0x2d2   : > { %v4179_v20 = vadd.f32 %v769_v11, %v693_v14 }
 0x2d3   : > { %v3546_v12 = vpop.f32.mrf.mxu1 }
 0x2d5   : > { %v774_v15 = vpop.f32.mrf.mxu1 }
 0x2d6   : > { %v4175_v16 = vadd.f32 %v774_v15, %v693_v14 }
 0x2d7   : > { %v3549_v17 = vpop.f32.mrf.mxu1 }
 0x2d8   : > { %788 = vrot.lane.b32.xlu1 %v4175_v16, %s3958_s28 }
 0x2d9   : > { %v779_v19 = vpop.f32.mrf.mxu1 }
 0x2da   : > { %v4181_v21 = vadd.f32 %v779_v19, %v693_v14 }
 0x2db   : > { %v3552_v22 = vpop.f32.mrf.mxu1 }
 0x2dc   : > { %786 = vrot.lane.b32.xlu1 %v4179_v20, %s3958_s28  ;;  %790 = vrot.lane.b32.xlu0 %v4181_v21, %s3958_s28 }
 0x34a   : > { %v789_v25 = vpop.permute.xlu1 %788 }
 0x34e   : > { %v791_v24 = vpop.permute.xlu0 %790  ;;  %v787_v26 = vpop.permute.xlu1 %786 }
 0x34f   : > { %3554 = vmatpush3.xpose.msk.msra.mxu1 %vm792_vm3, %v791_v24 }
 0x350   : > { %3555 = vmatprep.subr.mxu1 %v3956_v2 }
 0x353   : > { %3556 = vmatpush3.xpose.msk.msra.mxu1 %vm792_vm3, %v789_v25 }
 0x354   : > { %3557 = vmatprep.subr.mxu1 %v3956_v2 }
 0x357   : > { %3558 = vmatpush3.xpose.msk.msra.mxu1 %vm792_vm3, %v787_v26 }
 0x358   : > { %3568 = vmatprep.subr.mxu1 %v3956_v2 }
 0x35a   : > { %3560 = vmatmul.mubr.msk.f32.vlgmr.msra.gmra.mxu1 %vm792_vm3, %v4179_v20 }
 0x35b   : > { %3562 = vmatprep.mubr.msk.f32.mxu1 %vm3957_vm0, %v3956_v2 }
 0x35e   : > { %3563 = vmatmul.mubr.msk.f32.gmra.mxu1 %vm792_vm3, %v4175_v16 }
 0x35f   : > { %3565 = vmatprep.mubr.msk.f32.mxu1 %vm3957_vm0, %v3956_v2 }
 0x362   : > { %3566 = vmatmul.mubr.msk.f32.gmra.mxu1 %vm792_vm3, %v4181_v21 }
 0x363   : > { %3574 = vmatprep.mubr.msk.f32.mxu1 %vm3957_vm0, %v3956_v2 }
 0x41a   : > { %v871_v30 = vpop.f32.mrf.mxu1 }
 0x41b   : > { %v872_v31 = vadd.f32 %v871_v30, %v4205_v29 }
 0x41c   : > { %v3561_v32 = vpop.f32.mrf.mxu1 }
 0x41d   : > { %v886_v33 = vsel %vm885_vm5, %v872_v31, -inf }
 0x41e   : > { %887 = vmax.xlane.f32.xlu1 %v886_v33  ;;  %v876_v34 = vpop.f32.mrf.mxu1 }
 0x41f   : > { %v877_v35 = vadd.f32 %v876_v34, %v4205_v29 }
 0x420   : > { %v3564_v36 = vpop.f32.mrf.mxu1 }
 0x421   : > { %v889_v37 = vsel %vm885_vm5, %v877_v35, -inf }
 0x422   : > { %890 = vmax.xlane.f32.xlu0 %v889_v37  ;;  %v881_v38 = vpop.f32.mrf.mxu1 }
 0x423   : > { %v882_v39 = vadd.f32 %v881_v38, %v4205_v29 }
 0x424   : > { %v3567_v40 = vpop.f32.mrf.mxu1 }
 0x425   : > { %v892_v41 = vsel %vm885_vm5, %v882_v39, -inf }
 0x426   : > { %893 = vmax.xlane.f32.xlu0 %v892_v41 }
 0x42f   : > { %923 = vrot.lane.b32.xlu1 %v4181_v21, %s3960_s29 }
 0x433   : > { %919 = vrot.lane.b32.xlu1 %v4179_v20, %s3960_s29 }
 0x437   : > { %1027 = vrot.lane.b32.xlu1 %v4181_v21, %s3961_s30 }
 0x43b   : > { %1025 = vrot.lane.b32.xlu1 %v4175_v16, %s3961_s30 }
 0x4a7   : > { %v888_v42 = vpop.xlane.xlu1 %887 }
 0x4a8   : > { %v895_v43 = vsub.f32 %v872_v31, %v888_v42 }
 0x4aa   : > { %v898_v44 = vmul.f32 1.442695, %v895_v43 }
 0x4ab   : > { %v924_v45 = vpop.permute.xlu1 %923  ;;  %v891_v46 = vpop.xlane.xlu0 %890 }
 0x4ac   : > { %3864 = vpow2.f32 %v898_v44  ;;  %v896_v47 = vsub.f32 %v877_v35, %v891_v46  ;;  %3569 = vmatpush3.msra.mxu1 %v924_v45 }
 0x4ad   : > { %3570 = vmatprep.subr.mxu1 %v3956_v2 }
 0x4ae   : > { %v900_v48 = vmul.f32 1.442695, %v896_v47 }
 0x4af   : > { %v894_v53 = vpop.xlane.xlu0 %893  ;;  %v920_v62 = vpop.permute.xlu1 %919 }
 0x4b0   : > { %3866 = vpow2.f32 %v900_v48  ;;  %v897_v55 = vsub.f32 %v882_v39, %v894_v53 }
 0x4b2   : > { %v902_v59 = vmul.f32 1.442695, %v897_v55 }
 0x4b3   : > { %v1028_v63 = vpop.permute.xlu1 %1027 }
 0x4b4   : > { %3868 = vpow2.f32 %v902_v59 }
 0x4b7   : > { %v1026_v0 = vpop.permute.xlu1 %1025 }
 0x4b9   : > { %v3865_v49 = vpop.eup %3864 }
 0x4ba   : > { %v904_v50 = vsel %vm885_vm5, %v3865_v49, 0.0 }
 0x4bb   : > { %905 = vadd.xlane.f32.xlu0 %v904_v50 }
 0x4bd   : > { %v3867_v51 = vpop.eup %3866 }
 0x4be   : > { %v907_v52 = vsel %vm885_vm5, %v3867_v51, 0.0 }
 0x4bf   : > { %908 = vadd.xlane.f32.xlu1 %v907_v52 }
 0x4c1   : > { %v3869_v60 = vpop.eup %3868 }
 0x4c2   : > { %v910_v61 = vsel %vm885_vm5, %v3869_v60, 0.0 }
 0x4d0   : > { %1017 = vrot.lane.b32.xlu1 %v4179_v20, %s3962_s16 }
 0x4d1   : > { %921 = vrot.lane.b32.xlu0 %v4175_v16, %s3960_s29 }
 0x4d4   : > { %1021 = vrot.lane.b32.xlu1 %v4181_v21, %s3962_s16 }
 0x4f0   : > { %911 = vadd.xlane.f32.xlu0 %v910_v61 }
 0x506   : > { %1023 = vrot.lane.b32.xlu0 %v4179_v20, %s3961_s30 }
 0x50a   : > { %1019 = vrot.lane.b32.xlu0 %v4175_v16, %s3962_s16 }
 0x544   : > { %v906_v1 = vpop.xlane.xlu0 %905 }
 0x545   : > { %3870 = vrcp.f32 %v906_v1 }
 0x548   : > { %v909_v3 = vpop.xlane.xlu1 %908  ;;  %v922_v4 = vpop.permute.xlu0 %921 }
 0x549   : > { %3872 = vrcp.f32 %v909_v3  ;;  %3571 = vmatpush3.msra.mxu1 %v922_v4 }
 0x54a   : > { %3572 = vmatprep.subr.mxu1 %v3956_v2 }
 0x54b   : > { %3573 = vmatpush3.msra.mxu1 %v920_v62 }
 0x54c   : > { %3583 = vmatprep.subr.mxu1 %v3956_v2  ;;  %v1018_v15 = vpop.permute.xlu1 %1017 }
 0x550   : > { %v1022_v19 = vpop.permute.xlu1 %1021 }
 0x552   : > { %v3871_v5 = vpop.eup %3870 }
 0x553   : > { %v916_v6 = vmul.f32 %v3871_v5, %v3865_v49 }
 0x555   : > { %3575 = vmatmul.mubr.msk.f32.vlgmr.msra.gmra.mxu1 %vm885_vm5, %v916_v6 }
 0x556   : > { %v3873_v7 = vpop.eup %3872  ;;  %3584 = vmatpush3.xpose.msk.msra.mxu1 %vm792_vm3, %v1028_v63  ;;  %3577 = vmatprep.mubr.msk.f32.mxu1 %vm3957_vm0, %v3956_v2 }
 0x557   : > { %3585 = vmatprep.subr.mxu1 %v3956_v2  ;;  %v917_v8 = vmul.f32 %v3873_v7, %v3867_v51  ;;  %v1270_v7 = vld [vmem:[%s5404_s6 + $0x18] sm:$0xff] }
 0x559   : > { %3578 = vmatmul.mubr.msk.f32.gmra.mxu1 %vm885_vm5, %v917_v8  ;;  %v1269_v8 = vld [vmem:[%s5404_s6 + $0x10] sm:$0xff] }
 0x55a   : > { %3586 = vmatpush3.xpose.msk.msra.mxu1 %vm792_vm3, %v1026_v0  ;;  %3580 = vmatprep.mubr.msk.f32.mxu1 %vm3957_vm0, %v3956_v2 }
 0x55b   : > { %3587 = vmatprep.subr.mxu1 %v3956_v2 }
 0x579   : > { %v912_v9 = vpop.xlane.xlu0 %911 }
 0x57a   : > { %3874 = vrcp.f32 %v912_v9  ;;  %v1268_v9 = vld [vmem:[%s5404_s6 + $0x8] sm:$0xff] }
 0x57d   : > { %v1024_v11 = vpop.permute.xlu0 %1023 }
 0x57e   : > { %3588 = vmatpush3.xpose.msk.msra.mxu1 %vm792_vm3, %v1024_v11  ;;  %v1267_v11 = vld [vmem:[%s5404_s6] sm:$0xff] }
 0x57f   : > { %3613 = vmatprep.subr.mxu1 %v3956_v2 }
 0x581   : > { %v1020_v17 = vpop.permute.xlu0 %1019 }
 0x587   : > { %v3875_v12 = vpop.eup %3874 }
 0x588   : > { %v918_v14 = vmul.f32 %v3875_v12, %v3869_v60 }
 0x58a   : > { %3581 = vmatmul.mubr.msk.f32.gmra.mxu1 %vm885_vm5, %v918_v14 }
 0x58b   : > { %3589 = vmatprep.mubr.msk.f32.mxu1 %vm3957_vm0, %v3956_v2 }
 0x58e   : > { %3590 = vmatmul.mubr.msk.f32.vlgmr.msra.gmra.mxu1 %vm792_vm3, %v1018_v15 }
 0x58f   : > { %3592 = vmatprep.mubr.msk.f32.mxu1 %vm3957_vm0, %v3956_v2  ;;  %3614 = vmatpush3.msra.mxu1 %v1270_v7 }
 0x590   : > { %3615 = vmatprep.subr.mxu1 %v3956_v2 }
 0x591   : > { %3616 = vmatpush3.msra.mxu1 %v1269_v8 }
 0x592   : > { %3593 = vmatmul.mubr.msk.f32.gmra.mxu1 %vm792_vm3, %v1020_v17  ;;  %3617 = vmatprep.subr.mxu1 %v3956_v2 }
 0x593   : > { %3595 = vmatprep.mubr.msk.f32.mxu1 %vm3957_vm0, %v3956_v2  ;;  %3618 = vmatpush3.msra.mxu1 %v1268_v9 }
 0x594   : > { %3619 = vmatprep.subr.mxu1 %v3956_v2 }
 0x595   : > { %3620 = vmatpush3.msra.mxu1 %v1267_v11 }
 0x596   : > { %3596 = vmatmul.mubr.msk.f32.gmra.mxu1 %vm792_vm3, %v1022_v19  ;;  %3647 = vmatprep.subr.mxu1 %v3956_v2 }
 0x597   : > { %3621 = vmatprep.mubr.msk.f32.mxu1 %vm3957_vm0, %v3956_v2 }
 0x615   : > { %v4261_v22 = vpop.f32.mrf.mxu1 }
 0x617   : > { %v3576_v24 = vpop.f32.mrf.mxu1 }
 0x619   : > { %v4263_v25 = vpop.f32.mrf.mxu1 }
 0x61b   : > { %v3579_v26 = vpop.f32.mrf.mxu1 }
 0x64a   : > { %v4265_v27 = vpop.f32.mrf.mxu1 }
 0x64c   : > { %v3582_v28 = vpop.f32.mrf.mxu1 }
 0x64e   : > { %v1107_v30 = vpop.f32.mrf.mxu1 }
 0x64f   : > { %v1108_v31 = vadd.f32 %v1107_v30, %v4205_v29 }
 0x650   : > { %v3591_v32 = vpop.f32.mrf.mxu1 }
 0x651   : > { %v1121_v33 = vsel %vm885_vm5, %v1108_v31, -inf }
 0x652   : > { %1122 = vmax.xlane.f32.xlu0 %v1121_v33  ;;  %v1112_v34 = vpop.f32.mrf.mxu1 }
 0x653   : > { %v1113_v35 = vadd.f32 %v1112_v34, %v4205_v29 }
 0x654   : > { %v3594_v36 = vpop.f32.mrf.mxu1 }
 0x655   : > { %v1124_v37 = vsel %vm885_vm5, %v1113_v35, -inf }
 0x656   : > { %1125 = vmax.xlane.f32.xlu1 %v1124_v37  ;;  %v1117_v38 = vpop.f32.mrf.mxu1 }
 0x657   : > { %v1118_v39 = vadd.f32 %v1117_v38, %v4205_v29 }
 0x658   : > { %v3597_v40 = vpop.f32.mrf.mxu1 }
 0x659   : > { %v1127_v41 = vsel %vm885_vm5, %v1118_v39, -inf }
 0x65a   : > { %1128 = vmax.xlane.f32.xlu0 %v1127_v41 }
 0x667   : > { %1156 = vrot.lane.b32.xlu1 %v4175_v16, %s3963_s17 }
 0x6db   : > { %v1123_v42 = vpop.xlane.xlu0 %1122 }
 0x6dc   : > { %v1130_v43 = vsub.f32 %v1108_v31, %v1123_v42 }
 0x6de   : > { %v1133_v44 = vmul.f32 1.442695, %v1130_v43 }
 0x6df   : > { %v1126_v45 = vpop.xlane.xlu1 %1125 }
 0x6e0   : > { %3876 = vpow2.f32 %v1133_v44  ;;  %v1131_v46 = vsub.f32 %v1113_v35, %v1126_v45 }
 0x6e2   : > { %v1135_v47 = vmul.f32 1.442695, %v1131_v46 }
 0x6e3   : > { %v1129_v48 = vpop.xlane.xlu0 %1128  ;;  %v1157_v61 = vpop.permute.xlu1 %1156 }
 0x6e4   : > { %3878 = vpow2.f32 %v1135_v47  ;;  %v1132_v49 = vsub.f32 %v1118_v39, %v1129_v48 }
 0x6e6   : > { %v1137_v50 = vmul.f32 1.442695, %v1132_v49 }
 0x6e8   : > { %3880 = vpow2.f32 %v1137_v50 }
 0x6ed   : > { %v3877_v51 = vpop.eup %3876 }
 0x6ee   : > { %v1139_v52 = vsel %vm885_vm5, %v3877_v51, 0.0 }
 0x6ef   : > { %1140 = vadd.xlane.f32.xlu0 %v1139_v52 }
 0x6f1   : > { %v3879_v53 = vpop.eup %3878 }
 0x6f2   : > { %v1142_v55 = vsel %vm885_vm5, %v3879_v53, 0.0 }
 0x6f3   : > { %1143 = vadd.xlane.f32.xlu0 %v1142_v55 }
 0x6f5   : > { %v3881_v16 = vpop.eup %3880 }
 0x6f6   : > { %v1145_v59 = vsel %vm885_vm5, %v3881_v16, 0.0 }
 0x6f7   : > { %1146 = vadd.xlane.f32.xlu1 %v1145_v59 }
 0x708   : > { %1154 = vrot.lane.b32.xlu1 %v4179_v20, %s3963_s17 }
 0x709   : > { %1158 = vrot.lane.b32.xlu0 %v4181_v21, %s3963_s17 }
 0x778   : > { %v1141_v60 = vpop.xlane.xlu0 %1140 }
 0x779   : > { %3882 = vrcp.f32 %v1141_v60 }
 0x77c   : > { %v1144_v62 = vpop.xlane.xlu0 %1143 }
 0x77d   : > { %3884 = vrcp.f32 %v1144_v62 }
 0x780   : > { %v1147_v63 = vpop.xlane.xlu1 %1146  ;;  %v1159_v0 = vpop.permute.xlu0 %1158 }
 0x781   : > { %3886 = vrcp.f32 %v1147_v63  ;;  %3599 = vmatpush3.msra.mxu0 %v1159_v0  ;;  %v1426_v63 = vld [vmem:[%s5405_s7 + $0x18] sm:$0xff]  ;;  %v1425_v0 = vld [vmem:[%s5405_s7 + $0x10] sm:$0xff] }
 0x782   : > { %3600 = vmatprep.subr.mxu0 %v3956_v2 }
 0x783   : > { %3601 = vmatpush3.msra.mxu0 %v1157_v61 }
 0x784   : > { %v1155_v1 = vpop.permute.xlu1 %1154  ;;  %3602 = vmatprep.subr.mxu0 %v3956_v2 }
 0x785   : > { %3603 = vmatpush3.msra.mxu0 %v1155_v1  ;;  %v1424_v1 = vld [vmem:[%s5405_s7 + $0x8] sm:$0xff] }
 0x786   : > { %v3883_v20 = vpop.eup %3882  ;;  %3630 = vmatprep.subr.mxu0 %v3956_v2 }
 0x787   : > { %v1151_v21 = vmul.f32 %v3883_v20, %v3877_v51  ;;  %v1423_v20 = vld [vmem:[%s5405_s7] sm:$0xff] }
 0x789   : > { %3605 = vmatmul.mubr.msk.f32.vlgmr.msra.gmra.mxu0 %vm885_vm5, %v1151_v21 }
 0x78a   : > { %v3885_v3 = vpop.eup %3884  ;;  %3607 = vmatprep.mubr.msk.f32.mxu0 %vm3957_vm0, %v3956_v2  ;;  %3631 = vmatpush3.msra.mxu0 %v1426_v63 }
 0x78b   : > { %v1152_v4 = vmul.f32 %v3885_v3, %v3879_v53  ;;  %3632 = vmatprep.subr.mxu0 %v3956_v2 }
 0x78c   : > { %3633 = vmatpush3.msra.mxu0 %v1425_v0 }
 0x78d   : > { %3608 = vmatmul.mubr.msk.f32.gmra.mxu0 %vm885_vm5, %v1152_v4  ;;  %3634 = vmatprep.subr.mxu0 %v3956_v2 }
 0x78e   : > { %v3887_v5 = vpop.eup %3886  ;;  %3610 = vmatprep.mubr.msk.f32.mxu0 %vm3957_vm0, %v3956_v2  ;;  %3635 = vmatpush3.msra.mxu0 %v1424_v1 }
 0x78f   : > { %v1153_v6 = vmul.f32 %v3887_v5, %v3881_v16  ;;  %3636 = vmatprep.subr.mxu0 %v3956_v2 }
 0x790   : > { %3637 = vmatpush3.msra.mxu0 %v1423_v20 }
 0x791   : > { %3611 = vmatmul.mubr.msk.f32.gmra.mxu0 %vm885_vm5, %v1153_v6  ;;  %3688 = vmatprep.subr.mxu0 %v3956_v2 }
 0x792   : > { %3638 = vmatprep.mubr.msk.f32.mxu0 %vm3957_vm0, %v3956_v2 }
 0x849   : > { %v1238_v12 = vpop.f32.mrf.mxu0 }
 0x84a   : > { %1255 = vrot.lane.b32.xlu1 %v1238_v12, %s3964_s27  ;;  %v4370_v12 = vsub.s32 2, %v4142_v54 }
 0x84b   : > { %v3606_v14 = vpop.f32.mrf.mxu0 }
 0x84c   : > { %5420 = vst [vmem:[#allocation5_spill] sm:$0xff] %v4370_v12  ;;  %v4373_v14 = vsub.s32 3, %v4142_v54 }
 0x84d   : > { %v1243_v15 = vpop.f32.mrf.mxu0 }
 0x84e   : > { %1257 = vrot.lane.b32.xlu0 %v1243_v15, %s3964_s27  ;;  %5421 = vst [vmem:[#allocation6_spill] sm:$0xff] %v4373_v14  ;;  %v1412_v15 = vrot.slane %v4150_v57, %v4370_v12 }
 0x84f   : > { %v3609_v17 = vpop.f32.mrf.mxu0 }
 0x851   : > { %v1248_v19 = vpop.f32.mrf.mxu0 }
 0x852   : > { %1259 = vrot.lane.b32.xlu1 %v1248_v19, %s3964_s27 }
 0x853   : > { %v3612_v24 = vpop.f32.mrf.mxu0 }
 0x854   : > { %v1419_v24 = vrot.slane %v4150_v57, %v4373_v14 }
 0x8bc   : > { %v1256_v26 = vpop.permute.xlu1 %1255 }
 0x8bd   : > { %v1264_v28 = vsel %vm792_vm3, %v4261_v22, %v1256_v26  ;;  %v1365_v22 = vsub.s32 4, %v4142_v54 }
 0x8be   : > { %3622 = vmatmul.mubr.msk.f32.vlgmr.msra.gmra.mxu1 %vm631_vm2, %v1264_v28 }
 0x8bf   : > { %3624 = vmatprep.mubr.msk.f32.mxu1 %vm3957_vm0, %v3956_v2 }
 0x8c0   : > { %v1258_v30 = vpop.permute.xlu0 %1257 }
 0x8c1   : > { %v1265_v31 = vsel %vm792_vm3, %v4263_v25, %v1258_v30  ;;  %v1366_v25 = vrot.slane %v4150_v57, %v1365_v22 }
 0x8c2   : > { %3625 = vmatmul.mubr.msk.f32.gmra.mxu1 %vm631_vm2, %v1265_v31 }
 0x8c3   : > { %3627 = vmatprep.mubr.msk.f32.mxu1 %vm3957_vm0, %v3956_v2 }
 0x8c4   : > { %v1260_v32 = vpop.permute.xlu1 %1259 }
 0x8c5   : > { %v1266_v33 = vsel %vm792_vm3, %v4265_v27, %v1260_v32 }
 0x8c6   : > { %3628 = vmatmul.mubr.msk.f32.gmra.mxu1 %vm631_vm2, %v1266_v33 }
 0x8c7   : > { %3679 = vmatprep.mubr.msk.f32.mxu1 %vm3957_vm0, %v3956_v2 }
 0x97e   : > { %v1346_v34 = vpop.f32.mrf.mxu1 }
 0x97f   : > { %v1360_v35 = vadd.f32 %v1346_v34, %v4102_v13 }
 0x980   : > { %v3623_v36 = vpop.f32.mrf.mxu1 }
 0x981   : > { %v4333_v37 = vadd.f32 %v1366_v25, %v1360_v35 }
 0x982   : > { %v1351_v38 = vpop.f32.mrf.mxu1 }
 0x983   : > { %v1361_v27 = vadd.f32 %v1351_v38, %v4109_v18  ;;  %v1370_v39 = vsel %vm631_vm2, %v4333_v37, 0.0  ;;  %v1562_v38 = vld [vmem:[%s5406_s8 + $0x78] sm:$0xff] }
 0x984   : > { %1371 = vadd.xlane.f32.xlu0 %v1370_v39  ;;  %v3626_v40 = vpop.f32.mrf.mxu1  ;;  %3648 = vmatpush3.msra.mxu1 %v1562_v38  ;;  %v1560_v39 = vld [vmem:[%s5406_s8 + $0x68] sm:$0xff] }
 0x985   : > { %v4338_v41 = vadd.f32 %v1366_v25, %v1361_v27  ;;  %3649 = vmatprep.subr.mxu1 %v3956_v2  ;;  %v1561_v27 = vld [vmem:[%s5406_s8 + $0x70] sm:$0xff]  ;;  %v1559_v40 = vld [vmem:[%s5406_s8 + $0x60] sm:$0xff] }
 0x986   : > { %v1356_v42 = vpop.f32.mrf.mxu1  ;;  %3650 = vmatpush3.msra.mxu1 %v1561_v27  ;;  %v1648_v27 = vsub.s32 5, %v4142_v54 }
 0x987   : > { %v1362_v43 = vadd.f32 %v1356_v42, %v4116_v23  ;;  %v1373_v44 = vsel %vm631_vm2, %v4338_v41, 0.0  ;;  %3651 = vmatprep.subr.mxu1 %v3956_v2  ;;  %v1558_v42 = vld [vmem:[%s5406_s8 + $0x58] sm:$0xff] }
 0x988   : > { %1374 = vadd.xlane.f32.xlu1 %v1373_v44  ;;  %v3629_v13 = vpop.f32.mrf.mxu1  ;;  %3652 = vmatpush3.msra.mxu1 %v1560_v39  ;;  %v1556_v44 = vld [vmem:[%s5406_s8 + $0x48] sm:$0xff]  ;;  %v1649_v39 = vrot.slane %v4150_v57, %v1648_v27 }
 0x989   : > { %v4343_v45 = vadd.f32 %v1366_v25, %v1362_v43  ;;  %3653 = vmatprep.subr.mxu1 %v3956_v2  ;;  %v1557_v43 = vld [vmem:[%s5406_s8 + $0x50] sm:$0xff]  ;;  %v1555_v13 = vld [vmem:[%s5406_s8 + $0x40] sm:$0xff] }
 0x98a   : > { %3654 = vmatpush3.msra.mxu1 %v1559_v40 }
 0x98b   : > { %v1376_v18 = vsel %vm631_vm2, %v4343_v45, 0.0  ;;  %3655 = vmatprep.subr.mxu1 %v3956_v2 }
 0x98c   : > { %1377 = vadd.xlane.f32.xlu0 %v1376_v18  ;;  %3656 = vmatpush3.msra.mxu1 %v1558_v42  ;;  %v1554_v18 = vld [vmem:[%s5406_s8 + $0x38] sm:$0xff] }
 0x98d   : > { %3657 = vmatprep.subr.mxu1 %v3956_v2 }
 0x98e   : > { %3658 = vmatpush3.msra.mxu1 %v1557_v43 }
 0x98f   : > { %3659 = vmatprep.subr.mxu1 %v3956_v2 }
 0x990   : > { %3660 = vmatpush3.msra.mxu1 %v1556_v44 }
 0x991   : > { %3661 = vmatprep.subr.mxu1 %v3956_v2 }
 0x992   : > { %3662 = vmatpush3.msra.mxu1 %v1555_v13 }
 0x993   : > { %3663 = vmatprep.subr.mxu1 %v3956_v2 }
 0x994   : > { %3664 = vmatpush3.msra.mxu1 %v1554_v18 }
 0x995   : > { %3665 = vmatprep.subr.mxu1 %v3956_v2 }
 0xa0d   : > { %v1372_v46 = vpop.xlane.xlu0 %1371 }
 0xa0e   : > { %v1379_v47 = vmul.f32 0.03125, %v1372_v46  ;;  %v1553_v46 = vld [vmem:[%s5406_s8 + $0x30] sm:$0xff] }
 0xa0f   : > { %3666 = vmatpush3.msra.mxu1 %v1553_v46 }
 0xa10   : > { %v1382_v48 = vsub.f32 %v4333_v37, %v1379_v47  ;;  %3667 = vmatprep.subr.mxu1 %v3956_v2  ;;  %v1552_v47 = vld [vmem:[%s5406_s8 + $0x28] sm:$0xff] }
 0xa11   : > { %v1375_v49 = vpop.xlane.xlu1 %1374  ;;  %3668 = vmatpush3.msra.mxu1 %v1552_v47 }
 0xa12   : > { %v1380_v50 = vmul.f32 0.03125, %v1375_v49  ;;  %v1385_v51 = vmul.f32 %v1382_v48, %v1382_v48  ;;  %3669 = vmatprep.subr.mxu1 %v3956_v2  ;;  %v1550_v49 = vld [vmem:[%s5406_s8 + $0x18] sm:$0xff] }
 0xa14   : > { %v1383_v23 = vsub.f32 %v4338_v41, %v1380_v50  ;;  %v1388_v52 = vsel %vm631_vm2, %v1385_v51, 0.0  ;;  %v1549_v50 = vld [vmem:[%s5406_s8 + $0x10] sm:$0xff]  ;;  %v1548_v51 = vld [vmem:[%s5406_s8 + $0x8] sm:$0xff] }
 0xa15   : > { %1389 = vadd.xlane.f32.xlu0 %v1388_v52  ;;  %v1378_v53 = vpop.xlane.xlu0 %1377  ;;  %v1430_v52 = vrot.slane %v4171_v10, %v4153_v58 }
 0xa16   : > { %v1381_v55 = vmul.f32 0.03125, %v1378_v53  ;;  %v1386_v16 = vmul.f32 %v1383_v23, %v1383_v23 }
 0xa18   : > { %v1384_v59 = vsub.f32 %v4343_v45, %v1381_v55  ;;  %v1391_v60 = vsel %vm631_vm2, %v1386_v16, 0.0 }
 0xa19   : > { %1392 = vadd.xlane.f32.xlu0 %v1391_v60 }
 0xa1a   : > { %v1387_v61 = vmul.f32 %v1384_v59, %v1384_v59 }
 0xa1c   : > { %v1394_v62 = vsel %vm631_vm2, %v1387_v61, 0.0 }
 0xa1d   : > { %1395 = vadd.xlane.f32.xlu1 %v1394_v62 }
 0xa9e   : > { %v1390_v21 = vpop.xlane.xlu0 %1389 }
 0xa9f   : > { %v1397_v3 = vmul.f32 0.03125, %v1390_v21 }
 0xaa1   : > { %v1400_v4 = vadd.f32 1e-06, %v1397_v3 }
 0xaa2   : > { %v1393_v5 = vpop.xlane.xlu0 %1392 }
 0xaa3   : > { %3888 = vrsqrt.f32 %v1400_v4  ;;  %v1398_v6 = vmul.f32 0.03125, %v1393_v5 }
 0xaa5   : > { %v1401_v7 = vadd.f32 1e-06, %v1398_v6 }
 0xaa6   : > { %v1396_v8 = vpop.xlane.xlu1 %1395 }
 0xaa7   : > { %3890 = vrsqrt.f32 %v1401_v7  ;;  %v1399_v9 = vmul.f32 0.03125, %v1396_v8 }
 0xaa9   : > { %v1402_v11 = vadd.f32 1e-06, %v1399_v9 }
 0xaab   : > { %3892 = vrsqrt.f32 %v1402_v11 }
 0xab0   : > { %v3889_v17 = vpop.eup %3888 }
 0xab1   : > { %v1406_v19 = vmul.f32 %v3889_v17, %v1382_v48  ;;  %v1551_v48 = vld [vmem:[%s5406_s8 + $0x20] sm:$0xff] }
 0xab2   : > { %3670 = vmatpush3.msra.mxu1 %v1551_v48 }
 0xab3   : > { %v1413_v26 = vmul.f32 %v1412_v15, %v1406_v19  ;;  %3671 = vmatprep.subr.mxu1 %v3956_v2 }
 0xab4   : > { %v3891_v28 = vpop.eup %3890  ;;  %3672 = vmatpush3.msra.mxu1 %v1550_v49 }
 0xab5   : > { %v1420_v30 = vadd.f32 %v1419_v24, %v1413_v26  ;;  %v1407_v31 = vmul.f32 %v3891_v28, %v1383_v23  ;;  %3673 = vmatprep.subr.mxu1 %v3956_v2  ;;  %v1547_v23 = vld [vmem:[%s5406_s8] sm:$0xff] }
 0xab6   : > { %3674 = vmatpush3.msra.mxu1 %v1549_v50 }
 0xab7   : > { %3639 = vmatmul.mubr.msk.f32.vlgmr.msra.gmra.mxu0 %vm631_vm2, %v1420_v30  ;;  %v1414_v32 = vmul.f32 %v1412_v15, %v1407_v31  ;;  %3675 = vmatprep.subr.mxu1 %v3956_v2 }
 0xab8   : > { %v3893_v33 = vpop.eup %3892  ;;  %3641 = vmatprep.mubr.msk.f32.mxu0 %vm3957_vm0, %v3956_v2  ;;  %3676 = vmatpush3.msra.mxu1 %v1548_v51 }
 0xab9   : > { %v1421_v25 = vadd.f32 %v1419_v24, %v1414_v32  ;;  %v1408_v34 = vmul.f32 %v3893_v33, %v1384_v59  ;;  %3677 = vmatprep.subr.mxu1 %v3956_v2 }
 0xaba   : > { %3678 = vmatpush3.msra.mxu1 %v1547_v23 }
 0xabb   : > { %3642 = vmatmul.mubr.msk.f32.gmra.mxu0 %vm631_vm2, %v1421_v25  ;;  %v1415_v35 = vmul.f32 %v1412_v15, %v1408_v34  ;;  %3735 = vmatprep.subr.mxu1 %v3956_v2 }
 0xabc   : > { %3644 = vmatprep.mubr.msk.f32.mxu0 %vm3957_vm0, %v3956_v2 }
 0xabd   : > { %v1422_v36 = vadd.f32 %v1419_v24, %v1415_v35 }
 0xabf   : > { %3645 = vmatmul.mubr.msk.f32.gmra.mxu0 %vm631_vm2, %v1422_v36 }
 0xac0   : > { %3696 = vmatprep.mubr.msk.f32.mxu0 %vm3957_vm0, %v3956_v2 }
 0xb77   : > { %v1506_v53 = vpop.f32.mrf.mxu0 }
 0xb78   : > { %v1507_v55 = vadd.f32 %v1506_v53, %v1430_v52 }
 0xb79   : > { %v3640_v16 = vpop.f32.mrf.mxu0 }
 0xb7a   : > { %v1520_v59 = vmul.f32 %v1507_v55, %v1507_v55 }
 0xb7b   : > { %v1511_v60 = vpop.f32.mrf.mxu0 }
 0xb7c   : > { %v1523_v61 = vmul.f32 %v1520_v59, %v1507_v55  ;;  %v1512_v62 = vadd.f32 %v1511_v60, %v1430_v52 }
 0xb7d   : > { %v3643_v63 = vpop.f32.mrf.mxu0 }
 0xb7e   : > { %v1526_v0 = vmul.f32 0.044715, %v1523_v61  ;;  %v1521_v1 = vmul.f32 %v1512_v62, %v1512_v62 }
 0xb7f   : > { %v1516_v20 = vpop.f32.mrf.mxu0 }
 0xb80   : > { %v1529_v21 = vadd.f32 %v1526_v0, %v1507_v55  ;;  %v1524_v3 = vmul.f32 %v1521_v1, %v1512_v62  ;;  %v1517_v4 = vadd.f32 %v1516_v20, %v1430_v52 }
 0xb81   : > { %v3646_v5 = vpop.f32.mrf.mxu0 }
 0xb82   : > { %v1532_v6 = vmul.f32 0.7978846, %v1529_v21  ;;  %v1527_v7 = vmul.f32 0.044715, %v1524_v3  ;;  %v1522_v8 = vmul.f32 %v1517_v4, %v1517_v4  ;;  %v3288_v3 = vld [vmem:[%s5402_s4 + $0x38] sm:$0xff]  ;;  %v3286_v5 = vld [vmem:[%s5402_s4 + $0x28] sm:$0xff] }
 0xb83   : > { %3689 = vmatpush3.msra.mxu0 %v3288_v3 }
 0xb84   : > { %3894 = vtanh.f32 %v1532_v6  ;;  %v1530_v10 = vadd.f32 %v1527_v7, %v1512_v62  ;;  %v1525_v9 = vmul.f32 %v1522_v8, %v1517_v4  ;;  %3690 = vmatprep.subr.mxu0 %v3956_v2  ;;  %v3285_v6 = vld [vmem:[%s5402_s4 + $0x20] sm:$0xff] }
 0xb86   : > { %v1533_v11 = vmul.f32 0.7978846, %v1530_v10  ;;  %v1528_v15 = vmul.f32 0.044715, %v1525_v9 }
 0xb88   : > { %3896 = vtanh.f32 %v1533_v11  ;;  %v1531_v17 = vadd.f32 %v1528_v15, %v1517_v4 }
 0xb8a   : > { %v1534_v19 = vmul.f32 0.7978846, %v1531_v17 }
 0xb8c   : > { %3898 = vtanh.f32 %v1534_v19 }
 0xb91   : > { %v3895_v24 = vpop.eup %3894 }
 0xb92   : > { %v1538_v26 = vadd.f32 1.0, %v3895_v24 }
 0xb94   : > { %v1541_v28 = vmul.f32 0.5, %v1538_v26  ;;  %v4504_v26 = vld [vmem:[%s5401_s3 + $0x8] sm:$0xff] }
 0xb95   : > { %v3897_v30 = vpop.eup %3896 }
 0xb96   : > { %v1544_v31 = vmul.f32 %v1541_v28, %v1507_v55  ;;  %v1539_v32 = vadd.f32 1.0, %v3897_v30  ;;  %v1699_v28 = vrot.slane %v4504_v26, %v4145_v56 }
 0xb98   : > { %3680 = vmatmul.mubr.f32.vlgmr.msra.gmra.mxu1 %v1544_v31  ;;  %v1542_v33 = vmul.f32 0.5, %v1539_v32  ;;  %v1706_v32 = vrot.slane %v4504_v26, %v4153_v58 }
 0xb99   : > { %v3899_v25 = vpop.eup %3898  ;;  %3682 = vmatprep.mubr.msk.f32.mxu1 %vm3957_vm0, %v3956_v2 }
 0xb9a   : > { %v1545_v34 = vmul.f32 %v1542_v33, %v1512_v62  ;;  %v1540_v35 = vadd.f32 1.0, %v3899_v25 }
 0xb9c   : > { %3683 = vmatmul.mubr.f32.gmra.mxu1 %v1545_v34  ;;  %v1543_v36 = vmul.f32 0.5, %v1540_v35 }
 0xb9d   : > { %3685 = vmatprep.mubr.msk.f32.mxu1 %vm3957_vm0, %v3956_v2 }
 0xb9e   : > { %v1546_v38 = vmul.f32 %v1543_v36, %v1517_v4  ;;  %v3287_v4 = vld [vmem:[%s5402_s4 + $0x30] sm:$0xff] }
 0xb9f   : > { %3691 = vmatpush3.msra.mxu0 %v3287_v4 }
 0xba0   : > { %3686 = vmatmul.mubr.f32.gmra.mxu1 %v1546_v38  ;;  %3692 = vmatprep.subr.mxu0 %v3956_v2 }
 0xba1   : > { %3741 = vmatprep.mubr.msk.f32.mxu1 %vm3957_vm0, %v3956_v2  ;;  %3693 = vmatpush3.msra.mxu0 %v3286_v5 }
 0xba2   : > { %3694 = vmatprep.subr.mxu0 %v3956_v2 }
 0xba3   : > { %3695 = vmatpush3.msra.mxu0 %v3285_v6 }
 0xba4   : > { %3705 = vmatprep.subr.mxu0 %v3956_v2 }
 0xc58   : > { %v1629_v40 = vpop.f32.mrf.mxu1 }
 0xc59   : > { %v1643_v42 = vadd.f32 %v1629_v40, %v4333_v37 }
 0xc5a   : > { %v3681_v43 = vpop.f32.mrf.mxu1 }
 0xc5b   : > { %v4465_v44 = vadd.f32 %v1649_v39, %v1643_v42 }
 0xc5c   : > { %v1634_v13 = vpop.f32.mrf.mxu1 }
 0xc5d   : > { %v1644_v18 = vadd.f32 %v1634_v13, %v4338_v41  ;;  %v1657_v46 = vsel %vm631_vm2, %v4465_v44, 0.0  ;;  %v4522_v13 = vld [vmem:[%s5403_s5 + $0x2] sm:$0x3] }
 0xc5e   : > { %1658 = vadd.xlane.f32.xlu0 %v1657_v46  ;;  %v3684_v47 = vpop.f32.mrf.mxu1 }
 0xc5f   : > { %v4470_v48 = vadd.f32 %v1649_v39, %v1644_v18  ;;  %v1718_v47 = vrot.slane %v4522_v13, %v4145_v56 }
 0xc60   : > { %v1639_v49 = vpop.f32.mrf.mxu1 }
 0xc61   : > { %v1645_v50 = vadd.f32 %v1639_v49, %v4343_v45  ;;  %v1660_v57 = vsel %vm631_vm2, %v4470_v48, 0.0 }
 0xc62   : > { %1661 = vadd.xlane.f32.xlu1 %v1660_v57  ;;  %v3687_v37 = vpop.f32.mrf.mxu1 }
 0xc63   : > { %v4475_v51 = vadd.f32 %v1649_v39, %v1645_v50 }
 0xc65   : > { %v1663_v41 = vsel %vm631_vm2, %v4475_v51, 0.0 }
 0xc66   : > { %1664 = vadd.xlane.f32.xlu0 %v1663_v41 }
 0xce7   : > { %v1659_v23 = vpop.xlane.xlu0 %1658 }
 0xce8   : > { %v1666_v52 = vmul.f32 0.03125, %v1659_v23 }
 0xcea   : > { %v1669_v53 = vsub.f32 %v4465_v44, %v1666_v52 }
 0xceb   : > { %v1662_v55 = vpop.xlane.xlu1 %1661 }
 0xcec   : > { %v1667_v16 = vmul.f32 0.03125, %v1662_v55  ;;  %v1672_v59 = vmul.f32 %v1669_v53, %v1669_v53 }
 0xcee   : > { %v1670_v45 = vsub.f32 %v4470_v48, %v1667_v16  ;;  %v1675_v60 = vsel %vm631_vm2, %v1672_v59, 0.0 }
 0xcef   : > { %1676 = vadd.xlane.f32.xlu1 %v1675_v60  ;;  %v1665_v61 = vpop.xlane.xlu0 %1664 }
 0xcf0   : > { %v1668_v62 = vmul.f32 0.03125, %v1665_v61  ;;  %v1673_v63 = vmul.f32 %v1670_v45, %v1670_v45 }
 0xcf2   : > { %v1671_v0 = vsub.f32 %v4475_v51, %v1668_v62  ;;  %v1678_v1 = vsel %vm631_vm2, %v1673_v63, 0.0 }
 0xcf3   : > { %1679 = vadd.xlane.f32.xlu0 %v1678_v1 }
 0xcf4   : > { %v1674_v20 = vmul.f32 %v1671_v0, %v1671_v0 }
 0xcf6   : > { %v1681_v21 = vsel %vm631_vm2, %v1674_v20, 0.0 }
 0xcf7   : > { %1682 = vadd.xlane.f32.xlu1 %v1681_v21 }
 0xd78   : > { %v1677_v7 = vpop.xlane.xlu1 %1676 }
 0xd79   : > { %v1684_v8 = vmul.f32 0.03125, %v1677_v7 }
 0xd7b   : > { %v1687_v10 = vadd.f32 1e-06, %v1684_v8 }
 0xd7c   : > { %v1680_v9 = vpop.xlane.xlu0 %1679 }
 0xd7d   : > { %3900 = vrsqrt.f32 %v1687_v10  ;;  %v1685_v11 = vmul.f32 0.03125, %v1680_v9 }
 0xd7f   : > { %v1688_v15 = vadd.f32 1e-06, %v1685_v11 }
 0xd80   : > { %v1683_v17 = vpop.xlane.xlu1 %1682 }
 0xd81   : > { %3902 = vrsqrt.f32 %v1688_v15  ;;  %v1686_v19 = vmul.f32 0.03125, %v1683_v17 }
 0xd83   : > { %v1689_v24 = vadd.f32 1e-06, %v1686_v19 }
 0xd85   : > { %3904 = vrsqrt.f32 %v1689_v24 }
 0xd8a   : > { %v3901_v30 = vpop.eup %3900 }
 0xd8b   : > { %v1693_v31 = vmul.f32 %v3901_v30, %v1669_v53 }
 0xd8d   : > { %v1700_v33 = vmul.f32 %v1699_v28, %v1693_v31 }
 0xd8e   : > { %v3903_v25 = vpop.eup %3902 }
 0xd8f   : > { %v1707_v34 = vadd.f32 %v1706_v32, %v1700_v33  ;;  %v1694_v35 = vmul.f32 %v3903_v25, %v1670_v45 }
 0xd91   : > { %3697 = vmatmul.mubr.msk.f32.vlgmr.msra.gmra.mxu0 %vm631_vm2, %v1707_v34  ;;  %v1701_v36 = vmul.f32 %v1699_v28, %v1694_v35 }
 0xd92   : > { %v3905_v38 = vpop.eup %3904  ;;  %3699 = vmatprep.mubr.msk.f32.mxu0 %vm3957_vm0, %v3956_v2 }
 0xd93   : > { %v1708_v39 = vadd.f32 %v1706_v32, %v1701_v36  ;;  %v1695_v40 = vmul.f32 %v3905_v38, %v1671_v0 }
 0xd95   : > { %3700 = vmatmul.mubr.msk.f32.gmra.mxu0 %vm631_vm2, %v1708_v39  ;;  %v1702_v42 = vmul.f32 %v1699_v28, %v1695_v40 }
 0xd96   : > { %3702 = vmatprep.mubr.msk.f32.mxu0 %vm3957_vm0, %v3956_v2 }
 0xd97   : > { %v1709_v43 = vadd.f32 %v1706_v32, %v1702_v42 }
 0xd99   : > { %3703 = vmatmul.mubr.msk.f32.gmra.mxu0 %vm631_vm2, %v1709_v43 }
 0xd9a   : > { %3711 = vmatprep.mubr.msk.f32.mxu0 %vm3957_vm0, %v3956_v2 }
 0xe51   : > { %v1794_v18 = vpop.f32.mrf.mxu0 }
 0xe52   : > { %v4530_v41 = vadd.f32 %v1794_v18, %v1718_v47 }
 0xe53   : > { %v3698_v46 = vpop.f32.mrf.mxu0 }
 0xe55   : > { %v1799_v49 = vpop.f32.mrf.mxu0 }
 0xe56   : > { %v4526_v50 = vadd.f32 %v1799_v49, %v1718_v47 }
 0xe57   : > { %v3701_v57 = vpop.f32.mrf.mxu0 }
 0xe58   : > { %1813 = vrot.lane.b32.xlu1 %v4526_v50, %s3958_s28 }
 0xe59   : > { %v1804_v37 = vpop.f32.mrf.mxu0 }
 0xe5a   : > { %v4532_v23 = vadd.f32 %v1804_v37, %v1718_v47 }
 0xe5b   : > { %v3704_v52 = vpop.f32.mrf.mxu0 }
 0xe5c   : > { %1811 = vrot.lane.b32.xlu1 %v4530_v41, %s3958_s28  ;;  %1815 = vrot.lane.b32.xlu0 %v4532_v23, %s3958_s28 }
 0xe60   : > { %2050 = vrot.lane.b32.xlu1 %v4532_v23, %s3961_s30  ;;  %2048 = vrot.lane.b32.xlu0 %v4526_v50, %s3961_s30 }
 0xe64   : > { %2046 = vrot.lane.b32.xlu1 %v4530_v41, %s3961_s30  ;;  %2040 = vrot.lane.b32.xlu0 %v4530_v41, %s3962_s16 }
 0xe68   : > { %2042 = vrot.lane.b32.xlu1 %v4526_v50, %s3962_s16  ;;  %2044 = vrot.lane.b32.xlu0 %v4532_v23, %s3962_s16 }
 0xeca   : > { %v1814_v53 = vpop.permute.xlu1 %1813 }
 0xece   : > { %v1812_v55 = vpop.permute.xlu1 %1811  ;;  %v1816_v16 = vpop.permute.xlu0 %1815 }
 0xecf   : > { %3706 = vmatpush3.xpose.msk.msra.mxu0 %vm792_vm3, %v1816_v16 }
 0xed0   : > { %3707 = vmatprep.subr.mxu0 %v3956_v2 }
 0xed2   : > { %v2051_v59 = vpop.permute.xlu1 %2050  ;;  %v2049_v45 = vpop.permute.xlu0 %2048 }
 0xed3   : > { %3708 = vmatpush3.xpose.msk.msra.mxu0 %vm792_vm3, %v1814_v53  ;;  %3736 = vmatpush3.xpose.msk.msra.mxu1 %vm792_vm3, %v2051_v59 }
 0xed4   : > { %3737 = vmatprep.subr.mxu1 %v3956_v2  ;;  %3709 = vmatprep.subr.mxu0 %v3956_v2 }
 0xed6   : > { %v2047_v60 = vpop.permute.xlu1 %2046  ;;  %v2041_v61 = vpop.permute.xlu0 %2040 }
 0xed7   : > { %3710 = vmatpush3.xpose.msk.msra.mxu0 %vm792_vm3, %v1812_v55  ;;  %3738 = vmatpush3.xpose.msk.msra.mxu1 %vm792_vm3, %v2049_v45 }
 0xed8   : > { %3739 = vmatprep.subr.mxu1 %v3956_v2  ;;  %3720 = vmatprep.subr.mxu0 %v3956_v2 }
 0xeda   : > { %3712 = vmatmul.mubr.msk.f32.vlgmr.msra.gmra.mxu0 %vm792_vm3, %v4530_v41  ;;  %v2043_v62 = vpop.permute.xlu1 %2042  ;;  %v2045_v63 = vpop.permute.xlu0 %2044 }
 0xedb   : > { %3740 = vmatpush3.xpose.msk.msra.mxu1 %vm792_vm3, %v2047_v60  ;;  %3714 = vmatprep.mubr.msk.f32.mxu0 %vm3957_vm0, %v3956_v2 }
 0xedc   : > { %3765 = vmatprep.subr.mxu1 %v3956_v2 }
 0xede   : > { %3715 = vmatmul.mubr.msk.f32.gmra.mxu0 %vm792_vm3, %v4526_v50  ;;  %3742 = vmatmul.mubr.msk.f32.vlgmr.msra.gmra.mxu1 %vm792_vm3, %v2041_v61 }
 0xedf   : > { %3717 = vmatprep.mubr.msk.f32.mxu0 %vm3957_vm0, %v3956_v2  ;;  %3744 = vmatprep.mubr.msk.f32.mxu1 %vm3957_vm0, %v3956_v2 }
 0xee2   : > { %3718 = vmatmul.mubr.msk.f32.gmra.mxu0 %vm792_vm3, %v4532_v23  ;;  %3745 = vmatmul.mubr.msk.f32.gmra.mxu1 %vm792_vm3, %v2043_v62 }
 0xee3   : > { %3747 = vmatprep.mubr.msk.f32.mxu1 %vm3957_vm0, %v3956_v2  ;;  %3726 = vmatprep.mubr.msk.f32.mxu0 %vm3957_vm0, %v3956_v2 }
 0xee6   : > { %3748 = vmatmul.mubr.msk.f32.gmra.mxu1 %vm792_vm3, %v2045_v63 }
 0xee7   : > { %3773 = vmatprep.mubr.msk.f32.mxu1 %vm3957_vm0, %v3956_v2 }
 0xf9a   : > { %v1895_v0 = vpop.f32.mrf.mxu0 }
 0xf9b   : > { %v1896_v1 = vadd.f32 %v1895_v0, %v4205_v29 }
 0xf9c   : > { %v3713_v20 = vpop.f32.mrf.mxu0 }
 0xf9d   : > { %v1909_v21 = vsel %vm885_vm5, %v1896_v1, -inf }
 0xf9e   : > { %v2130_v3 = vpop.f32.mrf.mxu1  ;;  %1910 = vmax.xlane.f32.xlu1 %v1909_v21  ;;  %v1900_v4 = vpop.f32.mrf.mxu0 }
 0xf9f   : > { %v1901_v5 = vadd.f32 %v1900_v4, %v4205_v29  ;;  %v2131_v24 = vadd.f32 %v2130_v3, %v4205_v29 }
 0xfa0   : > { %v3716_v6 = vpop.f32.mrf.mxu0  ;;  %v3743_v7 = vpop.f32.mrf.mxu1 }
 0xfa1   : > { %v1912_v8 = vsel %vm885_vm5, %v1901_v5, -inf  ;;  %v2144_v25 = vsel %vm885_vm5, %v2131_v24, -inf }
 0xfa2   : > { %v2135_v10 = vpop.f32.mrf.mxu1  ;;  %1913 = vmax.xlane.f32.xlu0 %v1912_v8  ;;  %v1905_v9 = vpop.f32.mrf.mxu0 }
 0xfa3   : > { %v2136_v11 = vadd.f32 %v2135_v10, %v4205_v29  ;;  %v1906_v15 = vadd.f32 %v1905_v9, %v4205_v29 }
 0xfa4   : > { %v3719_v17 = vpop.f32.mrf.mxu0  ;;  %v3746_v19 = vpop.f32.mrf.mxu1 }
 0xfa5   : > { %v2147_v28 = vsel %vm885_vm5, %v2136_v11, -inf  ;;  %v1915_v30 = vsel %vm885_vm5, %v1906_v15, -inf }
 0xfa6   : > { %v2140_v31 = vpop.f32.mrf.mxu1  ;;  %2148 = vmax.xlane.f32.xlu1 %v2147_v28  ;;  %1916 = vmax.xlane.f32.xlu0 %v1915_v30 }
 0xfa7   : > { %v2141_v33 = vadd.f32 %v2140_v31, %v4205_v29 }
 0xfa8   : > { %v3749_v32 = vpop.f32.mrf.mxu1 }
 0xfa9   : > { %v2150_v34 = vsel %vm885_vm5, %v2141_v33, -inf }
 0xfaa   : > { %2145 = vmax.xlane.f32.xlu0 %v2144_v25 }
 0xfae   : > { %2151 = vmax.xlane.f32.xlu0 %v2150_v34 }
 0xfb7   : > { %1946 = vrot.lane.b32.xlu1 %v4532_v23, %s3960_s29 }
 0xfbb   : > { %1942 = vrot.lane.b32.xlu1 %v4530_v41, %s3960_s29 }
 0xfbf   : > { %2181 = vrot.lane.b32.xlu1 %v4532_v23, %s3963_s17 }
 0xfc4   : > { %1944 = vrot.lane.b32.xlu0 %v4526_v50, %s3960_s29 }
0x1027   : > { %v1911_v35 = vpop.xlane.xlu1 %1910 }
0x1028   : > { %v1918_v29 = vsub.f32 %v1896_v1, %v1911_v35 }
0x102a   : > { %v1921_v36 = vmul.f32 1.442695, %v1918_v29 }
0x102b   : > { %v1914_v38 = vpop.xlane.xlu0 %1913 }
0x102c   : > { %3906 = vpow2.f32 %v1921_v36  ;;  %v1919_v18 = vsub.f32 %v1901_v5, %v1914_v38  ;;  %v3313_v38 = vld [vmem:[%s5404_s6 + $0x38] sm:$0xff] }
0x102d   : > { %3766 = vmatpush3.msra.mxu1 %v3313_v38  ;;  %v3318_v38 = vld [vmem:[%s5405_s7 + $0x28] sm:$0xff] }
0x102e   : > { %v1923_v23 = vmul.f32 1.442695, %v1919_v18  ;;  %3767 = vmatprep.subr.mxu1 %v3956_v2  ;;  %v3310_v18 = vld [vmem:[%s5404_s6 + $0x20] sm:$0xff] }
0x102f   : > { %v2149_v39 = vpop.xlane.xlu1 %2148  ;;  %v1917_v40 = vpop.xlane.xlu0 %1916 }
0x1030   : > { %v2154_v42 = vsub.f32 %v2136_v11, %v2149_v39  ;;  %v1920_v43 = vsub.f32 %v1906_v15, %v1917_v40  ;;  %v3312_v39 = vld [vmem:[%s5404_s6 + $0x30] sm:$0xff]  ;;  %v3311_v40 = vld [vmem:[%s5404_s6 + $0x28] sm:$0xff] }
0x1031   : > { %3768 = vmatpush3.msra.mxu1 %v3312_v39  ;;  %v3317_v39 = vld [vmem:[%s5405_s7 + $0x20] sm:$0xff] }
0x1032   : > { %v2158_v46 = vmul.f32 1.442695, %v2154_v42  ;;  %v1925_v47 = vmul.f32 1.442695, %v1920_v43  ;;  %3769 = vmatprep.subr.mxu1 %v3956_v2 }
0x1033   : > { %v1947_v49 = vpop.permute.xlu1 %1946  ;;  %v2146_v57 = vpop.xlane.xlu0 %2145  ;;  %3770 = vmatpush3.msra.mxu1 %v3311_v40 }
0x1034   : > { %3908 = vpow2.f32 %v2158_v46  ;;  %v2153_v37 = vsub.f32 %v2131_v24, %v2146_v57  ;;  %3721 = vmatpush3.msra.mxu0 %v1947_v49  ;;  %3771 = vmatprep.subr.mxu1 %v3956_v2 }
0x1035   : > { %3722 = vmatprep.subr.mxu0 %v3956_v2  ;;  %3910 = vpow2.f32 %v1925_v47  ;;  %3772 = vmatpush3.msra.mxu1 %v3310_v18 }
0x1036   : > { %v2156_v52 = vmul.f32 1.442695, %v2153_v37  ;;  %3799 = vmatprep.subr.mxu1 %v3956_v2 }
0x1037   : > { %v2152_v53 = vpop.xlane.xlu0 %2151  ;;  %v1943_v61 = vpop.permute.xlu1 %1942 }
0x1038   : > { %3912 = vpow2.f32 %v2156_v52  ;;  %v2155_v55 = vsub.f32 %v2141_v33, %v2152_v53 }
0x1039   : > { %v3907_v16 = vpop.eup %3906  ;;  %3914 = vpow2.f32 %v1923_v23 }
0x103a   : > { %v2160_v59 = vmul.f32 1.442695, %v2155_v55  ;;  %v1927_v45 = vsel %vm885_vm5, %v3907_v16, 0.0 }
0x103b   : > { %1928 = vadd.xlane.f32.xlu1 %v1927_v45  ;;  %v1945_v60 = vpop.permute.xlu0 %1944  ;;  %v2182_v7 = vpop.permute.xlu1 %2181 }
0x103c   : > { %3723 = vmatpush3.msra.mxu0 %v1945_v60  ;;  %3916 = vpow2.f32 %v2160_v59 }
0x103d   : > { %3724 = vmatprep.subr.mxu0 %v3956_v2 }
0x103e   : > { %3725 = vmatpush3.msra.mxu0 %v1943_v61 }
0x103f   : > { %3750 = vmatprep.subr.mxu0 %v3956_v2 }
0x1041   : > { %v3909_v62 = vpop.eup %3908 }
0x1042   : > { %v2165_v63 = vsel %vm885_vm5, %v3909_v62, 0.0  ;;  %v3911_v0 = vpop.eup %3910 }
0x1043   : > { %2166 = vadd.xlane.f32.xlu1 %v2165_v63  ;;  %v1933_v20 = vsel %vm885_vm5, %v3911_v0, 0.0 }
0x1045   : > { %v3913_v1 = vpop.eup %3912 }
0x1046   : > { %v2162_v21 = vsel %vm885_vm5, %v3913_v1, 0.0  ;;  %v3915_v3 = vpop.eup %3914 }
0x1047   : > { %1934 = vadd.xlane.f32.xlu1 %v1933_v20  ;;  %2163 = vadd.xlane.f32.xlu0 %v2162_v21  ;;  %v1930_v4 = vsel %vm885_vm5, %v3915_v3, 0.0 }
0x1049   : > { %v3917_v5 = vpop.eup %3916 }
0x104a   : > { %v2168_v6 = vsel %vm885_vm5, %v3917_v5, 0.0 }
0x104b   : > { %1931 = vadd.xlane.f32.xlu0 %v1930_v4 }
0x104f   : > { %2169 = vadd.xlane.f32.xlu0 %v2168_v6 }
0x1058   : > { %2179 = vrot.lane.b32.xlu1 %v4526_v50, %s3963_s17 }
0x1065   : > { %2177 = vrot.lane.b32.xlu0 %v4530_v41, %s3963_s17 }
0x10c4   : > { %v1929_v8 = vpop.xlane.xlu1 %1928 }
0x10c5   : > { %3918 = vrcp.f32 %v1929_v8 }
0x10cc   : > { %v2167_v10 = vpop.xlane.xlu1 %2166 }
0x10d0   : > { %v2164_v9 = vpop.xlane.xlu0 %2163  ;;  %v1935_v11 = vpop.xlane.xlu1 %1934 }
0x10d2   : > { %v3919_v15 = vpop.eup %3918 }
0x10d3   : > { %v1939_v17 = vmul.f32 %v3919_v15, %v3907_v16 }
0x10d4   : > { %v1932_v19 = vpop.xlane.xlu0 %1931  ;;  %v2180_v50 = vpop.permute.xlu1 %2179 }
0x10d5   : > { %3920 = vrcp.f32 %v1932_v19  ;;  %3727 = vmatmul.mubr.msk.f32.vlgmr.msra.gmra.mxu0 %vm885_vm5, %v1939_v17 }
0x10d6   : > { %3751 = vmatpush3.msra.mxu0 %v2182_v7  ;;  %3729 = vmatprep.mubr.msk.f32.mxu0 %vm3957_vm0, %v3956_v2  ;;  %3922 = vrcp.f32 %v1935_v11 }
0x10d7   : > { %3752 = vmatprep.subr.mxu0 %v3956_v2  ;;  %3924 = vrcp.f32 %v2164_v9 }
0x10d8   : > { %3753 = vmatpush3.msra.mxu0 %v2180_v50  ;;  %v2170_v41 = vpop.xlane.xlu0 %2169  ;;  %3926 = vrcp.f32 %v2167_v10 }
0x10d9   : > { %3754 = vmatprep.subr.mxu0 %v3956_v2  ;;  %3928 = vrcp.f32 %v2170_v41 }
0x10dc   : > { %v2178_v24 = vpop.permute.xlu0 %2177 }
0x10dd   : > { %3755 = vmatpush3.msra.mxu0 %v2178_v24 }
0x10de   : > { %3782 = vmatprep.subr.mxu0 %v3956_v2 }
0x10e2   : > { %v3921_v28 = vpop.eup %3920 }
0x10e3   : > { %v1940_v30 = vmul.f32 %v3921_v28, %v3915_v3  ;;  %v3923_v31 = vpop.eup %3922 }
0x10e4   : > { %v1941_v32 = vmul.f32 %v3923_v31, %v3911_v0  ;;  %v3925_v33 = vpop.eup %3924  ;;  %v2390_v0 = vrot.slane %v4504_v26, %v1365_v22 }
0x10e5   : > { %3730 = vmatmul.mubr.msk.f32.gmra.mxu0 %vm885_vm5, %v1940_v30  ;;  %v2174_v25 = vmul.f32 %v3925_v33, %v3913_v1  ;;  %v3927_v34 = vpop.eup %3926 }
0x10e6   : > { %3732 = vmatprep.mubr.msk.f32.mxu0 %vm3957_vm0, %v3956_v2  ;;  %v2175_v35 = vmul.f32 %v3927_v34, %v3909_v62  ;;  %v3929_v29 = vpop.eup %3928 }
0x10e7   : > { %v2176_v36 = vmul.f32 %v3929_v29, %v3917_v5  ;;  %v3320_v29 = vld [vmem:[%s5405_s7 + $0x38] sm:$0xff] }
0x10e9   : > { %3733 = vmatmul.mubr.msk.f32.gmra.mxu0 %vm885_vm5, %v1941_v32 }
0x10ea   : > { %3756 = vmatprep.mubr.msk.f32.mxu0 %vm3957_vm0, %v3956_v2 }
0x10ed   : > { %3757 = vmatmul.mubr.msk.f32.vlgmr.msra.gmra.mxu0 %vm885_vm5, %v2174_v25 }
0x10ee   : > { %3759 = vmatprep.mubr.msk.f32.mxu0 %vm3957_vm0, %v3956_v2  ;;  %3783 = vmatpush3.msra.mxu0 %v3320_v29 }
0x10ef   : > { %3784 = vmatprep.subr.mxu0 %v3956_v2 }
0x10f1   : > { %3760 = vmatmul.mubr.msk.f32.gmra.mxu0 %vm885_vm5, %v2175_v35 }
0x10f2   : > { %3762 = vmatprep.mubr.msk.f32.mxu0 %vm3957_vm0, %v3956_v2 }
0x10f5   : > { %3763 = vmatmul.mubr.msk.f32.gmra.mxu0 %vm885_vm5, %v2176_v36  ;;  %v3319_v36 = vld [vmem:[%s5405_s7 + $0x30] sm:$0xff] }
0x10f6   : > { %3790 = vmatprep.mubr.msk.f32.mxu0 %vm3957_vm0, %v3956_v2  ;;  %3785 = vmatpush3.msra.mxu0 %v3319_v36 }
0x10f7   : > { %3786 = vmatprep.subr.mxu0 %v3956_v2 }
0x10f8   : > { %3787 = vmatpush3.msra.mxu0 %v3318_v38 }
0x10f9   : > { %3788 = vmatprep.subr.mxu0 %v3956_v2 }
0x10fa   : > { %3789 = vmatpush3.msra.mxu0 %v3317_v39 }
0x1195   : > { %v2026_v42 = vpop.f32.mrf.mxu0 }
0x1197   : > { %v3728_v43 = vpop.f32.mrf.mxu0 }
0x11a5   : > { %v2031_v46 = vpop.f32.mrf.mxu0 }
0x11a7   : > { %v3731_v47 = vpop.f32.mrf.mxu0 }
0x11a9   : > { %v2036_v49 = vpop.f32.mrf.mxu0 }
0x11ab   : > { %v3734_v57 = vpop.f32.mrf.mxu0 }
0x11ad   : > { %v2261_v37 = vpop.f32.mrf.mxu0 }
0x11ae   : > { %2278 = vrot.lane.b32.xlu1 %v2261_v37, %s3964_s27 }
0x11af   : > { %v3758_v23 = vpop.f32.mrf.mxu0 }
0x11b0   : > { %v2436_v23 = vrot.slane %v4504_v26, %v4370_v12 }
0x11b1   : > { %v2266_v52 = vpop.f32.mrf.mxu0 }
0x11b2   : > { %2280 = vrot.lane.b32.xlu0 %v2266_v52, %s3964_s27 }
0x11b3   : > { %v3761_v53 = vpop.f32.mrf.mxu0 }
0x11b5   : > { %v2271_v55 = vpop.f32.mrf.mxu0 }
0x11b6   : > { %2282 = vrot.lane.b32.xlu1 %v2271_v55, %s3964_s27  ;;  %v2443_v55 = vrot.slane %v4504_v26, %v4373_v14  ;;  %s3965_s27 = smov 32  }
0x11b7   : > { %v3764_v16 = vpop.f32.mrf.mxu0 }
0x1220   : > { %v2279_v59 = vpop.permute.xlu1 %2278 }
0x1221   : > { %v2287_v45 = vsel %vm792_vm3, %v2026_v42, %v2279_v59 }
0x1222   : > { %3774 = vmatmul.mubr.msk.f32.vlgmr.msra.gmra.mxu1 %vm631_vm2, %v2287_v45 }
0x1223   : > { %3776 = vmatprep.mubr.msk.f32.mxu1 %vm3957_vm0, %v3956_v2 }
0x1224   : > { %v2281_v60 = vpop.permute.xlu0 %2280 }
0x1225   : > { %v2288_v61 = vsel %vm792_vm3, %v2031_v46, %v2281_v60 }
0x1226   : > { %3777 = vmatmul.mubr.msk.f32.gmra.mxu1 %vm631_vm2, %v2288_v61 }
0x1227   : > { %3779 = vmatprep.mubr.msk.f32.mxu1 %vm3957_vm0, %v3956_v2 }
0x1228   : > { %v2283_v62 = vpop.permute.xlu1 %2282 }
0x1229   : > { %v2289_v63 = vsel %vm792_vm3, %v2036_v49, %v2283_v62 }
0x122a   : > { %3780 = vmatmul.mubr.msk.f32.gmra.mxu1 %vm631_vm2, %v2289_v63 }
0x122b   : > { %3831 = vmatprep.mubr.msk.f32.mxu1 %vm3957_vm0, %v3956_v2 }
0x12e2   : > { %v2370_v1 = vpop.f32.mrf.mxu1 }
0x12e3   : > { %v2384_v20 = vadd.f32 %v2370_v1, %v4465_v44 }
0x12e4   : > { %v3775_v21 = vpop.f32.mrf.mxu1 }
0x12e5   : > { %v4672_v3 = vadd.f32 %v2390_v0, %v2384_v20  ;;  %v3339_v21 = vld [vmem:[%s5406_s8 + $0xf8] sm:$0xff] }
0x12e6   : > { %v2375_v4 = vpop.f32.mrf.mxu1  ;;  %3800 = vmatpush3.msra.mxu1 %v3339_v21  ;;  %v2675_v21 = vrot.slane %v4504_v26, %v1648_v27 }
0x12e7   : > { %v2385_v5 = vadd.f32 %v2375_v4, %v4470_v48  ;;  %v2394_v6 = vsel %vm631_vm2, %v4672_v3, 0.0  ;;  %3801 = vmatprep.subr.mxu1 %v3956_v2  ;;  %v3338_v4 = vld [vmem:[%s5406_s8 + $0xf0] sm:$0xff] }
0x12e8   : > { %2395 = vadd.xlane.f32.xlu0 %v2394_v6  ;;  %v3778_v7 = vpop.f32.mrf.mxu1  ;;  %3802 = vmatpush3.msra.mxu1 %v3338_v4  ;;  %v3336_v6 = vld [vmem:[%s5406_s8 + $0xe0] sm:$0xff] }
0x12e9   : > { %v4677_v8 = vadd.f32 %v2390_v0, %v2385_v5  ;;  %3803 = vmatprep.subr.mxu1 %v3956_v2  ;;  %v3337_v5 = vld [vmem:[%s5406_s8 + $0xe8] sm:$0xff]  ;;  %v3335_v7 = vld [vmem:[%s5406_s8 + $0xd8] sm:$0xff] }
0x12ea   : > { %v2380_v10 = vpop.f32.mrf.mxu1  ;;  %3804 = vmatpush3.msra.mxu1 %v3337_v5 }
0x12eb   : > { %v2386_v9 = vadd.f32 %v2380_v10, %v4475_v51  ;;  %v2397_v22 = vsel %vm631_vm2, %v4677_v8, 0.0  ;;  %3805 = vmatprep.subr.mxu1 %v3956_v2  ;;  %v3334_v10 = vld [vmem:[%s5406_s8 + $0xd0] sm:$0xff] }
0x12ec   : > { %2398 = vadd.xlane.f32.xlu1 %v2397_v22  ;;  %v3781_v44 = vpop.f32.mrf.mxu1  ;;  %3806 = vmatpush3.msra.mxu1 %v3336_v6  ;;  %v3332_v22 = vld [vmem:[%s5406_s8 + $0xc0] sm:$0xff] }
0x12ed   : > { %v4682_v11 = vadd.f32 %v2390_v0, %v2386_v9  ;;  %3807 = vmatprep.subr.mxu1 %v3956_v2  ;;  %v3333_v9 = vld [vmem:[%s5406_s8 + $0xc8] sm:$0xff]  ;;  %v3331_v44 = vld [vmem:[%s5406_s8 + $0xb8] sm:$0xff] }
0x12ee   : > { %3808 = vmatpush3.msra.mxu1 %v3335_v7 }
0x12ef   : > { %v2400_v48 = vsel %vm631_vm2, %v4682_v11, 0.0  ;;  %3809 = vmatprep.subr.mxu1 %v3956_v2 }
0x12f0   : > { %2401 = vadd.xlane.f32.xlu0 %v2400_v48  ;;  %3810 = vmatpush3.msra.mxu1 %v3334_v10  ;;  %v3330_v48 = vld [vmem:[%s5406_s8 + $0xb0] sm:$0xff] }
0x12f1   : > { %3811 = vmatprep.subr.mxu1 %v3956_v2 }
0x12f2   : > { %3812 = vmatpush3.msra.mxu1 %v3333_v9 }
0x12f3   : > { %3813 = vmatprep.subr.mxu1 %v3956_v2 }
0x12f4   : > { %3814 = vmatpush3.msra.mxu1 %v3332_v22 }
0x12f5   : > { %3815 = vmatprep.subr.mxu1 %v3956_v2 }
0x12f6   : > { %3816 = vmatpush3.msra.mxu1 %v3331_v44 }
0x12f7   : > { %3817 = vmatprep.subr.mxu1 %v3956_v2 }
0x12f8   : > { %3818 = vmatpush3.msra.mxu1 %v3330_v48 }
0x12f9   : > { %3819 = vmatprep.subr.mxu1 %v3956_v2 }
0x1371   : > { %v2396_v15 = vpop.xlane.xlu0 %2395 }
0x1372   : > { %v2403_v17 = vmul.f32 0.03125, %v2396_v15  ;;  %v3329_v15 = vld [vmem:[%s5406_s8 + $0xa8] sm:$0xff] }
0x1373   : > { %3820 = vmatpush3.msra.mxu1 %v3329_v15 }
0x1374   : > { %v2406_v19 = vsub.f32 %v4672_v3, %v2403_v17  ;;  %3821 = vmatprep.subr.mxu1 %v3956_v2  ;;  %v3328_v17 = vld [vmem:[%s5406_s8 + $0xa0] sm:$0xff] }
0x1375   : > { %v2399_v50 = vpop.xlane.xlu1 %2398  ;;  %3822 = vmatpush3.msra.mxu1 %v3328_v17 }
0x1376   : > { %v2404_v41 = vmul.f32 0.03125, %v2399_v50  ;;  %v2409_v24 = vmul.f32 %v2406_v19, %v2406_v19  ;;  %3823 = vmatprep.subr.mxu1 %v3956_v2  ;;  %v3326_v50 = vld [vmem:[%s5406_s8 + $0x90] sm:$0xff] }
0x1378   : > { %v2407_v51 = vsub.f32 %v4677_v8, %v2404_v41  ;;  %v2412_v28 = vsel %vm631_vm2, %v2409_v24, 0.0  ;;  %v3325_v41 = vld [vmem:[%s5406_s8 + $0x88] sm:$0xff]  ;;  %v3324_v24 = vld [vmem:[%s5406_s8 + $0x80] sm:$0xff] }
0x1379   : > { %2413 = vadd.xlane.f32.xlu0 %v2412_v28  ;;  %v2402_v30 = vpop.xlane.xlu0 %2401 }
0x137a   : > { %v2405_v31 = vmul.f32 0.03125, %v2402_v30  ;;  %v2410_v32 = vmul.f32 %v2407_v51, %v2407_v51 }
0x137c   : > { %v2408_v33 = vsub.f32 %v4682_v11, %v2405_v31  ;;  %v2415_v25 = vsel %vm631_vm2, %v2410_v32, 0.0 }
0x137d   : > { %2416 = vadd.xlane.f32.xlu0 %v2415_v25 }
0x137e   : > { %v2411_v34 = vmul.f32 %v2408_v33, %v2408_v33 }
0x1380   : > { %v2418_v35 = vsel %vm631_vm2, %v2411_v34, 0.0 }
0x1381   : > { %2419 = vadd.xlane.f32.xlu1 %v2418_v35 }
0x1402   : > { %v2414_v40 = vpop.xlane.xlu0 %2413 }
0x1403   : > { %v2421_v42 = vmul.f32 0.03125, %v2414_v40 }
0x1405   : > { %v2424_v43 = vadd.f32 1e-06, %v2421_v42 }
0x1406   : > { %v2417_v18 = vpop.xlane.xlu0 %2416 }
0x1407   : > { %3930 = vrsqrt.f32 %v2424_v43  ;;  %v2422_v46 = vmul.f32 0.03125, %v2417_v18 }
0x1409   : > { %v2425_v47 = vadd.f32 1e-06, %v2422_v46 }
0x140a   : > { %v2420_v49 = vpop.xlane.xlu1 %2419 }
0x140b   : > { %3932 = vrsqrt.f32 %v2425_v47  ;;  %v2423_v57 = vmul.f32 0.03125, %v2420_v49 }
0x140d   : > { %v2426_v37 = vadd.f32 1e-06, %v2423_v57 }
0x140f   : > { %3934 = vrsqrt.f32 %v2426_v37 }
0x1414   : > { %v3931_v52 = vpop.eup %3930 }
0x1415   : > { %v2430_v53 = vmul.f32 %v3931_v52, %v2406_v19  ;;  %v3327_v19 = vld [vmem:[%s5406_s8 + $0x98] sm:$0xff] }
0x1416   : > { %3824 = vmatpush3.msra.mxu1 %v3327_v19 }
0x1417   : > { %v2437_v16 = vmul.f32 %v2436_v23, %v2430_v53  ;;  %3825 = vmatprep.subr.mxu1 %v3956_v2 }
0x1418   : > { %v3933_v59 = vpop.eup %3932  ;;  %3826 = vmatpush3.msra.mxu1 %v3326_v50 }
0x1419   : > { %v2444_v45 = vadd.f32 %v2443_v55, %v2437_v16  ;;  %v2431_v60 = vmul.f32 %v3933_v59, %v2407_v51  ;;  %3827 = vmatprep.subr.mxu1 %v3956_v2  ;;  %v2455_v51 = vrot.slane %v4522_v13, %v4153_v58 }
0x141a   : > { %3828 = vmatpush3.msra.mxu1 %v3325_v41 }
0x141b   : > { %3791 = vmatmul.mubr.msk.f32.vlgmr.msra.gmra.mxu0 %vm631_vm2, %v2444_v45  ;;  %v2438_v61 = vmul.f32 %v2436_v23, %v2431_v60  ;;  %3829 = vmatprep.subr.mxu1 %v3956_v2 }
0x141c   : > { %v3935_v62 = vpop.eup %3934  ;;  %3793 = vmatprep.mubr.msk.f32.mxu0 %vm3957_vm0, %v3956_v2  ;;  %3830 = vmatpush3.msra.mxu1 %v3324_v24 }
0x141d   : > { %v2445_v63 = vadd.f32 %v2443_v55, %v2438_v61  ;;  %v2432_v0 = vmul.f32 %v3935_v62, %v2408_v33 }
0x141f   : > { %3794 = vmatmul.mubr.msk.f32.gmra.mxu0 %vm631_vm2, %v2445_v63  ;;  %v2439_v1 = vmul.f32 %v2436_v23, %v2432_v0 }
0x1420   : > { %3796 = vmatprep.mubr.msk.f32.mxu0 %vm3957_vm0, %v3956_v2 }
0x1421   : > { %v2446_v20 = vadd.f32 %v2443_v55, %v2439_v1 }
0x1423   : > { %3797 = vmatmul.mubr.msk.f32.gmra.mxu0 %vm631_vm2, %v2446_v20 }
0x1424   : > { %2863 = vmatprep.mubr.f32.mxu0 %v3956_v2 }
0x14db   : > { %v2531_v28 = vpop.f32.mrf.mxu0 }
0x14dc   : > { %v2532_v30 = vadd.f32 %v2531_v28, %v2455_v51 }
0x14dd   : > { %v3792_v31 = vpop.f32.mrf.mxu0 }
0x14de   : > { %v2545_v32 = vmul.f32 %v2532_v30, %v2532_v30 }
0x14df   : > { %v2536_v33 = vpop.f32.mrf.mxu0 }
0x14e0   : > { %v2548_v25 = vmul.f32 %v2545_v32, %v2532_v30  ;;  %v2537_v34 = vadd.f32 %v2536_v33, %v2455_v51 }
0x14e1   : > { %v3795_v35 = vpop.f32.mrf.mxu0 }
0x14e2   : > { %v2551_v29 = vmul.f32 0.044715, %v2548_v25  ;;  %v2546_v36 = vmul.f32 %v2537_v34, %v2537_v34 }
0x14e3   : > { %v2541_v38 = vpop.f32.mrf.mxu0 }
0x14e4   : > { %v2554_v39 = vadd.f32 %v2551_v29, %v2532_v30  ;;  %v2549_v40 = vmul.f32 %v2546_v36, %v2537_v34  ;;  %v2542_v42 = vadd.f32 %v2541_v38, %v2455_v51  ;;  %v2783_v36 = vld [vmem:[%s5408_s10 + $0x78] sm:$0xff]  ;;  %v2782_v38 = vld [vmem:[%s5408_s10 + $0x70] sm:$0xff] }
0x14e5   : > { %v3798_v43 = vpop.f32.mrf.mxu0  ;;  %2815 = vmatprep.subr.mxu0 %v2783_v36 }
0x14e6   : > { %v2557_v18 = vmul.f32 0.7978846, %v2554_v39  ;;  %v2552_v46 = vmul.f32 0.044715, %v2549_v40  ;;  %v2547_v47 = vmul.f32 %v2542_v42, %v2542_v42  ;;  %v2781_v39 = vld [vmem:[%s5408_s10 + $0x68] sm:$0xff]  ;;  %v2780_v40 = vld [vmem:[%s5408_s10 + $0x60] sm:$0xff]  ;;  %2816 = vmatpush1.msra.mxu0 %v2782_v38 }
0x14e7   : > { %2817 = vmatprep.subr.mxu0 %v2781_v39  ;;  %v2778_v43 = vld [vmem:[%s5408_s10 + $0x50] sm:$0xff]  ;;  %v2903_v38 = vld [vmem:[%s5410_s12 + $0xf8] sm:$0xff] }
0x14e8   : > { %3936 = vtanh.f32 %v2557_v18  ;;  %v2555_v13 = vadd.f32 %v2552_v46, %v2537_v34  ;;  %v2550_v49 = vmul.f32 %v2547_v47, %v2542_v42  ;;  %2818 = vmatpush1.msra.mxu0 %v2780_v40  ;;  %v2777_v18 = vld [vmem:[%s5408_s10 + $0x48] sm:$0xff]  ;;  %v2776_v46 = vld [vmem:[%s5408_s10 + $0x40] sm:$0xff]  ;;  %v2775_v47 = vld [vmem:[%s5408_s10 + $0x38] sm:$0xff]  ;;  %3019 = vmatprep.subr.mxu1 %v2903_v38 }
0x14e9   : > { %v4878_v39 = vld [vmem:[%s5410_s12 + $0xf0] sm:$0xff] }
0x14ea   : > { %v2558_v57 = vmul.f32 0.7978846, %v2555_v13  ;;  %v2553_v37 = vmul.f32 0.044715, %v2550_v49  ;;  %v2774_v13 = vld [vmem:[%s5408_s10 + $0x30] sm:$0xff]  ;;  %v2773_v49 = vld [vmem:[%s5408_s10 + $0x28] sm:$0xff] }
0x14ec   : > { %3938 = vtanh.f32 %v2558_v57  ;;  %v2556_v23 = vadd.f32 %v2553_v37, %v2542_v42  ;;  %v2772_v57 = vld [vmem:[%s5408_s10 + $0x20] sm:$0xff]  ;;  %v2771_v37 = vld [vmem:[%s5408_s10 + $0x18] sm:$0xff] }
0x14ee   : > { %v2559_v52 = vmul.f32 0.7978846, %v2556_v23  ;;  %v2770_v23 = vld [vmem:[%s5408_s10 + $0x10] sm:$0xff] }
0x14f0   : > { %3940 = vtanh.f32 %v2559_v52  ;;  %v2769_v52 = vld [vmem:[%s5408_s10 + $0x8] sm:$0xff] }
0x14f5   : > { %v3937_v53 = vpop.eup %3936 }
0x14f6   : > { %v2563_v55 = vadd.f32 1.0, %v3937_v53 }
0x14f8   : > { %v2566_v16 = vmul.f32 0.5, %v2563_v55 }
0x14f9   : > { %v3939_v59 = vpop.eup %3938 }
0x14fa   : > { %v2569_v45 = vmul.f32 %v2566_v16, %v2532_v30  ;;  %v2564_v60 = vadd.f32 1.0, %v3939_v59 }
0x14fc   : > { %3832 = vmatmul.mubr.f32.vlgmr.msra.gmra.mxu1 %v2569_v45  ;;  %v2567_v61 = vmul.f32 0.5, %v2564_v60 }
0x14fd   : > { %v3941_v62 = vpop.eup %3940  ;;  %3834 = vmatprep.mubr.msk.f32.mxu1 %vm3957_vm0, %v3956_v2  ;;  %3020 = vmatpush1.msra.mxu1 %v4878_v39 }
0x14fe   : > { %v2570_v63 = vmul.f32 %v2567_v61, %v2537_v34  ;;  %v2565_v0 = vadd.f32 1.0, %v3941_v62 }
0x1500   : > { %3835 = vmatmul.mubr.f32.gmra.mxu1 %v2570_v63  ;;  %v2568_v1 = vmul.f32 0.5, %v2565_v0  ;;  %v2679_v0 = vld [vmem:[%s5407_s9] sm:$0xff] }
0x1501   : > { %3837 = vmatprep.mubr.msk.f32.mxu1 %vm3957_vm0, %v3956_v2 }
0x1502   : > { %v2571_v20 = vmul.f32 %v2568_v1, %v2542_v42  ;;  %v2779_v42 = vld [vmem:[%s5408_s10 + $0x58] sm:$0xff]  ;;  %v2722_v1 = vrot.slane %v2679_v0, %v4145_v56 }
0x1503   : > { %2819 = vmatprep.subr.mxu0 %v2779_v42  ;;  %v4883_v42 = vld [vmem:[%s5410_s12 + $0xe8] sm:$0xff] }
0x1504   : > { %3838 = vmatmul.mubr.f32.gmra.mxu1 %v2571_v20  ;;  %2820 = vmatpush1.msra.mxu0 %v2778_v43  ;;  %v4889_v43 = vld [vmem:[%s5410_s12 + $0xe0] sm:$0xff] }
0x1505   : > { %2821 = vmatprep.subr.mxu0 %v2777_v18  ;;  %3021 = vmatprep.subr.mxu1 %v4883_v42 }
0x1506   : > { %2822 = vmatpush1.msra.mxu0 %v2776_v46  ;;  %v4895_v46 = vld [vmem:[%s5410_s12 + $0xd8] sm:$0xff]  ;;  %3022 = vmatpush1.msra.mxu1 %v4889_v43 }
0x1507   : > { %2823 = vmatprep.subr.mxu0 %v2775_v47  ;;  %v4901_v47 = vld [vmem:[%s5410_s12 + $0xd0] sm:$0xff]  ;;  %3023 = vmatprep.subr.mxu1 %v4895_v46 }
0x1508   : > { %2824 = vmatpush1.msra.mxu0 %v2774_v13  ;;  %3024 = vmatpush1.msra.mxu1 %v4901_v47 }
0x1509   : > { %2825 = vmatprep.subr.mxu0 %v2773_v49  ;;  %v4907_v49 = vld [vmem:[%s5410_s12 + $0xc8] sm:$0xff] }
0x150a   : > { %2826 = vmatpush1.msra.mxu0 %v2772_v57  ;;  %v4913_v57 = vld [vmem:[%s5410_s12 + $0xc0] sm:$0xff]  ;;  %3025 = vmatprep.subr.mxu1 %v4907_v49 }
0x150b   : > { %2827 = vmatprep.subr.mxu0 %v2771_v37  ;;  %3026 = vmatpush1.msra.mxu1 %v4913_v57 }
0x150c   : > { %2828 = vmatpush1.msra.mxu0 %v2770_v23  ;;  %v4919_v23 = vld [vmem:[%s5410_s12 + $0xb8] sm:$0xff] }
0x150d   : > { %2829 = vmatprep.subr.mxu0 %v2769_v52  ;;  %v4925_v52 = vld [vmem:[%s5410_s12 + $0xb0] sm:$0xff]  ;;  %3027 = vmatprep.subr.mxu1 %v4919_v23 }
0x150e   : > { %3028 = vmatpush1.msra.mxu1 %v4925_v52 }
0x15bc   : > { %v2655_v4 = vpop.f32.mrf.mxu1 }
0x15bd   : > { %v2669_v5 = vadd.f32 %v2655_v4, %v4672_v3  ;;  %v2729_v4 = vrot.slane %v2679_v0, %v4153_v58  ;;  %v4979_v0 = vld [vmem:[%s5410_s12 + $0x68] sm:$0xff] }
0x15be   : > { %v3833_v6 = vpop.f32.mrf.mxu1 }
0x15bf   : > { %v2676_v7 = vadd.f32 %v2675_v21, %v2669_v5 }
0x15c0   : > { %v2660_v10 = vpop.f32.mrf.mxu1 }
0x15c1   : > { %v2670_v9 = vadd.f32 %v2660_v10, %v4677_v8  ;;  %v2680_v22 = vsel %vm631_vm2, %v2676_v7, 0.0  ;;  %v498_v10 = vadd.s32 16, %v4142_v54 }
0x15c2   : > { %2681 = vadd.xlane.f32.xlu0 %v2680_v22  ;;  %v3836_v44 = vpop.f32.mrf.mxu1  ;;  %v3250_v22 = vsel %vm499_vm6, 1.0, %v3956_v2 }
0x15c3   : > { %v2677_v48 = vadd.f32 %v2675_v21, %v2670_v9  ;;  %vm513_vm8 = vcmp.lt.s32.totalorder %v498_v10, 17  ;;  %v5027_v10 = vld [vmem:[%s5410_s12 + $0x28] sm:$0xff] }
0x15c4   : > { %v2665_v15 = vpop.f32.mrf.mxu1 }
0x15c5   : > { %v2671_v17 = vadd.f32 %v2665_v15, %v4682_v11  ;;  %v2683_v19 = vsel %vm631_vm2, %v2677_v48, 0.0  ;;  %v3251_v15 = vsel %vm508_vm7, 1.0, %v3956_v2 }
0x15c6   : > { %2684 = vadd.xlane.f32.xlu1 %v2683_v19  ;;  %v3839_v27 = vpop.f32.mrf.mxu1 }
0x15c7   : > { %v2678_v26 = vadd.f32 %v2675_v21, %v2671_v17 }
0x15c9   : > { %v2686_v3 = vsel %vm631_vm2, %v2678_v26, 0.0 }
0x15ca   : > { %2687 = vadd.xlane.f32.xlu0 %v2686_v3 }
0x164b   : > { %v2682_v50 = vpop.xlane.xlu0 %2681 }
0x164c   : > { %v2689_v41 = vmul.f32 0.03125, %v2682_v50 }
0x164e   : > { %v2692_v24 = vsub.f32 %v2676_v7, %v2689_v41  ;;  %v3252_v41 = vsel %vm513_vm8, 1.0, %v3956_v2 }
0x164f   : > { %v2685_v8 = vpop.xlane.xlu1 %2684 }
0x1650   : > { %v2690_v51 = vmul.f32 0.03125, %v2685_v8  ;;  %v2695_v28 = vmul.f32 %v2692_v24, %v2692_v24 }
0x1652   : > { %v2693_v30 = vsub.f32 %v2677_v48, %v2690_v51  ;;  %v2698_v31 = vsel %vm631_vm2, %v2695_v28, 0.0 }
0x1653   : > { %2699 = vadd.xlane.f32.xlu1 %v2698_v31  ;;  %v2688_v32 = vpop.xlane.xlu0 %2687 }
0x1654   : > { %v2691_v11 = vmul.f32 0.03125, %v2688_v32  ;;  %v2696_v33 = vmul.f32 %v2693_v30, %v2693_v30 }
0x1656   : > { %v4798_v25 = vsub.f32 %v2678_v26, %v2691_v11  ;;  %v2701_v34 = vsel %vm631_vm2, %v2696_v33, 0.0 }
0x1657   : > { %2702 = vadd.xlane.f32.xlu0 %v2701_v34 }
0x1658   : > { %v2697_v35 = vmul.f32 %v4798_v25, %v4798_v25 }
0x165a   : > { %v2704_v29 = vsel %vm631_vm2, %v2697_v35, 0.0 }
0x165b   : > { %2705 = vadd.xlane.f32.xlu1 %v2704_v29  ;;  %v2768_v29 = vld [vmem:[%s5408_s10] sm:$0xff] }
0x165c   : > { %2830 = vmatpush1.msra.mxu0 %v2768_v29  ;;  %v5183_v29 = vld [vmem:[%s5410_s12 + $0x158] sm:$0xff] }
0x165d   : > { %2946 = vmatprep.subr.mxu0 %v2903_v38  ;;  %v5195_v38 = vld [vmem:[%s5410_s12 + $0x148] sm:$0xff] }
0x16dc   : > { %v2700_v53 = vpop.xlane.xlu1 %2699 }
0x16dd   : > { %v2707_v55 = vmul.f32 0.03125, %v2700_v53 }
0x16df   : > { %v2710_v16 = vadd.f32 1e-06, %v2707_v55  ;;  %v4931_v55 = vld [vmem:[%s5410_s12 + $0xa8] sm:$0xff] }
0x16e0   : > { %v2703_v59 = vpop.xlane.xlu0 %2702  ;;  %3029 = vmatprep.subr.mxu1 %v4931_v55 }
0x16e1   : > { %3942 = vrsqrt.f32 %v2710_v16  ;;  %v2708_v45 = vmul.f32 0.03125, %v2703_v59  ;;  %v4937_v16 = vld [vmem:[%s5410_s12 + $0xa0] sm:$0xff]  ;;  %v4943_v59 = vld [vmem:[%s5410_s12 + $0x98] sm:$0xff] }
0x16e2   : > { %3030 = vmatpush1.msra.mxu1 %v4937_v16 }
0x16e3   : > { %v2711_v60 = vadd.f32 1e-06, %v2708_v45  ;;  %v4949_v45 = vld [vmem:[%s5410_s12 + $0x90] sm:$0xff]  ;;  %3031 = vmatprep.subr.mxu1 %v4943_v59 }
0x16e4   : > { %v2706_v61 = vpop.xlane.xlu1 %2705  ;;  %3032 = vmatpush1.msra.mxu1 %v4949_v45 }
0x16e5   : > { %3944 = vrsqrt.f32 %v2711_v60  ;;  %v2709_v62 = vmul.f32 0.03125, %v2706_v61  ;;  %v4955_v60 = vld [vmem:[%s5410_s12 + $0x88] sm:$0xff]  ;;  %v4961_v61 = vld [vmem:[%s5410_s12 + $0x80] sm:$0xff] }
0x16e6   : > { %3033 = vmatprep.subr.mxu1 %v4955_v60 }
0x16e7   : > { %v2712_v63 = vadd.f32 1e-06, %v2709_v62  ;;  %v4967_v62 = vld [vmem:[%s5410_s12 + $0x78] sm:$0xff]  ;;  %3034 = vmatpush1.msra.mxu1 %v4961_v61 }
0x16e8   : > { %3035 = vmatprep.subr.mxu1 %v4967_v62 }
0x16e9   : > { %3946 = vrsqrt.f32 %v2712_v63  ;;  %v4973_v63 = vld [vmem:[%s5410_s12 + $0x70] sm:$0xff] }
0x16ea   : > { %3036 = vmatpush1.msra.mxu1 %v4973_v63 }
0x16eb   : > { %3037 = vmatprep.subr.mxu1 %v4979_v0 }
0x16ee   : > { %v3943_v20 = vpop.eup %3942 }
0x16ef   : > { %v2716_v21 = vmul.f32 %v3943_v20, %v2692_v24  ;;  %v4991_v20 = vld [vmem:[%s5410_s12 + $0x58] sm:$0xff] }
0x16f1   : > { %v2723_v5 = vmul.f32 %v2722_v1, %v2716_v21  ;;  %v4997_v21 = vld [vmem:[%s5410_s12 + $0x50] sm:$0xff] }
0x16f2   : > { %v3945_v6 = vpop.eup %3944 }
0x16f3   : > { %v2717_v7 = vmul.f32 %v3945_v6, %v2693_v30  ;;  %v2730_v9 = vadd.f32 %v2729_v4, %v2723_v5  ;;  %v5009_v5 = vld [vmem:[%s5410_s12 + $0x40] sm:$0xff]  ;;  %v5015_v6 = vld [vmem:[%s5410_s12 + $0x38] sm:$0xff] }
0x16f5   : > { %v2724_v44 = vmul.f32 %v2722_v1, %v2717_v7  ;;  %v2733_v27 = vmul.f32 %v3250_v22, %v2730_v9  ;;  %v2747_v3 = vmul.f32 %v3251_v15, %v2730_v9  ;;  %v5021_v7 = vld [vmem:[%s5410_s12 + $0x30] sm:$0xff]  ;;  %v5033_v9 = vld [vmem:[%s5410_s12 + $0x20] sm:$0xff]  ;;  %v5039_v22 = vld [vmem:[%s5410_s12 + $0x18] sm:$0xff] }
0x16f6   : > { %v3947_v48 = vpop.eup %3946  ;;  %v5057_v15 = vld [vmem:[%s5410_s12] sm:$0xff] }
0x16f7   : > { %v2718_v17 = vmul.f32 %v3947_v48, %v4798_v25  ;;  %v2731_v19 = vadd.f32 %v2729_v4, %v2724_v44  ;;  %v2736_v8 = vsel %vm631_vm2, %v2733_v27, 0.0  ;;  %v2750_v31 = vsel %vm631_vm2, %v2747_v3, 0.0  ;;  %v5045_v44 = vld [vmem:[%s5410_s12 + $0x10] sm:$0xff]  ;;  %v5051_v48 = vld [vmem:[%s5410_s12 + $0x8] sm:$0xff]  ;;  %v5087_v3 = vld [vmem:[%s5410_s12 + $0x1d8] sm:$0xff] }
0x16f8   : > { %v5075_v27 = vld [vmem:[%s5410_s12 + $0x1e8] sm:$0xff] }
0x16f9   : > { %v2725_v26 = vmul.f32 %v2722_v1, %v2718_v17  ;;  %v2734_v50 = vmul.f32 0.0, %v2731_v19  ;;  %v2751_v54 = vsel %vm631_vm2, %v2731_v19, 0.0  ;;  %v4985_v1 = vld [vmem:[%s5410_s12 + $0x60] sm:$0xff]  ;;  %v5063_v17 = vld [vmem:[%s5410_s12 + $0x1f8] sm:$0xff]  ;;  %v5069_v19 = vld [vmem:[%s5410_s12 + $0x1f0] sm:$0xff] }
0x16fa   : > { %v2752_v11 = vadd.f32 %v2751_v54, %v2750_v31  ;;  %3038 = vmatpush1.msra.mxu1 %v4985_v1  ;;  %v5111_v54 = vld [vmem:[%s5410_s12 + $0x1b8] sm:$0xff]  ;;  %v5141_v31 = vld [vmem:[%s5410_s12 + $0x190] sm:$0xff] }
0x16fb   : > { %v2732_v24 = vadd.f32 %v2729_v4, %v2725_v26  ;;  %v2737_v51 = vsel %vm631_vm2, %v2734_v50, 0.0  ;;  %3039 = vmatprep.subr.mxu1 %v4991_v20  ;;  %v5003_v4 = vld [vmem:[%s5410_s12 + $0x48] sm:$0xff]  ;;  %v5081_v26 = vld [vmem:[%s5410_s12 + $0x1e0] sm:$0xff]  ;;  %v5093_v50 = vld [vmem:[%s5410_s12 + $0x1d0] sm:$0xff] }
0x16fc   : > { %v2738_v28 = vadd.f32 %v2737_v51, %v2736_v8  ;;  %3040 = vmatpush1.msra.mxu1 %v4997_v21  ;;  %v5117_v8 = vld [vmem:[%s5410_s12 + $0x1b0] sm:$0xff]  ;;  %v5123_v51 = vld [vmem:[%s5410_s12 + $0x1a8] sm:$0xff] }
0x16fd   : > { %v2749_v30 = vmul.f32 %v3252_v41, %v2732_v24  ;;  %v2735_v32 = vmul.f32 0.0, %v2732_v24  ;;  %3041 = vmatprep.subr.mxu1 %v5003_v4  ;;  %v5099_v41 = vld [vmem:[%s5410_s12 + $0x1c8] sm:$0xff]  ;;  %v5105_v24 = vld [vmem:[%s5410_s12 + $0x1c0] sm:$0xff] }
0x16fe   : > { %3042 = vmatpush1.msra.mxu1 %v5009_v5 }
0x16ff   : > { %v2753_v33 = vsel %vm631_vm2, %v2749_v30, 0.0  ;;  %v2739_v25 = vsel %vm631_vm2, %v2735_v32, 0.0  ;;  %3043 = vmatprep.subr.mxu1 %v5015_v6  ;;  %v5135_v30 = vld [vmem:[%s5410_s12 + $0x198] sm:$0xff]  ;;  %v5147_v32 = vld [vmem:[%s5410_s12 + $0x188] sm:$0xff] }
0x1700   : > { %v2754_v34 = vadd.f32 %v2753_v33, %v2752_v11  ;;  %v4867_v35 = vadd.f32 %v2739_v25, %v2738_v28  ;;  %3044 = vmatpush1.msra.mxu1 %v5021_v7  ;;  %v5129_v28 = vld [vmem:[%s5410_s12 + $0x1a0] sm:$0xff]  ;;  %v5159_v33 = vld [vmem:[%s5410_s12 + $0x178] sm:$0xff]  ;;  %v5165_v25 = vld [vmem:[%s5410_s12 + $0x170] sm:$0xff] }
0x1701   : > { %3045 = vmatprep.subr.mxu1 %v5027_v10  ;;  %v5153_v11 = vld [vmem:[%s5410_s12 + $0x180] sm:$0xff] }
0x1702   : > { %v2755_v2 = vrot.slane %v2754_v34, 4  ;;  %3046 = vmatpush1.msra.mxu1 %v5033_v9 }
0x1703   : > { %3047 = vmatprep.subr.mxu1 %v5039_v22 }
0x1704   : > { %v2756_v36 = vadd.f32 %v2755_v2, %v2754_v34  ;;  %3048 = vmatpush1.msra.mxu1 %v5045_v44  ;;  %v5171_v34 = vld [vmem:[%s5410_s12 + $0x168] sm:$0xff]  ;;  %v5177_v2 = vld [vmem:[%s5410_s12 + $0x160] sm:$0xff] }
0x1705   : > { %3049 = vmatprep.subr.mxu1 %v5051_v48 }
0x1706   : > { %v2757_v40 = vrot.slane %v2756_v36, 2  ;;  %3050 = vmatpush1.msra.mxu1 %v5057_v15 }
0x1707   : > { %3051 = vmatprep.subr.mxu1 %v5063_v17 }
0x1708   : > { %v2758_v18 = vadd.f32 %v2757_v40, %v2756_v36  ;;  %3052 = vmatpush2.msra.mxu1 %v5069_v19  ;;  %v5189_v36 = vld [vmem:[%s5410_s12 + $0x150] sm:$0xff]  ;;  %v5201_v40 = vld [vmem:[%s5410_s12 + $0x140] sm:$0xff] }
0x1709   : > { %3053 = vmatprep.subr.mxu1 %v5075_v27 }
0x170a   : > { %v2759_v13 = vrot.slane %v2758_v18, 1  ;;  %3054 = vmatpush2.msra.mxu1 %v5081_v26 }
0x170b   : > { %3055 = vmatprep.subr.mxu1 %v5087_v3 }
0x170c   : > { %v2760_v37 = vadd.f32 %v2759_v13, %v2758_v18  ;;  %3056 = vmatpush2.msra.mxu1 %v5093_v50  ;;  %v2741_v18 = vrot.slane %v4867_v35, 4 }
0x170d   : > { %3057 = vmatprep.subr.mxu1 %v5099_v41 }
0x170e   : > { %v2761_v53 = vmul.f32 0.0625, %v2760_v37  ;;  %3058 = vmatpush2.msra.mxu1 %v5105_v24  ;;  %v2742_v13 = vadd.f32 %v2741_v18, %v4867_v35  ;;  %v2907_v35 = vld [vmem:[%s5410_s12 + $0x118] sm:$0xff]  ;;  %v3092_v18 = vld [vmem:[%s5411_s13] sm:$0xff] }
0x170f   : > { %3059 = vmatprep.subr.mxu1 %v5111_v54 }
0x1710   : > { %2763 = vrot.lane.b32.xlu0 %v2761_v53, %s3965_s27  ;;  %3060 = vmatpush2.msra.mxu1 %v5117_v8  ;;  %v2743_v37 = vrot.slane %v2742_v13, 2 }
0x1711   : > { %3061 = vmatprep.subr.mxu1 %v5123_v51 }
0x1712   : > { %3062 = vmatpush2.msra.mxu1 %v5129_v28  ;;  %v2744_v53 = vadd.f32 %v2743_v37, %v2742_v13 }
0x1713   : > { %3063 = vmatprep.subr.mxu1 %v5135_v30 }
0x1714   : > { %3064 = vmatpush2.msra.mxu1 %v5141_v31  ;;  %v2745_v14 = vrot.slane %v2744_v53, 1 }
0x1715   : > { %3065 = vmatprep.subr.mxu1 %v5147_v32 }
0x1716   : > { %3066 = vmatpush2.msra.mxu1 %v5153_v11  ;;  %v2746_v58 = vadd.f32 %v2745_v14, %v2744_v53  ;;  %v2908_v14 = vld [vmem:[%s5410_s12 + $0x120] sm:$0xff] }
0x1717   : > { %3067 = vmatprep.subr.mxu1 %v5159_v33 }
0x1718   : > { %3068 = vmatpush2.msra.mxu1 %v5165_v25 }
0x1719   : > { %3069 = vmatprep.subr.mxu1 %v5171_v34 }
0x171a   : > { %3070 = vmatpush2.msra.mxu1 %v5177_v2 }
0x171b   : > { %3071 = vmatprep.subr.mxu1 %v5183_v29 }
0x171c   : > { %3072 = vmatpush2.msra.mxu1 %v5189_v36 }
0x171d   : > { %3073 = vmatprep.subr.mxu1 %v5195_v38 }
0x171e   : > { %3074 = vmatpush2.msra.mxu1 %v5201_v40 }
0x1782   : > { %v2764_v12 = vpop.permute.xlu0 %2763 }
0x1783   : > { %v2766_v56 = vsel %vm631_vm2, %v2746_v58, %v2764_v12  ;;  %v2910_v58 = vld [vmem:[%s5410_s12 + $0x130] sm:$0xff]  ;;  %v2909_v12 = vld [vmem:[%s5410_s12 + $0x128] sm:$0xff] }
0x1784   : > { %3340 = vmatmul.mubr.msk.f32.vlgmr.msra.gmra.mxu0 %vm2795_vm9, %v2766_v56  ;;  %v2911_v56 = vld [vmem:[%s5410_s12 + $0x138] sm:$0xff] }
0x1785   : > { %2947 = vmatpush1.msra.mxu0 %v4878_v39  ;;  %3075 = vmatprep.subr.mxu1 %v2911_v56  ;;  %v2906_v39 = vld [vmem:[%s5410_s12 + $0x110] sm:$0xff] }
0x1786   : > { %2948 = vmatprep.subr.mxu0 %v4883_v42  ;;  %3076 = vmatpush2.msra.mxu1 %v2910_v58  ;;  %v2905_v42 = vld [vmem:[%s5410_s12 + $0x108] sm:$0xff] }
0x1787   : > { %2949 = vmatpush1.msra.mxu0 %v4889_v43  ;;  %3077 = vmatprep.subr.mxu1 %v2909_v12  ;;  %v2904_v43 = vld [vmem:[%s5410_s12 + $0x100] sm:$0xff] }
0x1788   : > { %2950 = vmatprep.subr.mxu0 %v4895_v46  ;;  %3078 = vmatpush2.msra.mxu1 %v2908_v14  ;;  %v2767_v46 = vld [vmem:[%s5409_s11] sm:$0xf] }
0x1789   : > { %2951 = vmatpush1.msra.mxu0 %v4901_v47  ;;  %3079 = vmatprep.subr.mxu1 %v2907_v35  ;;  %v5422_v47 = vld [vmem:[#allocation3_spill] sm:$0xff] }
0x178a   : > { %2952 = vmatprep.subr.mxu0 %v4907_v49  ;;  %3080 = vmatpush2.msra.mxu1 %v2906_v39  ;;  %v2788_v49 = vrot.slane %v2767_v46, %v5422_v47 }
0x178b   : > { %2953 = vmatpush1.msra.mxu0 %v4913_v57  ;;  %3081 = vmatprep.subr.mxu1 %v2905_v42  ;;  %v5423_v57 = vld [vmem:[#allocation5_spill] sm:$0xff] }
0x178c   : > { %2954 = vmatprep.subr.mxu0 %v4919_v23  ;;  %3082 = vmatpush2.msra.mxu1 %v2904_v43  ;;  %v2792_v23 = vrot.slane %v2767_v46, %v5423_v57 }
0x178d   : > { %2955 = vmatpush1.msra.mxu0 %v4925_v52 }
0x178e   : > { %2956 = vmatprep.subr.mxu0 %v4931_v55 }
0x178f   : > { %2957 = vmatpush1.msra.mxu0 %v4937_v16 }
0x1790   : > { %2958 = vmatprep.subr.mxu0 %v4943_v59 }
0x1791   : > { %2959 = vmatpush1.msra.mxu0 %v4949_v45 }
0x1792   : > { %2960 = vmatprep.subr.mxu0 %v4955_v60 }
0x1793   : > { %2961 = vmatpush1.msra.mxu0 %v4961_v61  ;;  %v3123_v61 = vld [vmem:[%s5411_s13 + $0xf8] sm:$0xff] }
0x1794   : > { %2962 = vmatprep.subr.mxu0 %v4967_v62  ;;  %v3107_v62 = vld [vmem:[%s5411_s13 + $0x78] sm:$0xff] }
0x1795   : > { %2963 = vmatpush1.msra.mxu0 %v4973_v63  ;;  %v3122_v63 = vld [vmem:[%s5411_s13 + $0xf0] sm:$0xff] }
0x1796   : > { %2964 = vmatprep.subr.mxu0 %v4979_v0  ;;  %v3106_v0 = vld [vmem:[%s5411_s13 + $0x70] sm:$0xff] }
0x1797   : > { %2965 = vmatpush1.msra.mxu0 %v4985_v1  ;;  %v3121_v1 = vld [vmem:[%s5411_s13 + $0xe8] sm:$0xff] }
0x1798   : > { %2966 = vmatprep.subr.mxu0 %v4991_v20  ;;  %v3105_v20 = vld [vmem:[%s5411_s13 + $0x68] sm:$0xff] }
0x1799   : > { %2967 = vmatpush1.msra.mxu0 %v4997_v21  ;;  %v3120_v21 = vld [vmem:[%s5411_s13 + $0xe0] sm:$0xff] }
0x179a   : > { %2968 = vmatprep.subr.mxu0 %v5003_v4  ;;  %v3104_v4 = vld [vmem:[%s5411_s13 + $0x60] sm:$0xff] }
0x179b   : > { %2969 = vmatpush1.msra.mxu0 %v5009_v5  ;;  %v3119_v5 = vld [vmem:[%s5411_s13 + $0xd8] sm:$0xff] }
0x179c   : > { %2970 = vmatprep.subr.mxu0 %v5015_v6  ;;  %v3103_v6 = vld [vmem:[%s5411_s13 + $0x58] sm:$0xff] }
0x179d   : > { %2971 = vmatpush1.msra.mxu0 %v5021_v7  ;;  %v3118_v7 = vld [vmem:[%s5411_s13 + $0xd0] sm:$0xff] }
0x179e   : > { %2972 = vmatprep.subr.mxu0 %v5027_v10  ;;  %v3102_v10 = vld [vmem:[%s5411_s13 + $0x50] sm:$0xff] }
0x179f   : > { %2973 = vmatpush1.msra.mxu0 %v5033_v9  ;;  %v3117_v9 = vld [vmem:[%s5411_s13 + $0xc8] sm:$0xff] }
0x17a0   : > { %2974 = vmatprep.subr.mxu0 %v5039_v22  ;;  %v3101_v22 = vld [vmem:[%s5411_s13 + $0x48] sm:$0xff] }
0x17a1   : > { %2975 = vmatpush1.msra.mxu0 %v5045_v44  ;;  %v3116_v44 = vld [vmem:[%s5411_s13 + $0xc0] sm:$0xff] }
0x17a2   : > { %2976 = vmatprep.subr.mxu0 %v5051_v48  ;;  %v3100_v48 = vld [vmem:[%s5411_s13 + $0x40] sm:$0xff] }
0x17a3   : > { %2977 = vmatpush1.msra.mxu0 %v5057_v15  ;;  %v3115_v15 = vld [vmem:[%s5411_s13 + $0xb8] sm:$0xff] }
0x17a4   : > { %2978 = vmatprep.subr.mxu0 %v5063_v17  ;;  %v3099_v17 = vld [vmem:[%s5411_s13 + $0x38] sm:$0xff] }
0x17a5   : > { %2979 = vmatpush2.msra.mxu0 %v5069_v19  ;;  %v3114_v19 = vld [vmem:[%s5411_s13 + $0xb0] sm:$0xff] }
0x17a6   : > { %2980 = vmatprep.subr.mxu0 %v5075_v27  ;;  %v3098_v27 = vld [vmem:[%s5411_s13 + $0x30] sm:$0xff] }
0x17a7   : > { %2981 = vmatpush2.msra.mxu0 %v5081_v26  ;;  %v3113_v26 = vld [vmem:[%s5411_s13 + $0xa8] sm:$0xff] }
0x17a8   : > { %2982 = vmatprep.subr.mxu0 %v5087_v3  ;;  %v3097_v3 = vld [vmem:[%s5411_s13 + $0x28] sm:$0xff] }
0x17a9   : > { %2983 = vmatpush2.msra.mxu0 %v5093_v50  ;;  %v3112_v50 = vld [vmem:[%s5411_s13 + $0xa0] sm:$0xff] }
0x17aa   : > { %2984 = vmatprep.subr.mxu0 %v5099_v41  ;;  %v3096_v41 = vld [vmem:[%s5411_s13 + $0x20] sm:$0xff] }
0x17ab   : > { %2985 = vmatpush2.msra.mxu0 %v5105_v24  ;;  %v5424_v24 = vld [vmem:[#allocation4_spill] sm:$0xff] }
0x17ac   : > { %2986 = vmatprep.subr.mxu0 %v5111_v54  ;;  %v2939_v54 = vrot.slane %v2767_v46, %v5424_v24 }
0x17ad   : > { %2987 = vmatpush2.msra.mxu0 %v5117_v8  ;;  %v5425_v8 = vld [vmem:[#allocation6_spill] sm:$0xff] }
0x17ae   : > { %2988 = vmatprep.subr.mxu0 %v5123_v51  ;;  %v2943_v51 = vrot.slane %v2767_v46, %v5425_v8 }
0x17af   : > { %2989 = vmatpush2.msra.mxu0 %v5129_v28 }
0x17b0   : > { %2990 = vmatprep.subr.mxu0 %v5135_v30 }
0x17b1   : > { %2991 = vmatpush2.msra.mxu0 %v5141_v31 }
0x17b2   : > { %2992 = vmatprep.subr.mxu0 %v5147_v32 }
0x17b3   : > { %2993 = vmatpush2.msra.mxu0 %v5153_v11 }
0x17b4   : > { %2994 = vmatprep.subr.mxu0 %v5159_v33 }
0x17b5   : > { %2995 = vmatpush2.msra.mxu0 %v5165_v25  ;;  %v3111_v25 = vld [vmem:[%s5411_s13 + $0x98] sm:$0xff] }
0x17b6   : > { %2996 = vmatprep.subr.mxu0 %v5171_v34  ;;  %v3095_v34 = vld [vmem:[%s5411_s13 + $0x18] sm:$0xff] }
0x17b7   : > { %2997 = vmatpush2.msra.mxu0 %v5177_v2  ;;  %v3110_v2 = vld [vmem:[%s5411_s13 + $0x90] sm:$0xff] }
0x17b8   : > { %2998 = vmatprep.subr.mxu0 %v5183_v29  ;;  %v3094_v29 = vld [vmem:[%s5411_s13 + $0x10] sm:$0xff] }
0x17b9   : > { %2999 = vmatpush2.msra.mxu0 %v5189_v36  ;;  %v3109_v36 = vld [vmem:[%s5411_s13 + $0x88] sm:$0xff] }
0x17ba   : > { %3000 = vmatprep.subr.mxu0 %v5195_v38  ;;  %v3093_v38 = vld [vmem:[%s5411_s13 + $0x8] sm:$0xff] }
0x17bb   : > { %3001 = vmatpush2.msra.mxu0 %v5201_v40  ;;  %v3108_v40 = vld [vmem:[%s5411_s13 + $0x80] sm:$0xff] }
0x17bc   : > { %3002 = vmatprep.subr.mxu0 %v2911_v56 }
0x17bd   : > { %3003 = vmatpush2.msra.mxu0 %v2910_v58 }
0x17be   : > { %3004 = vmatprep.subr.mxu0 %v2909_v12 }
0x17bf   : > { %3005 = vmatpush2.msra.mxu0 %v2908_v14 }
0x17c0   : > { %3006 = vmatprep.subr.mxu0 %v2907_v35  ;;  %v3124_v35 = vld [vmem:[#allocation2] sm:$0x1] }
0x17c1   : > { %3007 = vmatpush2.msra.mxu0 %v2906_v39 }
0x17c2   : > { %3008 = vmatprep.subr.mxu0 %v2905_v42 }
0x17c3   : > { %3009 = vmatpush2.msra.mxu0 %v2904_v43 }
0x17c4   : > { %3480 = vmatprep.subr.mxu0 %v3123_v61 }
0x1844   : > { %v2865_v52 = vpop.f32.mrf.mxu0 }
0x1845   : > { %v2866_v55 = vadd.f32 %v2865_v52, %v2788_v49 }
0x1846   : > { %v2867_v16 = vpop.f32.mrf.mxu0 }
0x1847   : > { %v2868_v59 = vadd.f32 %v2867_v16, %v2792_v23  ;;  %v2870_v60 = vmax.f32 %v2866_v55, 0.0 }
0x1849   : > { %v2871_v45 = vmax.f32 %v2868_v59, 0.0 }
0x184b   : > { %3010 = vmatprep.mubr.f32.mxu0 %v2871_v45 }
0x184c   : > { %3011 = vmatmul.mubr.f32.vlgmr.msra.gmra.mxu0 %v2870_v60 }
0x184d   : > { %3481 = vmatpush3.msra.mxu0 %v3107_v62 }
0x184e   : > { %3482 = vmatprep.subr.mxu0 %v3122_v63 }
0x184f   : > { %3483 = vmatpush3.msra.mxu0 %v3106_v0 }
0x1850   : > { %3484 = vmatprep.subr.mxu0 %v3121_v1 }
0x1851   : > { %3485 = vmatpush3.msra.mxu0 %v3105_v20 }
0x1852   : > { %3486 = vmatprep.subr.mxu0 %v3120_v21 }
0x1853   : > { %3487 = vmatpush3.msra.mxu0 %v3104_v4 }
0x1854   : > { %3488 = vmatprep.subr.mxu0 %v3119_v5 }
0x1855   : > { %3489 = vmatpush3.msra.mxu0 %v3103_v6 }
0x1856   : > { %3490 = vmatprep.subr.mxu0 %v3118_v7 }
0x1857   : > { %3491 = vmatpush3.msra.mxu0 %v3102_v10 }
0x1858   : > { %3492 = vmatprep.subr.mxu0 %v3117_v9 }
0x1859   : > { %3493 = vmatpush3.msra.mxu0 %v3101_v22 }
0x185a   : > { %3494 = vmatprep.subr.mxu0 %v3116_v44 }
0x185b   : > { %3495 = vmatpush3.msra.mxu0 %v3100_v48 }
0x185c   : > { %3496 = vmatprep.subr.mxu0 %v3115_v15 }
0x185d   : > { %3497 = vmatpush3.msra.mxu0 %v3099_v17 }
0x185e   : > { %3498 = vmatprep.subr.mxu0 %v3114_v19 }
0x185f   : > { %3499 = vmatpush3.msra.mxu0 %v3098_v27 }
0x1860   : > { %3500 = vmatprep.subr.mxu0 %v3113_v26 }
0x1861   : > { %3501 = vmatpush3.msra.mxu0 %v3097_v3 }
0x1862   : > { %3502 = vmatprep.subr.mxu0 %v3112_v50 }
0x1863   : > { %3503 = vmatpush3.msra.mxu0 %v3096_v41 }
0x1864   : > { %3504 = vmatprep.subr.mxu0 %v3111_v25 }
0x1865   : > { %3505 = vmatpush3.msra.mxu0 %v3095_v34 }
0x1866   : > { %3506 = vmatprep.subr.mxu0 %v3110_v2 }
0x1867   : > { %3507 = vmatpush3.msra.mxu0 %v3094_v29 }
0x1868   : > { %3508 = vmatprep.subr.mxu0 %v3109_v36 }
0x1869   : > { %3509 = vmatpush3.msra.mxu0 %v3093_v38 }
0x186a   : > { %3510 = vmatprep.subr.mxu0 %v3108_v40 }
0x186b   : > { %3511 = vmatpush3.msra.mxu0 %v3092_v18 }
0x190c   : > { %v3012_v28 = vpop.f32.mrf.mxu0 }
0x190d   : > { %v3013_v30 = vadd.f32 %v3012_v28, %v2939_v54 }
0x190e   : > { %v3014_v31 = vpop.f32.mrf.mxu0 }
0x190f   : > { %v3015_v32 = vadd.f32 %v3014_v31, %v2943_v51  ;;  %v3017_v33 = vmax.f32 %v3013_v30, 0.0 }
0x1911   : > { %v3018_v11 = vmax.f32 %v3015_v32, 0.0 }
0x1913   : > { %3083 = vmatprep.mubr.f32.mxu1 %v3018_v11 }
0x1914   : > { %3084 = vmatmul.mubr.f32.vlgmr.msra.gmra.mxu1 %v3017_v33 }
0x19d4   : > { %v3085_v13 = vpop.f32.mrf.mxu1 }
0x19d5   : > { %v3086_v37 = vadd.f32 %v3085_v13, %v2939_v54 }
0x19d6   : > { %v3087_v53 = vpop.f32.mrf.mxu1 }
0x19d7   : > { %v3088_v56 = vadd.f32 %v3087_v53, %v2943_v51  ;;  %v3090_v12 = vmax.f32 %v3086_v37, 0.0 }
0x19d9   : > { %v3091_v58 = vmax.f32 %v3088_v56, 0.0 }
0x19db   : > { %3189 = vmatprep.mubr.f32.mxu0 %v3091_v58 }
0x19dc   : > { %3190 = vmatmul.mubr.f32.vlgmr.msra.gmra.mxu0 %v3090_v12 }
0x1a9c   : > { %v3512_v14 = vpop.f32.mrf.mxu0 }
0x1a9e   : > { %v3513_v39 = vpop.f32.mrf.mxu0 }
0x1a9f   : > { %v3514_v42 = vadd.f32 %v3513_v39, %v3512_v14 }
0x1aa1   : > { %v3192_v43 = vadd.f32 %v3514_v42, %v3124_v35 }
0x1aa3   : > { %3196 = vst.msk [vmem:[%s494_s23] sm:$0x1] %vm3195_vm10, %v3192_v43 }
0x1aa4 PF: > { %s27_s20 = sadd.s32 1, %s3954_s20  }
0x1aa5   : > { %p24_p5 = scmp.ge.s32.totalorder %s27_s20, 4  }
0x1aa7   :  { %26 = sbr.rel (!%p24_p5) target bundleno = 3 (0x3), region = 116 }

</bundles_post_ra>
